<compile_context>
chip_gen: v5e
topology: v5e:2x2
jax: 0.10.0
libtpu: 0.0.40
codegen_flags: <defaults>
</compile_context>

<pallas_src>
import functools

import jax
import jax.numpy as jnp
from jax.experimental import pallas as pl
from jax.experimental.pallas import tpu as pltpu


# ----------------------------------------------------------------------------
# Tiled matmul with fused bias / optional ReLU / optional residual epilogue.
# ----------------------------------------------------------------------------
def _pick_tile(dim, target, align):
    """Largest aligned tile <= target that divides dim (or the full dim)."""
    if dim <= target:
        return dim
    t = (target // align) * align
    while t >= align:
        if dim % t == 0:
            return t
        t -= align
    return dim


def _matmul_kernel(*refs, act, has_res):
    if has_res:
        x_ref, w_ref, b_ref, res_ref, o_ref, acc_ref = refs
    else:
        x_ref, w_ref, b_ref, o_ref, acc_ref = refs
        res_ref = None

    @pl.when(pl.program_id(2) == 0)
    def _init():
        acc_ref[...] = jnp.zeros_like(acc_ref)

    acc_ref[...] += jnp.dot(x_ref[...], w_ref[...],
                            preferred_element_type=jnp.float32)

    @pl.when(pl.program_id(2) == pl.num_programs(2) - 1)
    def _finalize():
        out = acc_ref[...] + b_ref[...]
        if act == "relu":
            out = jnp.maximum(out, 0.0)
        if has_res:
            out = out + res_ref[...].astype(jnp.float32)
        o_ref[...] = out.astype(o_ref.dtype)


def matmul_bias(x, w, b, act="none", residual=None, tm=256, tn=256, tk=512):
    """y = act(x @ w + b) [+ residual]; x:(M,K) w:(K,N) b:(N,). Tiled/pipelined."""
    M, K = x.shape
    K2, N = w.shape
    assert K == K2
    tm = _pick_tile(M, tm, 8)
    tn = _pick_tile(N, tn, 128)
    tk = _pick_tile(K, tk, 128)
    grid = (M // tm, N // tn, K // tk)
    b2 = b.reshape(1, N)
    has_res = residual is not None

    in_specs = [
        pl.BlockSpec((tm, tk), lambda i, j, k: (i, k)),
        pl.BlockSpec((tk, tn), lambda i, j, k: (k, j)),
        pl.BlockSpec((1, tn), lambda i, j, k: (0, j)),
    ]
    args = [x, w, b2]
    if has_res:
        in_specs.append(pl.BlockSpec((tm, tn), lambda i, j, k: (i, j)))
        args.append(residual)

    return pl.pallas_call(
        functools.partial(_matmul_kernel, act=act, has_res=has_res),
        out_shape=jax.ShapeDtypeStruct((M, N), x.dtype),
        grid=grid,
        in_specs=in_specs,
        out_specs=pl.BlockSpec((tm, tn), lambda i, j, k: (i, j)),
        scratch_shapes=[pltpu.VMEM((tm, tn), jnp.float32)],
        compiler_params=pltpu.CompilerParams(
            dimension_semantics=("parallel", "parallel", "arbitrary"),
            vmem_limit_bytes=64 * 1024 * 1024),
        cost_estimate=pl.CostEstimate(
            flops=2 * M * N * K,
            transcendentals=0,
            bytes_accessed=4 * (M * K + K * N + M * N)),
    )(*args)


# ----------------------------------------------------------------------------
# Conv3x3 (stride=1, pad=1) lowered to a dense latent->latent matmul.
# Rows indexed by (cin, hi, wi), columns by (cout, ho, wo) -- both C-major,
# matching torch's .view(-1, C*H*W) flattening on either side.
# ----------------------------------------------------------------------------
def _conv3x3_matrix(w, H, W):
    """Dense (Cin*H*W, Cout*H*W) matrix equivalent to Conv2d(k=3, s=1, p=1)."""
    Cout, Cin = w.shape[0], w.shape[1]
    dh = jnp.arange(H)[:, None] - jnp.arange(H)[None, :] + 1     # (Hi, Ho) -> kh
    dw = jnp.arange(W)[:, None] - jnp.arange(W)[None, :] + 1     # (Wi, Wo) -> kw
    mh = ((dh >= 0) & (dh <= 2)).astype(w.dtype)
    mw = ((dw >= 0) & (dw <= 2)).astype(w.dtype)
    kh = jnp.clip(dh, 0, 2)
    kw = jnp.clip(dw, 0, 2)
    wt = w[:, :, kh, :]                                          # (Cout,Cin,Hi,Ho,3)
    wt = wt[:, :, :, :, kw]                                      # (Cout,Cin,Hi,Ho,Wi,Wo)
    wt = wt * mh[None, None, :, :, None, None] * mw[None, None, None, None, :, :]
    mat = jnp.transpose(wt, (1, 2, 4, 0, 3, 5)).reshape(Cin * H * W,
                                                        Cout * H * W)
    return mat


def conv3x3_e(x_flat, w, b, H, W, act="none", residual=None):
    """Conv2d(k=3,s=1,p=1) on C-major flattened frames.

    x_flat: (N, Cin*H*W)  w: (Cout, Cin, 3, 3)  b: (Cout,)
    residual (optional): (N, Cout*H*W) added after the activation.
    Returns (N, Cout*H*W).
    """
    mat = _conv3x3_matrix(w, H, W)
    b_full = jnp.repeat(b, H * W)
    return matmul_bias(x_flat, mat, b_full, act=act, residual=residual)


# ----------------------------------------------------------------------------
# Depthwise temporal gated conv (k=3, zero-pad along T): tanh(.) * sigmoid(.)
# One kernel per batch element; the +-1 time shifts are sliced in VMEM.
# ----------------------------------------------------------------------------
def _gated_temporal_kernel(xp_ref, wa_ref, ba_ref, wb_ref, bb_ref, o_ref, *, T):
    xp = xp_ref[0].astype(jnp.float32)          # (T+2, E)
    xm1 = xp[0:T, :]
    x0 = xp[1:T + 1, :]
    xp1 = xp[2:T + 2, :]
    wa = wa_ref[...]                            # (3, E)
    wb = wb_ref[...]
    pre_a = wa[0:1] * xm1 + wa[1:2] * x0 + wa[2:3] * xp1 + ba_ref[...]
    pre_b = wb[0:1] * xm1 + wb[1:2] * x0 + wb[2:3] * xp1 + bb_ref[...]
    o_ref[0] = (jnp.tanh(pre_a) * jax.nn.sigmoid(pre_b)).astype(o_ref.dtype)


def gated_temporal(x_bte, wa, ba, wb, bb, C, HW):
    """x_bte: (B, T, E) with E = C*HW (C-major); wa/wb: (3,C,1); ba/bb: (C,1)."""
    B, T, E = x_bte.shape
    xp = jnp.pad(x_bte, ((0, 0), (1, 1), (0, 0)))            # zero-pad T
    wa_full = jnp.repeat(wa.reshape(3, C), HW, axis=1)        # (3, E)
    wb_full = jnp.repeat(wb.reshape(3, C), HW, axis=1)
    ba_full = jnp.repeat(ba.reshape(1, C), HW, axis=1)        # (1, E)
    bb_full = jnp.repeat(bb.reshape(1, C), HW, axis=1)

    kernel = functools.partial(_gated_temporal_kernel, T=T)
    return pl.pallas_call(
        kernel,
        out_shape=jax.ShapeDtypeStruct((B, T, E), x_bte.dtype),
        grid=(B,),
        in_specs=[
            pl.BlockSpec((1, T + 2, E), lambda b: (b, 0, 0)),
            pl.BlockSpec((3, E), lambda b: (0, 0)),
            pl.BlockSpec((1, E), lambda b: (0, 0)),
            pl.BlockSpec((3, E), lambda b: (0, 0)),
            pl.BlockSpec((1, E), lambda b: (0, 0)),
        ],
        out_specs=pl.BlockSpec((1, T, E), lambda b: (b, 0, 0)),
        compiler_params=pltpu.CompilerParams(
            dimension_semantics=("parallel",)),
    )(xp, wa_full, ba_full, wb_full, bb_full)


# ----------------------------------------------------------------------------
# Fused multi-head self-attention (torch.nn.MultiheadAttention semantics):
# in-projection + per-head softmax attention + out-projection in one kernel.
# ----------------------------------------------------------------------------
def _mha_kernel(x_ref, win_ref, bin_ref, wout_ref, bout_ref, o_ref, *,
                num_heads, scale):
    x = x_ref[0]                                # (T, E)
    T, E = x.shape
    dh = E // num_heads

    qkv = jnp.dot(x, win_ref[...], preferred_element_type=jnp.float32)
    qkv = qkv + bin_ref[...]                    # (T, 3E)
    q = qkv[:, 0:E]
    k = qkv[:, E:2 * E]
    v = qkv[:, 2 * E:3 * E]
    wout = wout_ref[...]                        # (E, E)

    out = jnp.broadcast_to(bout_ref[...], (T, E)).astype(jnp.float32)
    for h in range(num_heads):
        lo, hi = h * dh, (h + 1) * dh
        qh = q[:, lo:hi] * scale
        s = jax.lax.dot_general(qh, k[:, lo:hi],
                                dimension_numbers=(((1,), (1,)), ((), ())),
                                preferred_element_type=jnp.float32)   # (T, T)
        m = jnp.max(s, axis=-1, keepdims=True)
        p = jnp.exp(s - m)
        p = p * pl.reciprocal(jnp.sum(p, axis=-1, keepdims=True), approx=True)
        oh = jnp.dot(p, v[:, lo:hi], preferred_element_type=jnp.float32)
        # concat(heads) @ Wout == sum_h head_h @ Wout[h*dh:(h+1)*dh, :]
        out = out + jnp.dot(oh, wout[lo:hi, :],
                            preferred_element_type=jnp.float32)
    o_ref[0] = out.astype(o_ref.dtype)


def multihead_attention(x, params, num_heads):
    """Self-attention over the T axis of x:(B,T,E) == torch MHA on (T,B,E)."""
    B, T, E = x.shape
    w_in, b_in, w_out, b_out = params
    dh = E // num_heads
    scale = 1.0 / float(dh) ** 0.5
    kernel = functools.partial(_mha_kernel, num_heads=num_heads, scale=scale)
    flops = 2 * B * (T * E * 3 * E + num_heads * 2 * T * T * dh + T * E * E)
    bytes_accessed = 4 * (2 * B * T * E + 3 * E * E + E * E + 4 * E)
    return pl.pallas_call(
        kernel,
        out_shape=jax.ShapeDtypeStruct((B, T, E), x.dtype),
        grid=(B,),
        in_specs=[
            pl.BlockSpec((1, T, E), lambda b: (b, 0, 0)),
            pl.BlockSpec((E, 3 * E), lambda b: (0, 0)),
            pl.BlockSpec((1, 3 * E), lambda b: (0, 0)),
            pl.BlockSpec((E, E), lambda b: (0, 0)),
            pl.BlockSpec((1, E), lambda b: (0, 0)),
        ],
        out_specs=pl.BlockSpec((1, T, E), lambda b: (b, 0, 0)),
        compiler_params=pltpu.CompilerParams(
            dimension_semantics=("parallel",)),
        cost_estimate=pl.CostEstimate(
            flops=flops,
            transcendentals=B * num_heads * T * T,
            bytes_accessed=bytes_accessed),
    )(x, w_in.T, b_in.reshape(1, 3 * E), w_out.T, b_out.reshape(1, E))


# ----------------------------------------------------------------------------
# Parameters
# ----------------------------------------------------------------------------
def init_params(key, n_channels, C, H, W, output_size, num_heads):
    E = C * H * W
    ks = jax.random.split(key, 16)
    norm = lambda k, shape, s: jax.random.normal(k, shape, jnp.float32) * s
    p = {}
    # image_encoder: conv3x3(Cin -> C) + ReLU
    p["enc_w"] = norm(ks[0], (C, n_channels, 3, 3), 1.0 / (n_channels * 9) ** 0.5)
    p["enc_b"] = jnp.zeros((C,), jnp.float32)
    # temporal_module: depthwise temporal gated conv
    p["tg_wa"] = norm(ks[1], (3, C, 1), 0.5)
    p["tg_ba"] = jnp.zeros((C, 1), jnp.float32)
    p["tg_wb"] = norm(ks[2], (3, C, 1), 0.5)
    p["tg_bb"] = jnp.zeros((C, 1), jnp.float32)
    # conv1 / conv2 / conv3
    for i, name in enumerate(["c1", "c2", "c3"]):
        p[f"{name}_w"] = norm(ks[3 + i], (C, C, 3, 3), 1.0 / (C * 9) ** 0.5)
        p[f"{name}_b"] = jnp.zeros((C,), jnp.float32)
    # attention_1 / attention_3  (attention_2 exists in the torch module but is
    # unused in forward(), so it is omitted here)
    for i, name in enumerate(["attn1", "attn3"]):
        k1, k2 = jax.random.split(ks[6 + i])
        p[name] = (
            norm(k1, (3 * E, E), 1.0 / E ** 0.5),   # in_proj_weight
            jnp.zeros((3 * E,), jnp.float32),       # in_proj_bias
            norm(k2, (E, E), 1.0 / E ** 0.5),       # out_proj.weight
            jnp.zeros((E,), jnp.float32),           # out_proj.bias
        )
    # mu / sigma heads (torch Linear stores (out, in))
    for i, name in enumerate(["smu", "ssig", "tmu", "tsig"]):
        p[f"{name}_w"] = norm(ks[8 + i], (output_size, E), 1.0 / E ** 0.5)
        p[f"{name}_b"] = jnp.zeros((output_size,), jnp.float32)
    return p


# ----------------------------------------------------------------------------
# AttentionStEncoder forward
# ----------------------------------------------------------------------------
@functools.partial(jax.jit, static_argnames=("num_heads", "output_size"))
def attention_st_encoder_forward(params, x, *, num_heads, output_size):
    B, T, Cin, H, W = x.shape
    C = params["enc_w"].shape[0]
    HW = H * W
    E = C * HW
    BT = B * T
    OS = output_size

    # image_encoder over all frames: conv3x3 + ReLU -> x_st in latent layout
    x_flat = x.reshape(BT, Cin * HW)
    x_st = conv3x3_e(x_flat, params["enc_w"], params["enc_b"], H, W, act="relu")

    # temporal module on (B, T, E)
    x_t5 = gated_temporal(x_st.reshape(B, T, E), params["tg_wa"],
                          params["tg_ba"], params["tg_wb"], params["tg_bb"],
                          C, HW)

    # attention_1 over the frame axis (== torch seq-first attention)
    x_t = multihead_attention(x_t5, params["attn1"], num_heads).reshape(BT, E)

    # conv stack with fused residual epilogues
    h1 = conv3x3_e(x_st, params["c1_w"], params["c1_b"], H, W,
                   residual=x_st)                       # conv1(x_st) + x_st
    h2 = conv3x3_e(h1, params["c2_w"], params["c2_b"], H, W,
                   residual=x_t)                        # conv2(h1) + x_t
    x_s = conv3x3_e(h2, params["c3_w"], params["c3_b"], H, W)

    # attention_3 then flatten
    x_s = multihead_attention(x_s.reshape(B, T, E), params["attn3"],
                              num_heads).reshape(BT, E)

    # merged mu/sigma heads: single block-diagonal matmul (one kernel launch)
    w_sp = jnp.concatenate([params["smu_w"], params["ssig_w"]], axis=0).T
    b_sp = jnp.concatenate([params["smu_b"], params["ssig_b"]], axis=0)
    w_tp = jnp.concatenate([params["tmu_w"], params["tsig_w"]], axis=0).T
    b_tp = jnp.concatenate([params["tmu_b"], params["tsig_b"]], axis=0)
    zeros = jnp.zeros((E, 2 * OS), x.dtype)
    w_heads = jnp.concatenate(
        [jnp.concatenate([w_sp, zeros], axis=1),
         jnp.concatenate([zeros, w_tp], axis=1)], axis=0)       # (2E, 4OS)
    b_heads = jnp.concatenate([b_sp, b_tp], axis=0)             # (4OS,)
    xin = jnp.concatenate([x_s, x_t], axis=1)                   # (BT, 2E)
    out = matmul_bias(xin, w_heads, b_heads)                    # (BT, 4OS)

    spatial_mu = out[:, 0 * OS:1 * OS].reshape(B, T, OS)
    spatial_sigma = out[:, 1 * OS:2 * OS].reshape(B, T, OS)
    temporal_mu = out[:, 2 * OS:3 * OS].reshape(B, T, OS)
    temporal_sigma = out[:, 3 * OS:4 * OS].reshape(B, T, OS)
    return spatial_mu, spatial_sigma, temporal_mu, temporal_sigma


# ----------------------------------------------------------------------------
if __name__ == "__main__":
    key = jax.random.PRNGKey(0)
    kp, kx = jax.random.split(key)

    # Small shapes: batch=2, frames=8, input channels=2, 8x8 images,
    # image_out_channel=4, image_out_size=(8,8) -> latent 256, heads=4, out=16.
    B, T, Cin, H, W = 2, 8, 2, 8, 8
    C, output_size, num_heads = 4, 16, 4

    params = init_params(kp, Cin, C, H, W, output_size, num_heads)
    x = jax.random.normal(kx, (B, T, Cin, H, W), jnp.float32)

    outs = attention_st_encoder_forward(params, x, num_heads=num_heads,
                                        output_size=output_size)
    outs = jax.block_until_ready(outs)

    expected = (B, T, output_size)
    assert all(o.shape == expected for o in outs), [o.shape for o in outs]
    assert all(bool(jnp.all(jnp.isfinite(o))) for o in outs)
    print("KERNEL_OK")
</pallas_src>

<mosaic_0001>
module attributes {stable_mosaic.version = 11 : i64} {
  func.func @_matmul_kernel(%arg0: i32, %arg1: i32, %arg2: i32, %arg3: memref<16x128xf32, #tpu.memory_space<vmem>>, %arg4: memref<128x256xf32, #tpu.memory_space<vmem>>, %arg5: memref<1x256xf32, #tpu.memory_space<vmem>>, %arg6: memref<16x256xf32, #tpu.memory_space<vmem>>, %arg7: memref<16x256xf32, #tpu.memory_space<vmem>>) attributes {dimension_semantics = [#tpu.dimension_semantics<parallel>, #tpu.dimension_semantics<parallel>, #tpu.dimension_semantics<arbitrary>], iteration_bounds = array<i64: 1, 1, 1>, scalar_prefetch = 0 : i64, scratch_operands = 1 : i64, tpu.core_type = #tpu.core_type<tc>, window_params = [{transform_indices = @transform_0, window_bounds = array<i64: 16, 128>}, {transform_indices = @transform_1, window_bounds = array<i64: 128, 256>}, {transform_indices = @transform_2, window_bounds = array<i64: 1, 256>}, {transform_indices = @transform_3, window_bounds = array<i64: 16, 256>}]} {
    %c0_i32 = arith.constant 0 : i32
    %0 = arith.cmpi eq, %arg2, %c0_i32 : i32
    %1 = arith.extui %0 : i1 to i32
    %c0_i32_0 = arith.constant 0 : i32
    %2 = arith.cmpi ne, %1, %c0_i32_0 : i32
    scf.if %2 {
      %cst_10 = arith.constant 0.000000e+00 : f32
      %12 = vector.broadcast %cst_10 : f32 to vector<16x256xf32>
      %c0_11 = arith.constant 0 : index
      %c0_12 = arith.constant 0 : index
      %13 = vector.load %arg7[%c0_11, %c0_12] : memref<16x256xf32, #tpu.memory_space<vmem>>, vector<16x256xf32>
      tpu.vector_store %arg7[%c0_11, %c0_12], %12 {strides = array<i32>} : memref<16x256xf32, #tpu.memory_space<vmem>>, vector<16x256xf32>,
    } else {
    }
    %c0 = arith.constant 0 : index
    %c0_1 = arith.constant 0 : index
    %3 = vector.load %arg7[%c0, %c0_1] : memref<16x256xf32, #tpu.memory_space<vmem>>, vector<16x256xf32>
    %c0_2 = arith.constant 0 : index
    %c0_3 = arith.constant 0 : index
    %4 = vector.load %arg3[%c0_2, %c0_3] : memref<16x128xf32, #tpu.memory_space<vmem>>, vector<16x128xf32>
    %c0_4 = arith.constant 0 : index
    %c0_5 = arith.constant 0 : index
    %5 = vector.load %arg4[%c0_4, %c0_5] : memref<128x256xf32, #tpu.memory_space<vmem>>, vector<128x256xf32>
    %cst = arith.constant dense<0.000000e+00> : vector<16x256xf32>
    %6 = tpu.matmul %4, %5, %cst {dimension_numbers = #tpu.dot_dimension_numbers<[1], [0], [0], [1], [0, 0, 1, 1], [], []>} : vector<16x128xf32>, vector<128x256xf32>, vector<16x256xf32> -> vector<16x256xf32>
    %7 = arith.addf %3, %6 : vector<16x256xf32>
    %c0_6 = arith.constant 0 : index
    %c0_7 = arith.constant 0 : index
    %8 = vector.load %arg7[%c0_6, %c0_7] : memref<16x256xf32, #tpu.memory_space<vmem>>, vector<16x256xf32>
    tpu.vector_store %arg7[%c0_6, %c0_7], %7 {strides = array<i32>} : memref<16x256xf32, #tpu.memory_space<vmem>>, vector<16x256xf32>,
    %c0_i32_8 = arith.constant 0 : i32
    %9 = arith.cmpi eq, %arg2, %c0_i32_8 : i32
    %10 = arith.extui %9 : i1 to i32
    %c0_i32_9 = arith.constant 0 : i32
    %11 = arith.cmpi ne, %10, %c0_i32_9 : i32
    scf.if %11 {
      %c0_10 = arith.constant 0 : index
      %c0_11 = arith.constant 0 : index
      %12 = vector.load %arg7[%c0_10, %c0_11] : memref<16x256xf32, #tpu.memory_space<vmem>>, vector<16x256xf32>
      %c0_12 = arith.constant 0 : index
      %c0_13 = arith.constant 0 : index
      %13 = vector.load %arg5[%c0_12, %c0_13] : memref<1x256xf32, #tpu.memory_space<vmem>>, vector<1x256xf32>
      %14 = vector.broadcast %13 : vector<1x256xf32> to vector<16x256xf32>
      %15 = arith.addf %12, %14 : vector<16x256xf32>
      %cst_14 = arith.constant 0.000000e+00 : f32
      %16 = vector.broadcast %cst_14 : f32 to vector<16x256xf32>
      %17 = arith.maximumf %15, %16 : vector<16x256xf32>
      %c0_15 = arith.constant 0 : index
      %c0_16 = arith.constant 0 : index
      %18 = vector.load %arg6[%c0_15, %c0_16] : memref<16x256xf32, #tpu.memory_space<vmem>>, vector<16x256xf32>
      tpu.vector_store %arg6[%c0_15, %c0_16], %17 {strides = array<i32>} : memref<16x256xf32, #tpu.memory_space<vmem>>, vector<16x256xf32>,
    } else {
    }
    return
  }
  func.func @transform_0(%arg0: i32, %arg1: i32, %arg2: i32) -> (i32, i32) {
    %c0_i32 = arith.constant 0 : i32
    return %arg0, %arg2 : i32, i32
  }
  func.func @transform_1(%arg0: i32, %arg1: i32, %arg2: i32) -> (i32, i32) {
    %c0_i32 = arith.constant 0 : i32
    return %arg2, %arg1 : i32, i32
  }
  func.func @transform_2(%arg0: i32, %arg1: i32, %arg2: i32) -> (i32, i32) {
    %c0_i32 = arith.constant 0 : i32
    %c0_i32_0 = arith.constant 0 : i32
    return %c0_i32, %arg1 : i32, i32
  }
  func.func @transform_3(%arg0: i32, %arg1: i32, %arg2: i32) -> (i32, i32) {
    %c0_i32 = arith.constant 0 : i32
    return %arg0, %arg1 : i32, i32
  }
}

module attributes {stable_mosaic.version = 11 : i64} {
  func.func @_matmul_kernel(%arg0: i32, %arg1: i32, %arg2: i32, %arg3: memref<16x256xf32, #tpu.memory_space<vmem>>, %arg4: memref<256x256xf32, #tpu.memory_space<vmem>>, %arg5: memref<1x256xf32, #tpu.memory_space<vmem>>, %arg6: memref<16x256xf32, #tpu.memory_space<vmem>>, %arg7: memref<16x256xf32, #tpu.memory_space<vmem>>, %arg8: memref<16x256xf32, #tpu.memory_space<vmem>>) attributes {dimension_semantics = [#tpu.dimension_semantics<parallel>, #tpu.dimension_semantics<parallel>, #tpu.dimension_semantics<arbitrary>], iteration_bounds = array<i64: 1, 1, 1>, scalar_prefetch = 0 : i64, scratch_operands = 1 : i64, tpu.core_type = #tpu.core_type<tc>, window_params = [{transform_indices = @transform_0, window_bounds = array<i64: 16, 256>}, {transform_indices = @transform_1, window_bounds = array<i64: 256, 256>}, {transform_indices = @transform_2, window_bounds = array<i64: 1, 256>}, {transform_indices = @transform_3, window_bounds = array<i64: 16, 256>}, {transform_indices = @transform_4, window_bounds = array<i64: 16, 256>}]} {
    %c0_i32 = arith.constant 0 : i32
    %0 = arith.cmpi eq, %arg2, %c0_i32 : i32
    %1 = arith.extui %0 : i1 to i32
    %c0_i32_0 = arith.constant 0 : i32
    %2 = arith.cmpi ne, %1, %c0_i32_0 : i32
    scf.if %2 {
      %cst_10 = arith.constant 0.000000e+00 : f32
      %12 = vector.broadcast %cst_10 : f32 to vector<16x256xf32>
      %c0_11 = arith.constant 0 : index
      %c0_12 = arith.constant 0 : index
      %13 = vector.load %arg8[%c0_11, %c0_12] : memref<16x256xf32, #tpu.memory_space<vmem>>, vector<16x256xf32>
      tpu.vector_store %arg8[%c0_11, %c0_12], %12 {strides = array<i32>} : memref<16x256xf32, #tpu.memory_space<vmem>>, vector<16x256xf32>,
    } else {
    }
    %c0 = arith.constant 0 : index
    %c0_1 = arith.constant 0 : index
    %3 = vector.load %arg8[%c0, %c0_1] : memref<16x256xf32, #tpu.memory_space<vmem>>, vector<16x256xf32>
    %c0_2 = arith.constant 0 : index
    %c0_3 = arith.constant 0 : index
    %4 = vector.load %arg3[%c0_2, %c0_3] : memref<16x256xf32, #tpu.memory_space<vmem>>, vector<16x256xf32>
    %c0_4 = arith.constant 0 : index
    %c0_5 = arith.constant 0 : index
    %5 = vector.load %arg4[%c0_4, %c0_5] : memref<256x256xf32, #tpu.memory_space<vmem>>, vector<256x256xf32>
    %cst = arith.constant dense<0.000000e+00> : vector<16x256xf32>
    %6 = tpu.matmul %4, %5, %cst {dimension_numbers = #tpu.dot_dimension_numbers<[1], [0], [0], [1], [0, 0, 1, 1], [], []>} : vector<16x256xf32>, vector<256x256xf32>, vector<16x256xf32> -> vector<16x256xf32>
    %7 = arith.addf %3, %6 : vector<16x256xf32>
    %c0_6 = arith.constant 0 : index
    %c0_7 = arith.constant 0 : index
    %8 = vector.load %arg8[%c0_6, %c0_7] : memref<16x256xf32, #tpu.memory_space<vmem>>, vector<16x256xf32>
    tpu.vector_store %arg8[%c0_6, %c0_7], %7 {strides = array<i32>} : memref<16x256xf32, #tpu.memory_space<vmem>>, vector<16x256xf32>,
    %c0_i32_8 = arith.constant 0 : i32
    %9 = arith.cmpi eq, %arg2, %c0_i32_8 : i32
    %10 = arith.extui %9 : i1 to i32
    %c0_i32_9 = arith.constant 0 : i32
    %11 = arith.cmpi ne, %10, %c0_i32_9 : i32
    scf.if %11 {
      %c0_10 = arith.constant 0 : index
      %c0_11 = arith.constant 0 : index
      %12 = vector.load %arg8[%c0_10, %c0_11] : memref<16x256xf32, #tpu.memory_space<vmem>>, vector<16x256xf32>
      %c0_12 = arith.constant 0 : index
      %c0_13 = arith.constant 0 : index
      %13 = vector.load %arg5[%c0_12, %c0_13] : memref<1x256xf32, #tpu.memory_space<vmem>>, vector<1x256xf32>
      %14 = vector.broadcast %13 : vector<1x256xf32> to vector<16x256xf32>
      %15 = arith.addf %12, %14 : vector<16x256xf32>
      %c0_14 = arith.constant 0 : index
      %c0_15 = arith.constant 0 : index
      %16 = vector.load %arg6[%c0_14, %c0_15] : memref<16x256xf32, #tpu.memory_space<vmem>>, vector<16x256xf32>
      %17 = arith.addf %15, %16 : vector<16x256xf32>
      %c0_16 = arith.constant 0 : index
      %c0_17 = arith.constant 0 : index
      %18 = vector.load %arg7[%c0_16, %c0_17] : memref<16x256xf32, #tpu.memory_space<vmem>>, vector<16x256xf32>
      tpu.vector_store %arg7[%c0_16, %c0_17], %17 {strides = array<i32>} : memref<16x256xf32, #tpu.memory_space<vmem>>, vector<16x256xf32>,
    } else {
    }
    return
  }
  func.func @transform_0(%arg0: i32, %arg1: i32, %arg2: i32) -> (i32, i32) {
    %c0_i32 = arith.constant 0 : i32
    return %arg0, %arg2 : i32, i32
  }
  func.func @transform_1(%arg0: i32, %arg1: i32, %arg2: i32) -> (i32, i32) {
    %c0_i32 = arith.constant 0 : i32
    return %arg2, %arg1 : i32, i32
  }
  func.func @transform_2(%arg0: i32, %arg1: i32, %arg2: i32) -> (i32, i32) {
    %c0_i32 = arith.constant 0 : i32
    %c0_i32_0 = arith.constant 0 : i32
    return %c0_i32, %arg1 : i32, i32
  }
  func.func @transform_3(%arg0: i32, %arg1: i32, %arg2: i32) -> (i32, i32) {
    %c0_i32 = arith.constant 0 : i32
    return %arg0, %arg1 : i32, i32
  }
  func.func @transform_4(%arg0: i32, %arg1: i32, %arg2: i32) -> (i32, i32) {
    %c0_i32 = arith.constant 0 : i32
    return %arg0, %arg1 : i32, i32
  }
}

module attributes {stable_mosaic.version = 11 : i64} {
  func.func @_gated_temporal_kernel(%arg0: i32, %arg1: memref<1x10x256xf32, #tpu.memory_space<vmem>>, %arg2: memref<3x256xf32, #tpu.memory_space<vmem>>, %arg3: memref<1x256xf32, #tpu.memory_space<vmem>>, %arg4: memref<3x256xf32, #tpu.memory_space<vmem>>, %arg5: memref<1x256xf32, #tpu.memory_space<vmem>>, %arg6: memref<1x8x256xf32, #tpu.memory_space<vmem>>) attributes {dimension_semantics = [#tpu.dimension_semantics<parallel>], iteration_bounds = array<i64: 2>, scalar_prefetch = 0 : i64, scratch_operands = 0 : i64, tpu.core_type = #tpu.core_type<tc>, window_params = [{transform_indices = @transform_0, window_bounds = array<i64: 1, 10, 256>}, {pipeline_mode = #tpu.pipeline_mode<synchronous>, transform_indices = @transform_1, window_bounds = array<i64: 3, 256>}, {pipeline_mode = #tpu.pipeline_mode<synchronous>, transform_indices = @transform_2, window_bounds = array<i64: 1, 256>}, {pipeline_mode = #tpu.pipeline_mode<synchronous>, transform_indices = @transform_3, window_bounds = array<i64: 3, 256>}, {pipeline_mode = #tpu.pipeline_mode<synchronous>, transform_indices = @transform_4, window_bounds = array<i64: 1, 256>}, {transform_indices = @transform_5, window_bounds = array<i64: 1, 8, 256>}]} {
    %c0 = arith.constant 0 : index
    %c0_0 = arith.constant 0 : index
    %c0_1 = arith.constant 0 : index
    %0 = vector.load %arg1[%c0, %c0_0, %c0_1] : memref<1x10x256xf32, #tpu.memory_space<vmem>>, vector<1x10x256xf32>
    %1 = vector.shape_cast %0 : vector<1x10x256xf32> to vector<10x256xf32>
    %2 = vector.extract_strided_slice %1 {offsets = [0, 0], sizes = [8, 256], strides = [1, 1]} : vector<10x256xf32> to vector<8x256xf32>
    %3 = vector.extract_strided_slice %1 {offsets = [1, 0], sizes = [8, 256], strides = [1, 1]} : vector<10x256xf32> to vector<8x256xf32>
    %4 = vector.extract_strided_slice %1 {offsets = [2, 0], sizes = [8, 256], strides = [1, 1]} : vector<10x256xf32> to vector<8x256xf32>
    %c0_2 = arith.constant 0 : index
    %c0_3 = arith.constant 0 : index
    %5 = vector.load %arg2[%c0_2, %c0_3] : memref<3x256xf32, #tpu.memory_space<vmem>>, vector<3x256xf32>
    %c0_4 = arith.constant 0 : index
    %c0_5 = arith.constant 0 : index
    %6 = vector.load %arg4[%c0_4, %c0_5] : memref<3x256xf32, #tpu.memory_space<vmem>>, vector<3x256xf32>
    %7 = vector.extract_strided_slice %5 {offsets = [0, 0], sizes = [1, 256], strides = [1, 1]} : vector<3x256xf32> to vector<1x256xf32>
    %8 = vector.broadcast %7 : vector<1x256xf32> to vector<8x256xf32>
    %9 = arith.mulf %8, %2 : vector<8x256xf32>
    %10 = vector.extract_strided_slice %5 {offsets = [1, 0], sizes = [1, 256], strides = [1, 1]} : vector<3x256xf32> to vector<1x256xf32>
    %11 = vector.broadcast %10 : vector<1x256xf32> to vector<8x256xf32>
    %12 = arith.mulf %11, %3 : vector<8x256xf32>
    %13 = arith.addf %9, %12 : vector<8x256xf32>
    %14 = vector.extract_strided_slice %5 {offsets = [2, 0], sizes = [1, 256], strides = [1, 1]} : vector<3x256xf32> to vector<1x256xf32>
    %15 = vector.broadcast %14 : vector<1x256xf32> to vector<8x256xf32>
    %16 = arith.mulf %15, %4 : vector<8x256xf32>
    %17 = arith.addf %13, %16 : vector<8x256xf32>
    %c0_6 = arith.constant 0 : index
    %c0_7 = arith.constant 0 : index
    %18 = vector.load %arg3[%c0_6, %c0_7] : memref<1x256xf32, #tpu.memory_space<vmem>>, vector<1x256xf32>
    %19 = vector.broadcast %18 : vector<1x256xf32> to vector<8x256xf32>
    %20 = arith.addf %17, %19 : vector<8x256xf32>
    %21 = vector.extract_strided_slice %6 {offsets = [0, 0], sizes = [1, 256], strides = [1, 1]} : vector<3x256xf32> to vector<1x256xf32>
    %22 = vector.broadcast %21 : vector<1x256xf32> to vector<8x256xf32>
    %23 = arith.mulf %22, %2 : vector<8x256xf32>
    %24 = vector.extract_strided_slice %6 {offsets = [1, 0], sizes = [1, 256], strides = [1, 1]} : vector<3x256xf32> to vector<1x256xf32>
    %25 = vector.broadcast %24 : vector<1x256xf32> to vector<8x256xf32>
    %26 = arith.mulf %25, %3 : vector<8x256xf32>
    %27 = arith.addf %23, %26 : vector<8x256xf32>
    %28 = vector.extract_strided_slice %6 {offsets = [2, 0], sizes = [1, 256], strides = [1, 1]} : vector<3x256xf32> to vector<1x256xf32>
    %29 = vector.broadcast %28 : vector<1x256xf32> to vector<8x256xf32>
    %30 = arith.mulf %29, %4 : vector<8x256xf32>
    %31 = arith.addf %27, %30 : vector<8x256xf32>
    %c0_8 = arith.constant 0 : index
    %c0_9 = arith.constant 0 : index
    %32 = vector.load %arg5[%c0_8, %c0_9] : memref<1x256xf32, #tpu.memory_space<vmem>>, vector<1x256xf32>
    %33 = vector.broadcast %32 : vector<1x256xf32> to vector<8x256xf32>
    %34 = arith.addf %31, %33 : vector<8x256xf32>
    %35 = math.tanh %20 : vector<8x256xf32>
    %36 = arith.negf %34 : vector<8x256xf32>
    %37 = math.exp %36 : vector<8x256xf32>
    %cst = arith.constant 1.000000e+00 : f32
    %38 = vector.broadcast %cst : f32 to vector<8x256xf32>
    %39 = arith.addf %38, %37 : vector<8x256xf32>
    %40 = arith.divf %38, %39 : vector<8x256xf32>
    %41 = arith.mulf %35, %40 : vector<8x256xf32>
    %c0_10 = arith.constant 0 : index
    %c0_11 = arith.constant 0 : index
    %c0_12 = arith.constant 0 : index
    %42 = vector.load %arg6[%c0_10, %c0_11, %c0_12] : memref<1x8x256xf32, #tpu.memory_space<vmem>>, vector<1x8x256xf32>
    %43 = vector.shape_cast %42 : vector<1x8x256xf32> to vector<8x256xf32>
    %44 = vector.shape_cast %41 : vector<8x256xf32> to vector<1x8x256xf32>
    tpu.vector_store %arg6[%c0_10, %c0_11, %c0_12], %44 {strides = array<i32>} : memref<1x8x256xf32, #tpu.memory_space<vmem>>, vector<1x8x256xf32>,
    return
  }
  func.func @transform_0(%arg0: i32) -> (i32, i32, i32) {
    %c0_i32 = arith.constant 0 : i32
    %c0_i32_0 = arith.constant 0 : i32
    %c0_i32_1 = arith.constant 0 : i32
    return %arg0, %c0_i32, %c0_i32_0 : i32, i32, i32
  }
  func.func @transform_1(%arg0: i32) -> (i32, i32) {
    %c0_i32 = arith.constant 0 : i32
    %c0_i32_0 = arith.constant 0 : i32
    %c0_i32_1 = arith.constant 0 : i32
    return %c0_i32, %c0_i32_0 : i32, i32
  }
  func.func @transform_2(%arg0: i32) -> (i32, i32) {
    %c0_i32 = arith.constant 0 : i32
    %c0_i32_0 = arith.constant 0 : i32
    %c0_i32_1 = arith.constant 0 : i32
    return %c0_i32, %c0_i32_0 : i32, i32
  }
  func.func @transform_3(%arg0: i32) -> (i32, i32) {
    %c0_i32 = arith.constant 0 : i32
    %c0_i32_0 = arith.constant 0 : i32
    %c0_i32_1 = arith.constant 0 : i32
    return %c0_i32, %c0_i32_0 : i32, i32
  }
  func.func @transform_4(%arg0: i32) -> (i32, i32) {
    %c0_i32 = arith.constant 0 : i32
    %c0_i32_0 = arith.constant 0 : i32
    %c0_i32_1 = arith.constant 0 : i32
    return %c0_i32, %c0_i32_0 : i32, i32
  }
  func.func @transform_5(%arg0: i32) -> (i32, i32, i32) {
    %c0_i32 = arith.constant 0 : i32
    %c0_i32_0 = arith.constant 0 : i32
    %c0_i32_1 = arith.constant 0 : i32
    return %arg0, %c0_i32, %c0_i32_0 : i32, i32, i32
  }
}

module attributes {stable_mosaic.version = 11 : i64} {
  func.func @_mha_kernel(%arg0: i32, %arg1: memref<1x8x256xf32, #tpu.memory_space<vmem>>, %arg2: memref<256x768xf32, #tpu.memory_space<vmem>>, %arg3: memref<1x768xf32, #tpu.memory_space<vmem>>, %arg4: memref<256x256xf32, #tpu.memory_space<vmem>>, %arg5: memref<1x256xf32, #tpu.memory_space<vmem>>, %arg6: memref<1x8x256xf32, #tpu.memory_space<vmem>>) attributes {dimension_semantics = [#tpu.dimension_semantics<parallel>], iteration_bounds = array<i64: 2>, scalar_prefetch = 0 : i64, scratch_operands = 0 : i64, tpu.core_type = #tpu.core_type<tc>, window_params = [{transform_indices = @transform_0, window_bounds = array<i64: 1, 8, 256>}, {pipeline_mode = #tpu.pipeline_mode<synchronous>, transform_indices = @transform_1, window_bounds = array<i64: 256, 768>}, {pipeline_mode = #tpu.pipeline_mode<synchronous>, transform_indices = @transform_2, window_bounds = array<i64: 1, 768>}, {pipeline_mode = #tpu.pipeline_mode<synchronous>, transform_indices = @transform_3, window_bounds = array<i64: 256, 256>}, {pipeline_mode = #tpu.pipeline_mode<synchronous>, transform_indices = @transform_4, window_bounds = array<i64: 1, 256>}, {transform_indices = @transform_5, window_bounds = array<i64: 1, 8, 256>}]} {
    %c0 = arith.constant 0 : index
    %c0_0 = arith.constant 0 : index
    %c0_1 = arith.constant 0 : index
    %0 = vector.load %arg1[%c0, %c0_0, %c0_1] : memref<1x8x256xf32, #tpu.memory_space<vmem>>, vector<1x8x256xf32>
    %1 = vector.shape_cast %0 : vector<1x8x256xf32> to vector<8x256xf32>
    %c0_2 = arith.constant 0 : index
    %c0_3 = arith.constant 0 : index
    %2 = vector.load %arg2[%c0_2, %c0_3] : memref<256x768xf32, #tpu.memory_space<vmem>>, vector<256x768xf32>
    %cst = arith.constant dense<0.000000e+00> : vector<8x768xf32>
    %3 = tpu.matmul %1, %2, %cst {dimension_numbers = #tpu.dot_dimension_numbers<[1], [0], [0], [1], [0, 0, 1, 1], [], []>} : vector<8x256xf32>, vector<256x768xf32>, vector<8x768xf32> -> vector<8x768xf32>
    %c0_4 = arith.constant 0 : index
    %c0_5 = arith.constant 0 : index
    %4 = vector.load %arg3[%c0_4, %c0_5] : memref<1x768xf32, #tpu.memory_space<vmem>>, vector<1x768xf32>
    %5 = vector.broadcast %4 : vector<1x768xf32> to vector<8x768xf32>
    %6 = arith.addf %3, %5 : vector<8x768xf32>
    %7 = vector.extract_strided_slice %6 {offsets = [0, 0], sizes = [8, 256], strides = [1, 1]} : vector<8x768xf32> to vector<8x256xf32>
    %8 = vector.extract_strided_slice %6 {offsets = [0, 256], sizes = [8, 256], strides = [1, 1]} : vector<8x768xf32> to vector<8x256xf32>
    %9 = vector.extract_strided_slice %6 {offsets = [0, 512], sizes = [8, 256], strides = [1, 1]} : vector<8x768xf32> to vector<8x256xf32>
    %c0_6 = arith.constant 0 : index
    %c0_7 = arith.constant 0 : index
    %10 = vector.load %arg4[%c0_6, %c0_7] : memref<256x256xf32, #tpu.memory_space<vmem>>, vector<256x256xf32>
    %c0_8 = arith.constant 0 : index
    %c0_9 = arith.constant 0 : index
    %11 = vector.load %arg5[%c0_8, %c0_9] : memref<1x256xf32, #tpu.memory_space<vmem>>, vector<1x256xf32>
    %12 = vector.shape_cast %11 : vector<1x256xf32> to vector<1x256xf32>
    %13 = vector.broadcast %12 : vector<1x256xf32> to vector<8x256xf32>
    %14 = vector.extract_strided_slice %7 {offsets = [0, 0], sizes = [8, 64], strides = [1, 1]} : vector<8x256xf32> to vector<8x64xf32>
    %cst_10 = arith.constant 1.250000e-01 : f32
    %15 = vector.broadcast %cst_10 : f32 to vector<8x64xf32>
    %16 = arith.mulf %14, %15 : vector<8x64xf32>
    %17 = vector.extract_strided_slice %8 {offsets = [0, 0], sizes = [8, 64], strides = [1, 1]} : vector<8x256xf32> to vector<8x64xf32>
    %cst_11 = arith.constant dense<0.000000e+00> : vector<8x8xf32>
    %18 = tpu.matmul %16, %17, %cst_11 {dimension_numbers = #tpu.dot_dimension_numbers<[1], [1], [0], [0], [0, 0, 1, 0], [], []>} : vector<8x64xf32>, vector<8x64xf32>, vector<8x8xf32> -> vector<8x8xf32>
    %cst_12 = arith.constant dense<0xFF800000> : vector<8xf32>
    %19 = vector.multi_reduction <maximumf>, %18, %cst_12 [1] : vector<8x8xf32> to vector<8xf32>
    %20 = vector.shape_cast %19 : vector<8xf32> to vector<8x1xf32>
    %21 = vector.broadcast %20 : vector<8x1xf32> to vector<8x8xf32>
    %22 = arith.subf %18, %21 : vector<8x8xf32>
    %23 = math.exp %22 : vector<8x8xf32>
    %cst_13 = arith.constant dense<0.000000e+00> : vector<8xf32>
    %24 = vector.multi_reduction <add>, %23, %cst_13 [1] : vector<8x8xf32> to vector<8xf32>
    %25 = vector.shape_cast %24 : vector<8xf32> to vector<8x1xf32>
    %26 = tpu.reciprocal %25 {approx = true} : vector<8x1xf32> -> vector<8x1xf32>
    %27 = vector.broadcast %26 : vector<8x1xf32> to vector<8x8xf32>
    %28 = arith.mulf %23, %27 : vector<8x8xf32>
    %29 = vector.extract_strided_slice %9 {offsets = [0, 0], sizes = [8, 64], strides = [1, 1]} : vector<8x256xf32> to vector<8x64xf32>
    %cst_14 = arith.constant dense<0.000000e+00> : vector<8x64xf32>
    %30 = tpu.matmul %28, %29, %cst_14 {dimension_numbers = #tpu.dot_dimension_numbers<[1], [0], [0], [1], [0, 0, 1, 1], [], []>} : vector<8x8xf32>, vector<8x64xf32>, vector<8x64xf32> -> vector<8x64xf32>
    %31 = vector.extract_strided_slice %10 {offsets = [0, 0], sizes = [64, 256], strides = [1, 1]} : vector<256x256xf32> to vector<64x256xf32>
    %cst_15 = arith.constant dense<0.000000e+00> : vector<8x256xf32>
    %32 = tpu.matmul %30, %31, %cst_15 {dimension_numbers = #tpu.dot_dimension_numbers<[1], [0], [0], [1], [0, 0, 1, 1], [], []>} : vector<8x64xf32>, vector<64x256xf32>, vector<8x256xf32> -> vector<8x256xf32>
    %33 = arith.addf %13, %32 : vector<8x256xf32>
    %34 = vector.extract_strided_slice %7 {offsets = [0, 64], sizes = [8, 64], strides = [1, 1]} : vector<8x256xf32> to vector<8x64xf32>
    %cst_16 = arith.constant 1.250000e-01 : f32
    %35 = vector.broadcast %cst_16 : f32 to vector<8x64xf32>
    %36 = arith.mulf %34, %35 : vector<8x64xf32>
    %37 = vector.extract_strided_slice %8 {offsets = [0, 64], sizes = [8, 64], strides = [1, 1]} : vector<8x256xf32> to vector<8x64xf32>
    %cst_17 = arith.constant dense<0.000000e+00> : vector<8x8xf32>
    %38 = tpu.matmul %36, %37, %cst_17 {dimension_numbers = #tpu.dot_dimension_numbers<[1], [1], [0], [0], [0, 0, 1, 0], [], []>} : vector<8x64xf32>, vector<8x64xf32>, vector<8x8xf32> -> vector<8x8xf32>
    %cst_18 = arith.constant dense<0xFF800000> : vector<8xf32>
    %39 = vector.multi_reduction <maximumf>, %38, %cst_18 [1] : vector<8x8xf32> to vector<8xf32>
    %40 = vector.shape_cast %39 : vector<8xf32> to vector<8x1xf32>
    %41 = vector.broadcast %40 : vector<8x1xf32> to vector<8x8xf32>
    %42 = arith.subf %38, %41 : vector<8x8xf32>
    %43 = math.exp %42 : vector<8x8xf32>
    %cst_19 = arith.constant dense<0.000000e+00> : vector<8xf32>
    %44 = vector.multi_reduction <add>, %43, %cst_19 [1] : vector<8x8xf32> to vector<8xf32>
    %45 = vector.shape_cast %44 : vector<8xf32> to vector<8x1xf32>
    %46 = tpu.reciprocal %45 {approx = true} : vector<8x1xf32> -> vector<8x1xf32>
    %47 = vector.broadcast %46 : vector<8x1xf32> to vector<8x8xf32>
    %48 = arith.mulf %43, %47 : vector<8x8xf32>
    %49 = vector.extract_strided_slice %9 {offsets = [0, 64], sizes = [8, 64], strides = [1, 1]} : vector<8x256xf32> to vector<8x64xf32>
    %cst_20 = arith.constant dense<0.000000e+00> : vector<8x64xf32>
    %50 = tpu.matmul %48, %49, %cst_20 {dimension_numbers = #tpu.dot_dimension_numbers<[1], [0], [0], [1], [0, 0, 1, 1], [], []>} : vector<8x8xf32>, vector<8x64xf32>, vector<8x64xf32> -> vector<8x64xf32>
    %51 = vector.extract_strided_slice %10 {offsets = [64, 0], sizes = [64, 256], strides = [1, 1]} : vector<256x256xf32> to vector<64x256xf32>
    %cst_21 = arith.constant dense<0.000000e+00> : vector<8x256xf32>
    %52 = tpu.matmul %50, %51, %cst_21 {dimension_numbers = #tpu.dot_dimension_numbers<[1], [0], [0], [1], [0, 0, 1, 1], [], []>} : vector<8x64xf32>, vector<64x256xf32>, vector<8x256xf32> -> vector<8x256xf32>
    %53 = arith.addf %33, %52 : vector<8x256xf32>
    %54 = vector.extract_strided_slice %7 {offsets = [0, 128], sizes = [8, 64], strides = [1, 1]} : vector<8x256xf32> to vector<8x64xf32>
    %cst_22 = arith.constant 1.250000e-01 : f32
    %55 = vector.broadcast %cst_22 : f32 to vector<8x64xf32>
    %56 = arith.mulf %54, %55 : vector<8x64xf32>
    %57 = vector.extract_strided_slice %8 {offsets = [0, 128], sizes = [8, 64], strides = [1, 1]} : vector<8x256xf32> to vector<8x64xf32>
    %cst_23 = arith.constant dense<0.000000e+00> : vector<8x8xf32>
    %58 = tpu.matmul %56, %57, %cst_23 {dimension_numbers = #tpu.dot_dimension_numbers<[1], [1], [0], [0], [0, 0, 1, 0], [], []>} : vector<8x64xf32>, vector<8x64xf32>, vector<8x8xf32> -> vector<8x8xf32>
    %cst_24 = arith.constant dense<0xFF800000> : vector<8xf32>
    %59 = vector.multi_reduction <maximumf>, %58, %cst_24 [1] : vector<8x8xf32> to vector<8xf32>
    %60 = vector.shape_cast %59 : vector<8xf32> to vector<8x1xf32>
    %61 = vector.broadcast %60 : vector<8x1xf32> to vector<8x8xf32>
    %62 = arith.subf %58, %61 : vector<8x8xf32>
    %63 = math.exp %62 : vector<8x8xf32>
    %cst_25 = arith.constant dense<0.000000e+00> : vector<8xf32>
    %64 = vector.multi_reduction <add>, %63, %cst_25 [1] : vector<8x8xf32> to vector<8xf32>
    %65 = vector.shape_cast %64 : vector<8xf32> to vector<8x1xf32>
    %66 = tpu.reciprocal %65 {approx = true} : vector<8x1xf32> -> vector<8x1xf32>
    %67 = vector.broadcast %66 : vector<8x1xf32> to vector<8x8xf32>
    %68 = arith.mulf %63, %67 : vector<8x8xf32>
    %69 = vector.extract_strided_slice %9 {offsets = [0, 128], sizes = [8, 64], strides = [1, 1]} : vector<8x256xf32> to vector<8x64xf32>
    %cst_26 = arith.constant dense<0.000000e+00> : vector<8x64xf32>
    %70 = tpu.matmul %68, %69, %cst_26 {dimension_numbers = #tpu.dot_dimension_numbers<[1], [0], [0], [1], [0, 0, 1, 1], [], []>} : vector<8x8xf32>, vector<8x64xf32>, vector<8x64xf32> -> vector<8x64xf32>
    %71 = vector.extract_strided_slice %10 {offsets = [128, 0], sizes = [64, 256], strides = [1, 1]} : vector<256x256xf32> to vector<64x256xf32>
    %cst_27 = arith.constant dense<0.000000e+00> : vector<8x256xf32>
    %72 = tpu.matmul %70, %71, %cst_27 {dimension_numbers = #tpu.dot_dimension_numbers<[1], [0], [0], [1], [0, 0, 1, 1], [], []>} : vector<8x64xf32>, vector<64x256xf32>, vector<8x256xf32> -> vector<8x256xf32>
    %73 = arith.addf %53, %72 : vector<8x256xf32>
    %74 = vector.extract_strided_slice %7 {offsets = [0, 192], sizes = [8, 64], strides = [1, 1]} : vector<8x256xf32> to vector<8x64xf32>
    %cst_28 = arith.constant 1.250000e-01 : f32
    %75 = vector.broadcast %cst_28 : f32 to vector<8x64xf32>
    %76 = arith.mulf %74, %75 : vector<8x64xf32>
    %77 = vector.extract_strided_slice %8 {offsets = [0, 192], sizes = [8, 64], strides = [1, 1]} : vector<8x256xf32> to vector<8x64xf32>
    %cst_29 = arith.constant dense<0.000000e+00> : vector<8x8xf32>
    %78 = tpu.matmul %76, %77, %cst_29 {dimension_numbers = #tpu.dot_dimension_numbers<[1], [1], [0], [0], [0, 0, 1, 0], [], []>} : vector<8x64xf32>, vector<8x64xf32>, vector<8x8xf32> -> vector<8x8xf32>
    %cst_30 = arith.constant dense<0xFF800000> : vector<8xf32>
    %79 = vector.multi_reduction <maximumf>, %78, %cst_30 [1] : vector<8x8xf32> to vector<8xf32>
    %80 = vector.shape_cast %79 : vector<8xf32> to vector<8x1xf32>
    %81 = vector.broadcast %80 : vector<8x1xf32> to vector<8x8xf32>
    %82 = arith.subf %78, %81 : vector<8x8xf32>
    %83 = math.exp %82 : vector<8x8xf32>
    %cst_31 = arith.constant dense<0.000000e+00> : vector<8xf32>
    %84 = vector.multi_reduction <add>, %83, %cst_31 [1] : vector<8x8xf32> to vector<8xf32>
    %85 = vector.shape_cast %84 : vector<8xf32> to vector<8x1xf32>
    %86 = tpu.reciprocal %85 {approx = true} : vector<8x1xf32> -> vector<8x1xf32>
    %87 = vector.broadcast %86 : vector<8x1xf32> to vector<8x8xf32>
    %88 = arith.mulf %83, %87 : vector<8x8xf32>
    %89 = vector.extract_strided_slice %9 {offsets = [0, 192], sizes = [8, 64], strides = [1, 1]} : vector<8x256xf32> to vector<8x64xf32>
    %cst_32 = arith.constant dense<0.000000e+00> : vector<8x64xf32>
    %90 = tpu.matmul %88, %89, %cst_32 {dimension_numbers = #tpu.dot_dimension_numbers<[1], [0], [0], [1], [0, 0, 1, 1], [], []>} : vector<8x8xf32>, vector<8x64xf32>, vector<8x64xf32> -> vector<8x64xf32>
    %91 = vector.extract_strided_slice %10 {offsets = [192, 0], sizes = [64, 256], strides = [1, 1]} : vector<256x256xf32> to vector<64x256xf32>
    %cst_33 = arith.constant dense<0.000000e+00> : vector<8x256xf32>
    %92 = tpu.matmul %90, %91, %cst_33 {dimension_numbers = #tpu.dot_dimension_numbers<[1], [0], [0], [1], [0, 0, 1, 1], [], []>} : vector<8x64xf32>, vector<64x256xf32>, vector<8x256xf32> -> vector<8x256xf32>
    %93 = arith.addf %73, %92 : vector<8x256xf32>
    %c0_34 = arith.constant 0 : index
    %c0_35 = arith.constant 0 : index
    %c0_36 = arith.constant 0 : index
    %94 = vector.load %arg6[%c0_34, %c0_35, %c0_36] : memref<1x8x256xf32, #tpu.memory_space<vmem>>, vector<1x8x256xf32>
    %95 = vector.shape_cast %94 : vector<1x8x256xf32> to vector<8x256xf32>
    %96 = vector.shape_cast %93 : vector<8x256xf32> to vector<1x8x256xf32>
    tpu.vector_store %arg6[%c0_34, %c0_35, %c0_36], %96 {strides = array<i32>} : memref<1x8x256xf32, #tpu.memory_space<vmem>>, vector<1x8x256xf32>,
    return
  }
  func.func @transform_0(%arg0: i32) -> (i32, i32, i32) {
    %c0_i32 = arith.constant 0 : i32
    %c0_i32_0 = arith.constant 0 : i32
    %c0_i32_1 = arith.constant 0 : i32
    return %arg0, %c0_i32, %c0_i32_0 : i32, i32, i32
  }
  func.func @transform_1(%arg0: i32) -> (i32, i32) {
    %c0_i32 = arith.constant 0 : i32
    %c0_i32_0 = arith.constant 0 : i32
    %c0_i32_1 = arith.constant 0 : i32
    return %c0_i32, %c0_i32_0 : i32, i32
  }
  func.func @transform_2(%arg0: i32) -> (i32, i32) {
    %c0_i32 = arith.constant 0 : i32
    %c0_i32_0 = arith.constant 0 : i32
    %c0_i32_1 = arith.constant 0 : i32
    return %c0_i32, %c0_i32_0 : i32, i32
  }
  func.func @transform_3(%arg0: i32) -> (i32, i32) {
    %c0_i32 = arith.constant 0 : i32
    %c0_i32_0 = arith.constant 0 : i32
    %c0_i32_1 = arith.constant 0 : i32
    return %c0_i32, %c0_i32_0 : i32, i32
  }
  func.func @transform_4(%arg0: i32) -> (i32, i32) {
    %c0_i32 = arith.constant 0 : i32
    %c0_i32_0 = arith.constant 0 : i32
    %c0_i32_1 = arith.constant 0 : i32
    return %c0_i32, %c0_i32_0 : i32, i32
  }
  func.func @transform_5(%arg0: i32) -> (i32, i32, i32) {
    %c0_i32 = arith.constant 0 : i32
    %c0_i32_0 = arith.constant 0 : i32
    %c0_i32_1 = arith.constant 0 : i32
    return %arg0, %c0_i32, %c0_i32_0 : i32, i32, i32
  }
}

module attributes {stable_mosaic.version = 11 : i64} {
  func.func @_matmul_kernel(%arg0: i32, %arg1: i32, %arg2: i32, %arg3: memref<16x256xf32, #tpu.memory_space<vmem>>, %arg4: memref<256x256xf32, #tpu.memory_space<vmem>>, %arg5: memref<1x256xf32, #tpu.memory_space<vmem>>, %arg6: memref<16x256xf32, #tpu.memory_space<vmem>>, %arg7: memref<16x256xf32, #tpu.memory_space<vmem>>) attributes {dimension_semantics = [#tpu.dimension_semantics<parallel>, #tpu.dimension_semantics<parallel>, #tpu.dimension_semantics<arbitrary>], iteration_bounds = array<i64: 1, 1, 1>, scalar_prefetch = 0 : i64, scratch_operands = 1 : i64, tpu.core_type = #tpu.core_type<tc>, window_params = [{transform_indices = @transform_0, window_bounds = array<i64: 16, 256>}, {transform_indices = @transform_1, window_bounds = array<i64: 256, 256>}, {transform_indices = @transform_2, window_bounds = array<i64: 1, 256>}, {transform_indices = @transform_3, window_bounds = array<i64: 16, 256>}]} {
    %c0_i32 = arith.constant 0 : i32
    %0 = arith.cmpi eq, %arg2, %c0_i32 : i32
    %1 = arith.extui %0 : i1 to i32
    %c0_i32_0 = arith.constant 0 : i32
    %2 = arith.cmpi ne, %1, %c0_i32_0 : i32
    scf.if %2 {
      %cst_10 = arith.constant 0.000000e+00 : f32
      %12 = vector.broadcast %cst_10 : f32 to vector<16x256xf32>
      %c0_11 = arith.constant 0 : index
      %c0_12 = arith.constant 0 : index
      %13 = vector.load %arg7[%c0_11, %c0_12] : memref<16x256xf32, #tpu.memory_space<vmem>>, vector<16x256xf32>
      tpu.vector_store %arg7[%c0_11, %c0_12], %12 {strides = array<i32>} : memref<16x256xf32, #tpu.memory_space<vmem>>, vector<16x256xf32>,
    } else {
    }
    %c0 = arith.constant 0 : index
    %c0_1 = arith.constant 0 : index
    %3 = vector.load %arg7[%c0, %c0_1] : memref<16x256xf32, #tpu.memory_space<vmem>>, vector<16x256xf32>
    %c0_2 = arith.constant 0 : index
    %c0_3 = arith.constant 0 : index
    %4 = vector.load %arg3[%c0_2, %c0_3] : memref<16x256xf32, #tpu.memory_space<vmem>>, vector<16x256xf32>
    %c0_4 = arith.constant 0 : index
    %c0_5 = arith.constant 0 : index
    %5 = vector.load %arg4[%c0_4, %c0_5] : memref<256x256xf32, #tpu.memory_space<vmem>>, vector<256x256xf32>
    %cst = arith.constant dense<0.000000e+00> : vector<16x256xf32>
    %6 = tpu.matmul %4, %5, %cst {dimension_numbers = #tpu.dot_dimension_numbers<[1], [0], [0], [1], [0, 0, 1, 1], [], []>} : vector<16x256xf32>, vector<256x256xf32>, vector<16x256xf32> -> vector<16x256xf32>
    %7 = arith.addf %3, %6 : vector<16x256xf32>
    %c0_6 = arith.constant 0 : index
    %c0_7 = arith.constant 0 : index
    %8 = vector.load %arg7[%c0_6, %c0_7] : memref<16x256xf32, #tpu.memory_space<vmem>>, vector<16x256xf32>
    tpu.vector_store %arg7[%c0_6, %c0_7], %7 {strides = array<i32>} : memref<16x256xf32, #tpu.memory_space<vmem>>, vector<16x256xf32>,
    %c0_i32_8 = arith.constant 0 : i32
    %9 = arith.cmpi eq, %arg2, %c0_i32_8 : i32
    %10 = arith.extui %9 : i1 to i32
    %c0_i32_9 = arith.constant 0 : i32
    %11 = arith.cmpi ne, %10, %c0_i32_9 : i32
    scf.if %11 {
      %c0_10 = arith.constant 0 : index
      %c0_11 = arith.constant 0 : index
      %12 = vector.load %arg7[%c0_10, %c0_11] : memref<16x256xf32, #tpu.memory_space<vmem>>, vector<16x256xf32>
      %c0_12 = arith.constant 0 : index
      %c0_13 = arith.constant 0 : index
      %13 = vector.load %arg5[%c0_12, %c0_13] : memref<1x256xf32, #tpu.memory_space<vmem>>, vector<1x256xf32>
      %14 = vector.broadcast %13 : vector<1x256xf32> to vector<16x256xf32>
      %15 = arith.addf %12, %14 : vector<16x256xf32>
      %c0_14 = arith.constant 0 : index
      %c0_15 = arith.constant 0 : index
      %16 = vector.load %arg6[%c0_14, %c0_15] : memref<16x256xf32, #tpu.memory_space<vmem>>, vector<16x256xf32>
      tpu.vector_store %arg6[%c0_14, %c0_15], %15 {strides = array<i32>} : memref<16x256xf32, #tpu.memory_space<vmem>>, vector<16x256xf32>,
    } else {
    }
    return
  }
  func.func @transform_0(%arg0: i32, %arg1: i32, %arg2: i32) -> (i32, i32) {
    %c0_i32 = arith.constant 0 : i32
    return %arg0, %arg2 : i32, i32
  }
  func.func @transform_1(%arg0: i32, %arg1: i32, %arg2: i32) -> (i32, i32) {
    %c0_i32 = arith.constant 0 : i32
    return %arg2, %arg1 : i32, i32
  }
  func.func @transform_2(%arg0: i32, %arg1: i32, %arg2: i32) -> (i32, i32) {
    %c0_i32 = arith.constant 0 : i32
    %c0_i32_0 = arith.constant 0 : i32
    return %c0_i32, %arg1 : i32, i32
  }
  func.func @transform_3(%arg0: i32, %arg1: i32, %arg2: i32) -> (i32, i32) {
    %c0_i32 = arith.constant 0 : i32
    return %arg0, %arg1 : i32, i32
  }
}

module attributes {stable_mosaic.version = 11 : i64} {
  func.func @_matmul_kernel(%arg0: i32, %arg1: i32, %arg2: i32, %arg3: memref<16x512xf32, #tpu.memory_space<vmem>>, %arg4: memref<512x64xf32, #tpu.memory_space<vmem>>, %arg5: memref<1x64xf32, #tpu.memory_space<vmem>>, %arg6: memref<16x64xf32, #tpu.memory_space<vmem>>, %arg7: memref<16x64xf32, #tpu.memory_space<vmem>>) attributes {dimension_semantics = [#tpu.dimension_semantics<parallel>, #tpu.dimension_semantics<parallel>, #tpu.dimension_semantics<arbitrary>], iteration_bounds = array<i64: 1, 1, 1>, scalar_prefetch = 0 : i64, scratch_operands = 1 : i64, tpu.core_type = #tpu.core_type<tc>, window_params = [{transform_indices = @transform_0, window_bounds = array<i64: 16, 512>}, {transform_indices = @transform_1, window_bounds = array<i64: 512, 64>}, {transform_indices = @transform_2, window_bounds = array<i64: 1, 64>}, {transform_indices = @transform_3, window_bounds = array<i64: 16, 64>}]} {
    %c0_i32 = arith.constant 0 : i32
    %0 = arith.cmpi eq, %arg2, %c0_i32 : i32
    %1 = arith.extui %0 : i1 to i32
    %c0_i32_0 = arith.constant 0 : i32
    %2 = arith.cmpi ne, %1, %c0_i32_0 : i32
    scf.if %2 {
      %cst_10 = arith.constant 0.000000e+00 : f32
      %12 = vector.broadcast %cst_10 : f32 to vector<16x64xf32>
      %c0_11 = arith.constant 0 : index
      %c0_12 = arith.constant 0 : index
      %13 = vector.load %arg7[%c0_11, %c0_12] : memref<16x64xf32, #tpu.memory_space<vmem>>, vector<16x64xf32>
      tpu.vector_store %arg7[%c0_11, %c0_12], %12 {strides = array<i32>} : memref<16x64xf32, #tpu.memory_space<vmem>>, vector<16x64xf32>,
    } else {
    }
    %c0 = arith.constant 0 : index
    %c0_1 = arith.constant 0 : index
    %3 = vector.load %arg7[%c0, %c0_1] : memref<16x64xf32, #tpu.memory_space<vmem>>, vector<16x64xf32>
    %c0_2 = arith.constant 0 : index
    %c0_3 = arith.constant 0 : index
    %4 = vector.load %arg3[%c0_2, %c0_3] : memref<16x512xf32, #tpu.memory_space<vmem>>, vector<16x512xf32>
    %c0_4 = arith.constant 0 : index
    %c0_5 = arith.constant 0 : index
    %5 = vector.load %arg4[%c0_4, %c0_5] : memref<512x64xf32, #tpu.memory_space<vmem>>, vector<512x64xf32>
    %cst = arith.constant dense<0.000000e+00> : vector<16x64xf32>
    %6 = tpu.matmul %4, %5, %cst {dimension_numbers = #tpu.dot_dimension_numbers<[1], [0], [0], [1], [0, 0, 1, 1], [], []>} : vector<16x512xf32>, vector<512x64xf32>, vector<16x64xf32> -> vector<16x64xf32>
    %7 = arith.addf %3, %6 : vector<16x64xf32>
    %c0_6 = arith.constant 0 : index
    %c0_7 = arith.constant 0 : index
    %8 = vector.load %arg7[%c0_6, %c0_7] : memref<16x64xf32, #tpu.memory_space<vmem>>, vector<16x64xf32>
    tpu.vector_store %arg7[%c0_6, %c0_7], %7 {strides = array<i32>} : memref<16x64xf32, #tpu.memory_space<vmem>>, vector<16x64xf32>,
    %c0_i32_8 = arith.constant 0 : i32
    %9 = arith.cmpi eq, %arg2, %c0_i32_8 : i32
    %10 = arith.extui %9 : i1 to i32
    %c0_i32_9 = arith.constant 0 : i32
    %11 = arith.cmpi ne, %10, %c0_i32_9 : i32
    scf.if %11 {
      %c0_10 = arith.constant 0 : index
      %c0_11 = arith.constant 0 : index
      %12 = vector.load %arg7[%c0_10, %c0_11] : memref<16x64xf32, #tpu.memory_space<vmem>>, vector<16x64xf32>
      %c0_12 = arith.constant 0 : index
      %c0_13 = arith.constant 0 : index
      %13 = vector.load %arg5[%c0_12, %c0_13] : memref<1x64xf32, #tpu.memory_space<vmem>>, vector<1x64xf32>
      %14 = vector.broadcast %13 : vector<1x64xf32> to vector<16x64xf32>
      %15 = arith.addf %12, %14 : vector<16x64xf32>
      %c0_14 = arith.constant 0 : index
      %c0_15 = arith.constant 0 : index
      %16 = vector.load %arg6[%c0_14, %c0_15] : memref<16x64xf32, #tpu.memory_space<vmem>>, vector<16x64xf32>
      tpu.vector_store %arg6[%c0_14, %c0_15], %15 {strides = array<i32>} : memref<16x64xf32, #tpu.memory_space<vmem>>, vector<16x64xf32>,
    } else {
    }
    return
  }
  func.func @transform_0(%arg0: i32, %arg1: i32, %arg2: i32) -> (i32, i32) {
    %c0_i32 = arith.constant 0 : i32
    return %arg0, %arg2 : i32, i32
  }
  func.func @transform_1(%arg0: i32, %arg1: i32, %arg2: i32) -> (i32, i32) {
    %c0_i32 = arith.constant 0 : i32
    return %arg2, %arg1 : i32, i32
  }
  func.func @transform_2(%arg0: i32, %arg1: i32, %arg2: i32) -> (i32, i32) {
    %c0_i32 = arith.constant 0 : i32
    %c0_i32_0 = arith.constant 0 : i32
    return %c0_i32, %arg1 : i32, i32
  }
  func.func @transform_3(%arg0: i32, %arg1: i32, %arg2: i32) -> (i32, i32) {
    %c0_i32 = arith.constant 0 : i32
    return %arg0, %arg1 : i32, i32
  }
}

</mosaic_0001>

<bundles_post_ra>
// kernel: attention_st_encoder_forward.8
= control target key start
LH: loop header
LB: loop body
LE: loop exit
PB: predicated region body
PF: predicated region fallthrough
CT: control target
= control target key end

     0   :  { %s312_s1 = inlined_call_operand.vmem [shape: f32[128,256], index: 1, kind: input, shape index: {}]   ;;  %s313_s0 = inlined_call_operand.vmem [shape: f32[16,128], index: 0, kind: input, shape index: {}]   ;;  %s314_s2 = inlined_call_operand.vmem [shape: f32[1,256], index: 2, kind: input, shape index: {}]   ;;  %s315_s3 = inlined_call_operand.vmem [shape: f32[16,256], index: 3, kind: output, shape index: {}]  }
   0x1   :  { %v58_v0 = vld [vmem:[%s312_s1 + $0xf0] sm:$0xff]  ;;  %v59_v1 = vld [vmem:[%s312_s1 + $0xf8] sm:$0xff]  ;;  %v56_v2 = vld [vmem:[%s312_s1 + $0xe0] sm:$0xff] }
   0x2   :  { %143 = vmatpush.msra.mxu2 %v58_v0  ;;  %159 = vmatpush.msra.mxu3 %v59_v1  ;;  %v57_v3 = vld [vmem:[%s312_s1 + $0xe8] sm:$0xff]  ;;  %v54_v4 = vld [vmem:[%s312_s1 + $0xd0] sm:$0xff]  ;;  %v55_v5 = vld [vmem:[%s312_s1 + $0xd8] sm:$0xff] }
   0x3   :  { %60 = vmatpush.msra.mxu0 %v58_v0  ;;  %83 = vmatpush.msra.mxu1 %v59_v1  ;;  %v52_v6 = vld [vmem:[%s312_s1 + $0xc0] sm:$0xff]  ;;  %v53_v7 = vld [vmem:[%s312_s1 + $0xc8] sm:$0xff]  ;;  %v50_v8 = vld [vmem:[%s312_s1 + $0xb0] sm:$0xff] }
   0x4   :  { %144 = vmatpush.msra.mxu2 %v56_v2  ;;  %160 = vmatpush.msra.mxu3 %v57_v3  ;;  %v51_v9 = vld [vmem:[%s312_s1 + $0xb8] sm:$0xff]  ;;  %v48_v10 = vld [vmem:[%s312_s1 + $0xa0] sm:$0xff]  ;;  %v49_v11 = vld [vmem:[%s312_s1 + $0xa8] sm:$0xff] }
   0x5   :  { %61 = vmatpush.msra.mxu0 %v56_v2  ;;  %84 = vmatpush.msra.mxu1 %v57_v3  ;;  %v46_v12 = vld [vmem:[%s312_s1 + $0x90] sm:$0xff]  ;;  %v47_v13 = vld [vmem:[%s312_s1 + $0x98] sm:$0xff]  ;;  %v44_v14 = vld [vmem:[%s312_s1 + $0x80] sm:$0xff] }
   0x6   :  { %145 = vmatpush.msra.mxu2 %v54_v4  ;;  %161 = vmatpush.msra.mxu3 %v55_v5  ;;  %v45_v15 = vld [vmem:[%s312_s1 + $0x88] sm:$0xff]  ;;  %v42_v16 = vld [vmem:[%s312_s1 + $0x70] sm:$0xff]  ;;  %v43_v17 = vld [vmem:[%s312_s1 + $0x78] sm:$0xff] }
   0x7   :  { %62 = vmatpush.msra.mxu0 %v54_v4  ;;  %85 = vmatpush.msra.mxu1 %v55_v5  ;;  %v40_v18 = vld [vmem:[%s312_s1 + $0x60] sm:$0xff]  ;;  %v41_v19 = vld [vmem:[%s312_s1 + $0x68] sm:$0xff]  ;;  %v38_v20 = vld [vmem:[%s312_s1 + $0x50] sm:$0xff] }
   0x8   :  { %146 = vmatpush.msra.mxu2 %v52_v6  ;;  %162 = vmatpush.msra.mxu3 %v53_v7  ;;  %v39_v21 = vld [vmem:[%s312_s1 + $0x58] sm:$0xff]  ;;  %v36_v22 = vld [vmem:[%s312_s1 + $0x40] sm:$0xff]  ;;  %v37_v23 = vld [vmem:[%s312_s1 + $0x48] sm:$0xff] }
   0x9   :  { %63 = vmatpush.msra.mxu0 %v52_v6  ;;  %86 = vmatpush.msra.mxu1 %v53_v7  ;;  %v34_v24 = vld [vmem:[%s312_s1 + $0x30] sm:$0xff]  ;;  %v35_v25 = vld [vmem:[%s312_s1 + $0x38] sm:$0xff]  ;;  %v32_v26 = vld [vmem:[%s312_s1 + $0x20] sm:$0xff] }
   0xa   :  { %147 = vmatpush.msra.mxu2 %v50_v8  ;;  %163 = vmatpush.msra.mxu3 %v51_v9  ;;  %v33_v27 = vld [vmem:[%s312_s1 + $0x28] sm:$0xff]  ;;  %v30_v28 = vld [vmem:[%s312_s1 + $0x10] sm:$0xff]  ;;  %v31_v29 = vld [vmem:[%s312_s1 + $0x18] sm:$0xff] }
   0xb   :  { %64 = vmatpush.msra.mxu0 %v50_v8  ;;  %87 = vmatpush.msra.mxu1 %v51_v9  ;;  %v28_v30 = vld [vmem:[%s312_s1] sm:$0xff]  ;;  %v29_v31 = vld [vmem:[%s312_s1 + $0x8] sm:$0xff] }
   0xc   :  { %148 = vmatpush.msra.mxu2 %v48_v10  ;;  %164 = vmatpush.msra.mxu3 %v49_v11  ;;  %v27_v32 = vld [vmem:[%s313_s0 + $0x8] sm:$0xff]  ;;  %v26_v33 = vld [vmem:[%s313_s0] sm:$0xff] }
   0xd   :  { %65 = vmatpush.msra.mxu0 %v48_v10  ;;  %88 = vmatpush.msra.mxu1 %v49_v11  ;;  %v121_v34 = vld [vmem:[%s314_s2] sm:$0x3] }
   0xe   :  { %149 = vmatpush.msra.mxu2 %v46_v12  ;;  %165 = vmatpush.msra.mxu3 %v47_v13  ;;  %v123_v35 = vperm.slane %v121_v34, 0  ;;  %v124_v36 = vperm.slane %v121_v34, 1 }
   0xf   :  { %66 = vmatpush.msra.mxu0 %v46_v12  ;;  %89 = vmatpush.msra.mxu1 %v47_v13 }
  0x10   :  { %150 = vmatpush.msra.mxu2 %v44_v14  ;;  %166 = vmatpush.msra.mxu3 %v45_v15 }
  0x11   :  { %67 = vmatpush.msra.mxu0 %v44_v14  ;;  %90 = vmatpush.msra.mxu1 %v45_v15 }
  0x12   :  { %151 = vmatpush.msra.mxu2 %v42_v16  ;;  %167 = vmatpush.msra.mxu3 %v43_v17 }
  0x13   :  { %68 = vmatpush.msra.mxu0 %v42_v16  ;;  %91 = vmatpush.msra.mxu1 %v43_v17 }
  0x14   :  { %152 = vmatpush.msra.mxu2 %v40_v18  ;;  %168 = vmatpush.msra.mxu3 %v41_v19 }
  0x15   :  { %69 = vmatpush.msra.mxu0 %v40_v18  ;;  %92 = vmatpush.msra.mxu1 %v41_v19 }
  0x16   :  { %153 = vmatpush.msra.mxu2 %v38_v20  ;;  %169 = vmatpush.msra.mxu3 %v39_v21 }
  0x17   :  { %70 = vmatpush.msra.mxu0 %v38_v20  ;;  %93 = vmatpush.msra.mxu1 %v39_v21 }
  0x18   :  { %154 = vmatpush.msra.mxu2 %v36_v22  ;;  %170 = vmatpush.msra.mxu3 %v37_v23 }
  0x19   :  { %71 = vmatpush.msra.mxu0 %v36_v22  ;;  %94 = vmatpush.msra.mxu1 %v37_v23 }
  0x1a   :  { %155 = vmatpush.msra.mxu2 %v34_v24  ;;  %171 = vmatpush.msra.mxu3 %v35_v25 }
  0x1b   :  { %72 = vmatpush.msra.mxu0 %v34_v24  ;;  %95 = vmatpush.msra.mxu1 %v35_v25 }
  0x1c   :  { %156 = vmatpush.msra.mxu2 %v32_v26  ;;  %172 = vmatpush.msra.mxu3 %v33_v27 }
  0x1d   :  { %73 = vmatpush.msra.mxu0 %v32_v26  ;;  %96 = vmatpush.msra.mxu1 %v33_v27 }
  0x1e   :  { %157 = vmatpush.msra.mxu2 %v30_v28  ;;  %173 = vmatpush.msra.mxu3 %v31_v29 }
  0x1f   :  { %74 = vmatpush.msra.mxu0 %v30_v28  ;;  %97 = vmatpush.msra.mxu1 %v31_v29 }
  0x20   :  { %158 = vmatpush.msra.mxu2 %v28_v30  ;;  %174 = vmatpush.msra.mxu3 %v29_v31 }
  0x21   :  { %79 = vmatmul.f32.vlgmr.msra.gmra.mxu2 %v27_v32  ;;  %102 = vmatmul.f32.vlgmr.msra.gmra.mxu3 %v27_v32 }
  0x22   :  { %75 = vmatpush.msra.mxu0 %v28_v30  ;;  %98 = vmatpush.msra.mxu1 %v29_v31 }
  0x23   :  { %76 = vmatmul.f32.vlgmr.msra.gmra.mxu0 %v26_v33  ;;  %99 = vmatmul.f32.vlgmr.msra.gmra.mxu1 %v26_v33 }
  0xa0   :  { %v77_v37 = vpop.f32.mrf.mxu0  ;;  %v100_v38 = vpop.f32.mrf.mxu1 }
  0xa1   :  { %v127_v39 = vadd.f32 %v123_v35, %v77_v37  ;;  %v128_v40 = vadd.f32 %v124_v36, %v100_v38 }
  0xa3   :  { %v131_v41 = vmax.f32 %v127_v39, 0.0  ;;  %v132_v42 = vmax.f32 %v128_v40, 0.0 }
  0xa4   :  { %v80_v43 = vpop.f32.mrf.mxu2  ;;  %v103_v44 = vpop.f32.mrf.mxu3 }
  0xa5   :  { %135 = vst [vmem:[%s315_s3] sm:$0xff] %v131_v41  ;;  %v129_v45 = vadd.f32 %v123_v35, %v80_v43  ;;  %v130_v46 = vadd.f32 %v124_v36, %v103_v44 }
  0xa6   :  { %136 = vst [vmem:[%s315_s3 + $0x8] sm:$0xff] %v132_v42 }
  0xa7   :  { %v133_v47 = vmax.f32 %v129_v45, 0.0  ;;  %v134_v48 = vmax.f32 %v130_v46, 0.0 }
  0xa9   :  { %137 = vst [vmem:[%s315_s3 + $0x10] sm:$0xff] %v133_v47 }
  0xaa   :  { %138 = vst [vmem:[%s315_s3 + $0x18] sm:$0xff] %v134_v48 }

// kernel: attention_st_encoder_forward.11
= control target key start
LH: loop header
LB: loop body
LE: loop exit
PB: predicated region body
PF: predicated region fallthrough
CT: control target
= control target key end

     0   :  { %s486_s1 = inlined_call_operand.vmem [shape: f32[256,256], index: 1, kind: input, shape index: {}]   ;;  %s487_s0 = inlined_call_operand.vmem [shape: f32[16,256], index: 0, kind: input, shape index: {}, may-alias: {0,3}]   ;;  %s488_s2 = inlined_call_operand.vmem [shape: f32[1,256], index: 2, kind: input, shape index: {}]   ;;  %s489_s3 = inlined_call_operand.vmem [shape: f32[16,256], index: 3, kind: input, shape index: {}, may-alias: {0,3}]   ;;  %s490_s4 = inlined_call_operand.vmem [shape: f32[16,256], index: 4, kind: output, shape index: {}]  }
   0x1   :  { %v64_v0 = vld [vmem:[%s486_s1 + $0xf8] sm:$0xff]  ;;  %v62_v2 = vld [vmem:[%s486_s1 + $0xe8] sm:$0xff]  ;;  %v63_v6 = vld [vmem:[%s486_s1 + $0xf0] sm:$0xff] }
   0x2   :  { %v96_v1 = vld [vmem:[%s486_s1 + $0x1f8] sm:$0xff]  ;;  %143 = vmatpush.msra.mxu2 %v64_v0  ;;  %v94_v3 = vld [vmem:[%s486_s1 + $0x1e8] sm:$0xff]  ;;  %v95_v7 = vld [vmem:[%s486_s1 + $0x1f0] sm:$0xff]  ;;  %97 = vmatpush.msra.mxu0 %v63_v6 }
   0x3   :  { %166 = vmatpush.msra.mxu3 %v96_v1  ;;  %v60_v4 = vld [vmem:[%s486_s1 + $0xd8] sm:$0xff]  ;;  %v61_v8 = vld [vmem:[%s486_s1 + $0xe0] sm:$0xff]  ;;  %120 = vmatpush.msra.mxu1 %v95_v7  ;;  %v58_v10 = vld [vmem:[%s486_s1 + $0xc8] sm:$0xff] }
   0x4   :  { %v92_v5 = vld [vmem:[%s486_s1 + $0x1d8] sm:$0xff]  ;;  %144 = vmatpush.msra.mxu2 %v62_v2  ;;  %v93_v9 = vld [vmem:[%s486_s1 + $0x1e0] sm:$0xff]  ;;  %v90_v11 = vld [vmem:[%s486_s1 + $0x1c8] sm:$0xff]  ;;  %98 = vmatpush.msra.mxu0 %v61_v8 }
   0x5   :  { %167 = vmatpush.msra.mxu3 %v94_v3  ;;  %v59_v12 = vld [vmem:[%s486_s1 + $0xd0] sm:$0xff]  ;;  %121 = vmatpush.msra.mxu1 %v93_v9  ;;  %v56_v14 = vld [vmem:[%s486_s1 + $0xb8] sm:$0xff]  ;;  %v57_v16 = vld [vmem:[%s486_s1 + $0xc0] sm:$0xff] }
   0x6   :  { %145 = vmatpush.msra.mxu2 %v60_v4  ;;  %v91_v13 = vld [vmem:[%s486_s1 + $0x1d0] sm:$0xff]  ;;  %v88_v15 = vld [vmem:[%s486_s1 + $0x1b8] sm:$0xff]  ;;  %v89_v17 = vld [vmem:[%s486_s1 + $0x1c0] sm:$0xff]  ;;  %99 = vmatpush.msra.mxu0 %v59_v12 }
   0x7   :  { %168 = vmatpush.msra.mxu3 %v92_v5  ;;  %122 = vmatpush.msra.mxu1 %v91_v13  ;;  %v54_v18 = vld [vmem:[%s486_s1 + $0xa8] sm:$0xff]  ;;  %v55_v20 = vld [vmem:[%s486_s1 + $0xb0] sm:$0xff]  ;;  %v52_v22 = vld [vmem:[%s486_s1 + $0x98] sm:$0xff] }
   0x8   :  { %146 = vmatpush.msra.mxu2 %v58_v10  ;;  %v86_v19 = vld [vmem:[%s486_s1 + $0x1a8] sm:$0xff]  ;;  %v87_v21 = vld [vmem:[%s486_s1 + $0x1b0] sm:$0xff]  ;;  %100 = vmatpush.msra.mxu0 %v57_v16  ;;  %v84_v23 = vld [vmem:[%s486_s1 + $0x198] sm:$0xff] }
   0x9   :  { %169 = vmatpush.msra.mxu3 %v90_v11  ;;  %123 = vmatpush.msra.mxu1 %v89_v17  ;;  %v53_v24 = vld [vmem:[%s486_s1 + $0xa0] sm:$0xff]  ;;  %v50_v26 = vld [vmem:[%s486_s1 + $0x88] sm:$0xff]  ;;  %v51_v28 = vld [vmem:[%s486_s1 + $0x90] sm:$0xff] }
   0xa   :  { %147 = vmatpush.msra.mxu2 %v56_v14  ;;  %v85_v25 = vld [vmem:[%s486_s1 + $0x1a0] sm:$0xff]  ;;  %101 = vmatpush.msra.mxu0 %v55_v20  ;;  %v82_v27 = vld [vmem:[%s486_s1 + $0x188] sm:$0xff]  ;;  %v83_v29 = vld [vmem:[%s486_s1 + $0x190] sm:$0xff] }
   0xb   :  { %170 = vmatpush.msra.mxu3 %v88_v15  ;;  %124 = vmatpush.msra.mxu1 %v87_v21  ;;  %v48_v30 = vld [vmem:[%s486_s1 + $0x78] sm:$0xff]  ;;  %v49_v32 = vld [vmem:[%s486_s1 + $0x80] sm:$0xff]  ;;  %v46_v34 = vld [vmem:[%s486_s1 + $0x68] sm:$0xff] }
   0xc   :  { %148 = vmatpush.msra.mxu2 %v54_v18  ;;  %102 = vmatpush.msra.mxu0 %v53_v24  ;;  %v80_v31 = vld [vmem:[%s486_s1 + $0x178] sm:$0xff]  ;;  %v81_v33 = vld [vmem:[%s486_s1 + $0x180] sm:$0xff]  ;;  %v78_v35 = vld [vmem:[%s486_s1 + $0x168] sm:$0xff] }
   0xd   :  { %171 = vmatpush.msra.mxu3 %v86_v19  ;;  %125 = vmatpush.msra.mxu1 %v85_v25  ;;  %v47_v36 = vld [vmem:[%s486_s1 + $0x70] sm:$0xff]  ;;  %v44_v38 = vld [vmem:[%s486_s1 + $0x58] sm:$0xff]  ;;  %v45_v40 = vld [vmem:[%s486_s1 + $0x60] sm:$0xff] }
   0xe   :  { %149 = vmatpush.msra.mxu2 %v52_v22  ;;  %103 = vmatpush.msra.mxu0 %v51_v28  ;;  %v79_v37 = vld [vmem:[%s486_s1 + $0x170] sm:$0xff]  ;;  %v76_v39 = vld [vmem:[%s486_s1 + $0x158] sm:$0xff]  ;;  %v77_v41 = vld [vmem:[%s486_s1 + $0x160] sm:$0xff] }
   0xf   :  { %172 = vmatpush.msra.mxu3 %v84_v23  ;;  %126 = vmatpush.msra.mxu1 %v83_v29  ;;  %v42_v42 = vld [vmem:[%s486_s1 + $0x48] sm:$0xff]  ;;  %v43_v44 = vld [vmem:[%s486_s1 + $0x50] sm:$0xff]  ;;  %v40_v46 = vld [vmem:[%s486_s1 + $0x38] sm:$0xff] }
  0x10   :  { %150 = vmatpush.msra.mxu2 %v50_v26  ;;  %104 = vmatpush.msra.mxu0 %v49_v32  ;;  %v74_v43 = vld [vmem:[%s486_s1 + $0x148] sm:$0xff]  ;;  %v75_v45 = vld [vmem:[%s486_s1 + $0x150] sm:$0xff]  ;;  %v72_v47 = vld [vmem:[%s486_s1 + $0x138] sm:$0xff] }
  0x11   :  { %173 = vmatpush.msra.mxu3 %v82_v27  ;;  %127 = vmatpush.msra.mxu1 %v81_v33  ;;  %v41_v48 = vld [vmem:[%s486_s1 + $0x40] sm:$0xff]  ;;  %v38_v50 = vld [vmem:[%s486_s1 + $0x28] sm:$0xff]  ;;  %v39_v52 = vld [vmem:[%s486_s1 + $0x30] sm:$0xff] }
  0x12   :  { %151 = vmatpush.msra.mxu2 %v48_v30  ;;  %105 = vmatpush.msra.mxu0 %v47_v36  ;;  %v73_v49 = vld [vmem:[%s486_s1 + $0x140] sm:$0xff]  ;;  %v70_v51 = vld [vmem:[%s486_s1 + $0x128] sm:$0xff]  ;;  %v71_v53 = vld [vmem:[%s486_s1 + $0x130] sm:$0xff] }
  0x13   :  { %174 = vmatpush.msra.mxu3 %v80_v31  ;;  %128 = vmatpush.msra.mxu1 %v79_v37  ;;  %v36_v54 = vld [vmem:[%s486_s1 + $0x18] sm:$0xff]  ;;  %v37_v56 = vld [vmem:[%s486_s1 + $0x20] sm:$0xff]  ;;  %v34_v58 = vld [vmem:[%s486_s1 + $0x8] sm:$0xff] }
  0x14   :  { %152 = vmatpush.msra.mxu2 %v46_v34  ;;  %106 = vmatpush.msra.mxu0 %v45_v40  ;;  %v68_v55 = vld [vmem:[%s486_s1 + $0x118] sm:$0xff]  ;;  %v69_v57 = vld [vmem:[%s486_s1 + $0x120] sm:$0xff]  ;;  %v66_v59 = vld [vmem:[%s486_s1 + $0x108] sm:$0xff] }
  0x15   :  { %175 = vmatpush.msra.mxu3 %v78_v35  ;;  %129 = vmatpush.msra.mxu1 %v77_v41  ;;  %v29_v60 = vld [vmem:[%s487_s0] sm:$0xff]  ;;  %v30_v61 = vld [vmem:[%s487_s0 + $0x8] sm:$0xff]  ;;  %v35_v62 = vld [vmem:[%s486_s1 + $0x10] sm:$0xff] }
  0x16   :  { %153 = vmatpush.msra.mxu2 %v44_v38  ;;  %107 = vmatpush.msra.mxu0 %v43_v44  ;;  %v67_v63 = vld [vmem:[%s486_s1 + $0x110] sm:$0xff]  ;;  %v33_v0 = vld [vmem:[%s486_s1] sm:$0xff]  ;;  %v32_v3 = vld [vmem:[%s487_s0 + $0x18] sm:$0xff] }
  0x17   :  { %176 = vmatpush.msra.mxu3 %v76_v39  ;;  %130 = vmatpush.msra.mxu1 %v75_v45  ;;  %v65_v1 = vld [vmem:[%s486_s1 + $0x100] sm:$0xff]  ;;  %v31_v2 = vld [vmem:[%s487_s0 + $0x10] sm:$0xff]  ;;  %v215_v15 = vld [vmem:[%s489_s3 + $0x8] sm:$0xff] }
  0x18   :  { %154 = vmatpush.msra.mxu2 %v42_v42  ;;  %108 = vmatpush.msra.mxu0 %v41_v48  ;;  %v204_v4 = vld [vmem:[%s488_s2] sm:$0x3]  ;;  %v216_v22 = vld [vmem:[%s489_s3 + $0x10] sm:$0xff]  ;;  %v217_v27 = vld [vmem:[%s489_s3 + $0x18] sm:$0xff] }
  0x19   :  { %177 = vmatpush.msra.mxu3 %v74_v43  ;;  %131 = vmatpush.msra.mxu1 %v73_v49  ;;  %v206_v5 = vperm.slane %v204_v4, 0  ;;  %v207_v9 = vperm.slane %v204_v4, 1  ;;  %v214_v10 = vld [vmem:[%s489_s3] sm:$0xff] }
  0x1a   :  { %155 = vmatpush.msra.mxu2 %v40_v46  ;;  %109 = vmatpush.msra.mxu0 %v39_v52 }
  0x1b   :  { %178 = vmatpush.msra.mxu3 %v72_v47  ;;  %132 = vmatpush.msra.mxu1 %v71_v53 }
  0x1c   :  { %156 = vmatpush.msra.mxu2 %v38_v50  ;;  %110 = vmatpush.msra.mxu0 %v37_v56 }
  0x1d   :  { %179 = vmatpush.msra.mxu3 %v70_v51  ;;  %133 = vmatpush.msra.mxu1 %v69_v57 }
  0x1e   :  { %157 = vmatpush.msra.mxu2 %v36_v54  ;;  %111 = vmatpush.msra.mxu0 %v35_v62 }
  0x1f   :  { %180 = vmatpush.msra.mxu3 %v68_v55  ;;  %134 = vmatpush.msra.mxu1 %v67_v63 }
  0x20   :  { %158 = vmatpush.msra.mxu2 %v34_v58  ;;  %112 = vmatpush.msra.mxu0 %v33_v0 }
  0x21   :  { %181 = vmatpush.msra.mxu3 %v66_v59  ;;  %159 = vmatmul.f32.vlgmr.msra.gmra.mxu2 %v29_v60 }
  0x22   :  { %182 = vmatmul.f32.vlgmr.msra.gmra.mxu3 %v30_v61  ;;  %135 = vmatpush.msra.mxu1 %v65_v1 }
  0x23   :  { %113 = vmatmul.f32.vlgmr.msra.gmra.mxu0 %v29_v60  ;;  %136 = vmatmul.f32.vlgmr.msra.gmra.mxu1 %v30_v61 }
  0x29   :  { %162 = vmatmul.f32.gmra.mxu2 %v31_v2 }
  0x2a   :  { %185 = vmatmul.f32.gmra.mxu3 %v32_v3 }
  0x2b   :  { %116 = vmatmul.f32.gmra.mxu0 %v31_v2  ;;  %139 = vmatmul.f32.gmra.mxu1 %v32_v3 }
  0xa0   :  { %v114_v6 = vpop.f32.mrf.mxu0  ;;  %v137_v7 = vpop.f32.mrf.mxu1 }
  0xa1   :  { %v138_v8 = vadd.f32 %v137_v7, %v114_v6 }
  0xa3   :  { %v210_v13 = vadd.f32 %v206_v5, %v138_v8 }
  0xa4   :  { %v160_v11 = vpop.f32.mrf.mxu2 }
  0xa5   :  { %v183_v12 = vpop.f32.mrf.mxu3  ;;  %v218_v16 = vadd.f32 %v214_v10, %v210_v13 }
  0xa6   :  { %v184_v14 = vadd.f32 %v183_v12, %v160_v11 }
  0xa7   :  { %222 = vst [vmem:[%s490_s4] sm:$0xff] %v218_v16 }
  0xa8   :  { %v211_v17 = vadd.f32 %v207_v9, %v184_v14  ;;  %v117_v19 = vpop.f32.mrf.mxu0  ;;  %v140_v20 = vpop.f32.mrf.mxu1 }
  0xa9   :  { %v141_v21 = vadd.f32 %v140_v20, %v117_v19 }
  0xaa   :  { %v219_v18 = vadd.f32 %v215_v15, %v211_v17 }
  0xab   :  { %v212_v25 = vadd.f32 %v206_v5, %v141_v21 }
  0xac   :  { %223 = vst [vmem:[%s490_s4 + $0x8] sm:$0xff] %v219_v18  ;;  %v163_v23 = vpop.f32.mrf.mxu2 }
  0xad   :  { %v186_v24 = vpop.f32.mrf.mxu3  ;;  %v220_v28 = vadd.f32 %v216_v22, %v212_v25 }
  0xae   :  { %v187_v26 = vadd.f32 %v186_v24, %v163_v23 }
  0xaf   :  { %224 = vst [vmem:[%s490_s4 + $0x10] sm:$0xff] %v220_v28 }
  0xb0   :  { %v213_v29 = vadd.f32 %v207_v9, %v187_v26 }
  0xb2   :  { %v221_v30 = vadd.f32 %v217_v27, %v213_v29 }
  0xb4   :  { %225 = vst [vmem:[%s490_s4 + $0x18] sm:$0xff] %v221_v30 }

// kernel: attention_st_encoder_forward.9
= control target key start
LH: loop header
LB: loop body
LE: loop exit
PB: predicated region body
PF: predicated region fallthrough
CT: control target
= control target key end

     0   :  { %s535_s18 = smov 0   ;;  %s592_s0 = inlined_call_operand.vmem [shape: f32[2,10,256], index: 0, kind: input, shape index: {}]   ;;  %s593_s1 = inlined_call_operand.vmem [shape: f32[3,256], index: 1, kind: input, shape index: {}]   ;;  %s594_s2 = inlined_call_operand.vmem [shape: f32[1,256], index: 2, kind: input, shape index: {}]   ;;  %s595_s3 = inlined_call_operand.vmem [shape: f32[3,256], index: 3, kind: input, shape index: {}]   ;;  %s596_s4 = inlined_call_operand.vmem [shape: f32[1,256], index: 4, kind: input, shape index: {}]   ;;  %s597_s5 = inlined_call_operand.vmem [shape: f32[2,8,256], index: 5, kind: output, shape index: {}]  }
   0x1 LB: > { %s462_s19 = sadd.s32 4294967295, %s503_s18   ;;  %p466_p0 = scmp.ge.s32.totalorder %s503_s18, 1  ;;  %s503_s18 = sphi %s535_s18, %s15_s18  }
   0x2   : > { %p187_p1 = scmp.lt.s32.totalorder %s503_s18, 3 }
   0x4   : > { %p188_p2 = pnand %p466_p0, %p187_p1 }
   0x5   : > { %p215_p3 = scmp.lt.s32.totalorder (!%p188_p2), %s462_s19, 1 }
   0x6   : > { %191 = sbr.rel (%p188_p2) target bundleno = 62 (0x3e), region = 40 }
   0xb   : > { %s599_s19 = smov (!%p215_p3, %s462_s19), 1  ;;  %v230_v0 = vld [vmem:[%s595_s3] sm:$0x77]  ;;  %vm254_vm0 = vcmask 1046528   ;;  %vm279_vm1 = vcmask 1045504  }
   0xc   : > { %s475_s20 = sshll.u32 %s599_s19, 5  ;;  %v299_v1 = vperm.slane %v230_v0, 0  ;;  %v300_v2 = vperm.slane %v230_v0, 4  ;;  %v307_v3 = vperm.slane %v230_v0, 1  ;;  %v308_v4 = vperm.slane %v230_v0, 5  ;;  %s476_s7 = sshll.u32 %s599_s19, 4 }
   0xd   : > { %s219_s25 = scalar_lea.vmem %s592_s0, %s475_s20  ;;  %v229_v5 = vld [vmem:[%s593_s1] sm:$0x77]  ;;  %v331_v7 = vperm.slane %v230_v0, 2  ;;  %v332_v17 = vperm.slane %v230_v0, 6  ;;  %s224_s10 = scalar_lea.vmem %s597_s5, %s476_s7 }
   0xe   : > { %v232_v6 = vperm.slane %v229_v5, 0  ;;  %v555_v8 = vld [vmem:[%s219_s25] sm:$0xff]  ;;  %v557_v9 = vld [vmem:[%s219_s25 + $0x8] sm:$0xff]  ;;  %v227_v10 = vld [vmem:[%s219_s25 + $0x10] sm:$0x3]  ;;  %v303_v11 = vperm.slane %v299_v1, 0 }
   0xf   : > { %v304_v12 = vperm.slane %v300_v2, 0  ;;  %v228_v13 = vld [vmem:[%s219_s25 + $0x18] sm:$0x3]  ;;  %v233_v14 = vperm.slane %v229_v5, 4  ;;  %v311_v15 = vperm.slane %v307_v3, 1  ;;  %v312_v16 = vperm.slane %v308_v4, 1 }
  0x10   : > { %v240_v18 = vperm.slane %v229_v5, 1  ;;  %v241_v19 = vperm.slane %v229_v5, 5  ;;  %v265_v20 = vperm.slane %v229_v5, 2  ;;  %v266_v21 = vperm.slane %v229_v5, 6  ;;  %v355_v41 = vld [vmem:[%s596_s4] sm:$0x3] }
  0x11   : > { %v313_v22 = vmul.f32 %v311_v15, %v555_v8  ;;  %v314_v23 = vmul.f32 %v312_v16, %v557_v9  ;;  %v315_v24 = vmul.f32 %v311_v15, %v227_v10  ;;  %v305_v25 = vmul.f32 %v303_v11, %v555_v8 }
  0x12   : > { %v306_v26 = vmul.f32 %v304_v12, %v557_v9  ;;  %v316_v27 = vmul.f32 %v312_v16, %v228_v13  ;;  %v335_v28 = vperm.slane %v331_v7, 2  ;;  %v336_v32 = vperm.slane %v332_v17, 2 }
  0x13   : > { %v321_v29 = vrot.slane %v313_v22, 1  ;;  %v322_v30 = vrot.slane %v315_v24, 1  ;;  %v324_v31 = vrot.slane %v314_v23, 1  ;;  %v244_v33 = vperm.slane %v240_v18, 1 }
  0x14   : > { %v245_v34 = vperm.slane %v241_v19, 1  ;;  %v325_v35 = vrot.slane %v316_v27, 1  ;;  %v337_v36 = vmul.f32 %v335_v28, %v555_v8  ;;  %v338_v38 = vmul.f32 %v336_v32, %v557_v9 }
  0x15   : > { %v323_v37 = vsel %vm254_vm0, %v321_v29, %v322_v30  ;;  %v339_v39 = vmul.f32 %v335_v28, %v227_v10  ;;  %v340_v40 = vmul.f32 %v336_v32, %v228_v13  ;;  %v269_v42 = vperm.slane %v265_v20, 2 }
  0x16   : > { %v326_v43 = vsel %vm254_vm0, %v324_v31, %v325_v35  ;;  %v329_v44 = vadd.f32 %v323_v37, %v305_v25  ;;  %v345_v45 = vrot.slane %v337_v36, 2  ;;  %v348_v48 = vrot.slane %v338_v38, 2 }
  0x17   : > { %v330_v46 = vadd.f32 %v326_v43, %v306_v26  ;;  %v346_v47 = vrot.slane %v339_v39, 2  ;;  %v349_v49 = vrot.slane %v340_v40, 2  ;;  %v246_v50 = vmul.f32 %v244_v33, %v555_v8 }
  0x18   : > { %v270_v51 = vperm.slane %v266_v21, 2  ;;  %v357_v52 = vperm.slane %v355_v41, 0  ;;  %v358_v53 = vperm.slane %v355_v41, 1  ;;  %v247_v54 = vmul.f32 %v245_v34, %v557_v9 }
  0x19   : > { %v248_v55 = vmul.f32 %v244_v33, %v227_v10  ;;  %v347_v56 = vsel %vm279_vm1, %v345_v45, %v346_v47  ;;  %v350_v57 = vsel %vm279_vm1, %v348_v48, %v349_v49  ;;  %v249_v58 = vmul.f32 %v245_v34, %v228_v13 }
  0x1a   : > { %v353_v59 = vadd.f32 %v347_v56, %v329_v44  ;;  %v354_v60 = vadd.f32 %v350_v57, %v330_v46  ;;  %v236_v61 = vperm.slane %v232_v6, 0  ;;  %v237_v62 = vperm.slane %v233_v14, 0 }
  0x1b   : > { %v271_v63 = vmul.f32 %v269_v42, %v555_v8  ;;  %v272_v0 = vmul.f32 %v270_v51, %v557_v9  ;;  %v255_v3 = vrot.slane %v246_v50, 1  ;;  %v256_v4 = vrot.slane %v248_v55, 1 }
  0x1c   : > { %v361_v1 = vadd.f32 %v357_v52, %v353_v59  ;;  %v362_v2 = vadd.f32 %v358_v53, %v354_v60  ;;  %v258_v5 = vrot.slane %v247_v54, 1  ;;  %v273_v7 = vmul.f32 %v269_v42, %v227_v10 }
  0x1d   : > { %v259_v11 = vrot.slane %v249_v58, 1  ;;  %v274_v12 = vmul.f32 %v270_v51, %v228_v13  ;;  %v238_v17 = vmul.f32 %v236_v61, %v555_v8  ;;  %v239_v18 = vmul.f32 %v237_v62, %v557_v9  ;;  %v290_v8 = vld [vmem:[%s594_s2] sm:$0x3] }
  0x1e   : > { %v471_v15 = vmul.f32 -1.442695, %v361_v1  ;;  %v472_v16 = vmul.f32 -1.442695, %v362_v2  ;;  %v257_v6 = vsel %vm254_vm0, %v255_v3, %v256_v4  ;;  %v280_v14 = vrot.slane %v271_v63, 2 }
  0x1f   : > { %v281_v19 = vrot.slane %v273_v7, 2  ;;  %v260_v20 = vsel %vm254_vm0, %v258_v5, %v259_v11  ;;  %v283_v21 = vrot.slane %v272_v0, 2  ;;  %v284_v22 = vrot.slane %v274_v12, 2 }
  0x20   : > { %485 = vpow2.f32 %v471_v15  ;;  %v263_v23 = vadd.f32 %v257_v6, %v238_v17  ;;  %v264_v10 = vadd.f32 %v260_v20, %v239_v18  ;;  %v292_v28 = vperm.slane %v290_v8, 0 }
  0x21   : > { %487 = vpow2.f32 %v472_v16  ;;  %v282_v13 = vsel %vm279_vm1, %v280_v14, %v281_v19  ;;  %v285_v9 = vsel %vm279_vm1, %v283_v21, %v284_v22  ;;  %v293_v31 = vperm.slane %v290_v8, 1 }
  0x22   : > { %v288_v27 = vadd.f32 %v282_v13, %v263_v23  ;;  %v289_v30 = vadd.f32 %v285_v9, %v264_v10 }
  0x24   : > { %v296_v32 = vadd.f32 %v292_v28, %v288_v27  ;;  %v297_v33 = vadd.f32 %v293_v31, %v289_v30 }
  0x26   : > { %v486_v24 = vpop.eup %485 }
  0x27   : > { %v488_v25 = vpop.eup %487  ;;  %v371_v26 = vadd.f32 1.0, %v486_v24 }
  0x28   : > { %v372_v29 = vadd.f32 1.0, %v488_v25 }
  0x29   : > { %489 = vrcp.f32 %v371_v26  ;;  %vm378_vm2 = vweird.f32 %v371_v26  ;;  %v384_v37 = vand.u32 2147483648, %v371_v26  ;;  %v382_v40 = vand.u32 2147483647, %v371_v26 }
  0x2a   : > { %491 = vrcp.f32 %v372_v29  ;;  %v399_v41 = vand.u32 2147483648, %v372_v29  ;;  %vm393_vm4 = vweird.f32 %v372_v29  ;;  %v397_v43 = vand.u32 2147483647, %v372_v29 }
  0x2b   : > { %493 = vtanh.f32 %v296_v32  ;;  %v385_v45 = vor.u32 1.1754944e-38, %v384_v37  ;;  %vm383_vm7 = vcmp.eq.f32.partialorder %v382_v40, 8.507059e+37 }
  0x2c   : > { %495 = vtanh.f32 %v297_v33  ;;  %v400_v49 = vor.u32 1.1754944e-38, %v399_v41  ;;  %vm398_vm9 = vcmp.eq.f32.partialorder %v397_v43, 8.507059e+37 }
  0x2f   : > { %v490_v34 = vpop.eup %489 }
  0x30   : > { %v492_v35 = vpop.eup %491  ;;  %v374_v36 = vmul.f32 %v490_v34, %v371_v26  ;;  %vm379_vm3 = vweird.f32 %v490_v34 }
  0x31   : > { %v389_v38 = vmul.f32 %v492_v35, %v372_v29  ;;  %vm394_vm5 = vweird.f32 %v492_v35  ;;  %vm380_vm6 = vmor %vm378_vm2, %vm379_vm3  ;;  %v494_v47 = vpop.eup %493 }
  0x32   : > { %v375_v39 = vsub.f32 1.0, %v374_v36  ;;  %vm395_vm8 = vmor %vm393_vm4, %vm394_vm5  ;;  %v496_v50 = vpop.eup %495 }
  0x33   : > { %v390_v42 = vsub.f32 1.0, %v389_v38 }
  0x34   : > { %v376_v44 = vmul.f32 %v490_v34, %v375_v39 }
  0x35   : > { %v391_v46 = vmul.f32 %v492_v35, %v390_v42 }
  0x36   : > { %v377_v48 = vadd.f32 %v490_v34, %v376_v44 }
  0x37   : > { %v392_v51 = vadd.f32 %v492_v35, %v391_v46 }
  0x38   : > { %v381_v52 = vsel %vm380_vm6, %v490_v34, %v377_v48 }
  0x39   : > { %v386_v53 = vsel %vm383_vm7, %v385_v45, %v381_v52  ;;  %v396_v54 = vsel %vm395_vm8, %v492_v35, %v392_v51 }
  0x3a   : > { %v401_v55 = vsel %vm398_vm9, %v400_v49, %v396_v54  ;;  %v403_v56 = vmul.f32 %v494_v47, %v386_v53 }
  0x3b   : > { %v404_v57 = vmul.f32 %v496_v50, %v401_v55 }
  0x3c   : > { %405 = vst [vmem:[%s224_s10] sm:$0xff] %v403_v56 }
  0x3d   : > { %406 = vst [vmem:[%s224_s10 + $0x8] sm:$0xff] %v404_v57 }
  0x3e PF: > { %s15_s18 = sadd.s32 1, %s503_s18  }
  0x3f   : > { %p12_p4 = scmp.ge.s32.totalorder %s15_s18, 4  }
  0x41   :  { %14 = sbr.rel (!%p12_p4) target bundleno = 1 (0x1), region = 70 }

// kernel: attention_st_encoder_forward.13
= control target key start
LH: loop header
LB: loop body
LE: loop exit
PB: predicated region body
PF: predicated region fallthrough
CT: control target
= control target key end

     0   :  { %s458_s1 = inlined_call_operand.vmem [shape: f32[256,256], index: 1, kind: input, shape index: {}]   ;;  %s459_s0 = inlined_call_operand.vmem [shape: f32[16,256], index: 0, kind: input, shape index: {}]   ;;  %s460_s2 = inlined_call_operand.vmem [shape: f32[1,256], index: 2, kind: input, shape index: {}]   ;;  %s461_s3 = inlined_call_operand.vmem [shape: f32[16,256], index: 3, kind: output, shape index: {}]  }
   0x1   :  { %v61_v0 = vld [vmem:[%s458_s1 + $0xf8] sm:$0xff]  ;;  %v59_v2 = vld [vmem:[%s458_s1 + $0xe8] sm:$0xff]  ;;  %v60_v6 = vld [vmem:[%s458_s1 + $0xf0] sm:$0xff] }
   0x2   :  { %v93_v1 = vld [vmem:[%s458_s1 + $0x1f8] sm:$0xff]  ;;  %140 = vmatpush.msra.mxu2 %v61_v0  ;;  %v91_v3 = vld [vmem:[%s458_s1 + $0x1e8] sm:$0xff]  ;;  %v92_v7 = vld [vmem:[%s458_s1 + $0x1f0] sm:$0xff]  ;;  %94 = vmatpush.msra.mxu0 %v60_v6 }
   0x3   :  { %163 = vmatpush.msra.mxu3 %v93_v1  ;;  %v57_v4 = vld [vmem:[%s458_s1 + $0xd8] sm:$0xff]  ;;  %v58_v8 = vld [vmem:[%s458_s1 + $0xe0] sm:$0xff]  ;;  %117 = vmatpush.msra.mxu1 %v92_v7  ;;  %v55_v10 = vld [vmem:[%s458_s1 + $0xc8] sm:$0xff] }
   0x4   :  { %v89_v5 = vld [vmem:[%s458_s1 + $0x1d8] sm:$0xff]  ;;  %141 = vmatpush.msra.mxu2 %v59_v2  ;;  %v90_v9 = vld [vmem:[%s458_s1 + $0x1e0] sm:$0xff]  ;;  %v87_v11 = vld [vmem:[%s458_s1 + $0x1c8] sm:$0xff]  ;;  %95 = vmatpush.msra.mxu0 %v58_v8 }
   0x5   :  { %164 = vmatpush.msra.mxu3 %v91_v3  ;;  %v56_v12 = vld [vmem:[%s458_s1 + $0xd0] sm:$0xff]  ;;  %118 = vmatpush.msra.mxu1 %v90_v9  ;;  %v53_v14 = vld [vmem:[%s458_s1 + $0xb8] sm:$0xff]  ;;  %v54_v16 = vld [vmem:[%s458_s1 + $0xc0] sm:$0xff] }
   0x6   :  { %142 = vmatpush.msra.mxu2 %v57_v4  ;;  %v88_v13 = vld [vmem:[%s458_s1 + $0x1d0] sm:$0xff]  ;;  %v85_v15 = vld [vmem:[%s458_s1 + $0x1b8] sm:$0xff]  ;;  %v86_v17 = vld [vmem:[%s458_s1 + $0x1c0] sm:$0xff]  ;;  %96 = vmatpush.msra.mxu0 %v56_v12 }
   0x7   :  { %165 = vmatpush.msra.mxu3 %v89_v5  ;;  %119 = vmatpush.msra.mxu1 %v88_v13  ;;  %v51_v18 = vld [vmem:[%s458_s1 + $0xa8] sm:$0xff]  ;;  %v52_v20 = vld [vmem:[%s458_s1 + $0xb0] sm:$0xff]  ;;  %v49_v22 = vld [vmem:[%s458_s1 + $0x98] sm:$0xff] }
   0x8   :  { %143 = vmatpush.msra.mxu2 %v55_v10  ;;  %v83_v19 = vld [vmem:[%s458_s1 + $0x1a8] sm:$0xff]  ;;  %v84_v21 = vld [vmem:[%s458_s1 + $0x1b0] sm:$0xff]  ;;  %97 = vmatpush.msra.mxu0 %v54_v16  ;;  %v81_v23 = vld [vmem:[%s458_s1 + $0x198] sm:$0xff] }
   0x9   :  { %166 = vmatpush.msra.mxu3 %v87_v11  ;;  %120 = vmatpush.msra.mxu1 %v86_v17  ;;  %v50_v24 = vld [vmem:[%s458_s1 + $0xa0] sm:$0xff]  ;;  %v47_v26 = vld [vmem:[%s458_s1 + $0x88] sm:$0xff]  ;;  %v48_v28 = vld [vmem:[%s458_s1 + $0x90] sm:$0xff] }
   0xa   :  { %144 = vmatpush.msra.mxu2 %v53_v14  ;;  %v82_v25 = vld [vmem:[%s458_s1 + $0x1a0] sm:$0xff]  ;;  %98 = vmatpush.msra.mxu0 %v52_v20  ;;  %v79_v27 = vld [vmem:[%s458_s1 + $0x188] sm:$0xff]  ;;  %v80_v29 = vld [vmem:[%s458_s1 + $0x190] sm:$0xff] }
   0xb   :  { %167 = vmatpush.msra.mxu3 %v85_v15  ;;  %121 = vmatpush.msra.mxu1 %v84_v21  ;;  %v45_v30 = vld [vmem:[%s458_s1 + $0x78] sm:$0xff]  ;;  %v46_v32 = vld [vmem:[%s458_s1 + $0x80] sm:$0xff]  ;;  %v43_v34 = vld [vmem:[%s458_s1 + $0x68] sm:$0xff] }
   0xc   :  { %145 = vmatpush.msra.mxu2 %v51_v18  ;;  %99 = vmatpush.msra.mxu0 %v50_v24  ;;  %v77_v31 = vld [vmem:[%s458_s1 + $0x178] sm:$0xff]  ;;  %v78_v33 = vld [vmem:[%s458_s1 + $0x180] sm:$0xff]  ;;  %v75_v35 = vld [vmem:[%s458_s1 + $0x168] sm:$0xff] }
   0xd   :  { %168 = vmatpush.msra.mxu3 %v83_v19  ;;  %122 = vmatpush.msra.mxu1 %v82_v25  ;;  %v44_v36 = vld [vmem:[%s458_s1 + $0x70] sm:$0xff]  ;;  %v41_v38 = vld [vmem:[%s458_s1 + $0x58] sm:$0xff]  ;;  %v42_v40 = vld [vmem:[%s458_s1 + $0x60] sm:$0xff] }
   0xe   :  { %146 = vmatpush.msra.mxu2 %v49_v22  ;;  %100 = vmatpush.msra.mxu0 %v48_v28  ;;  %v76_v37 = vld [vmem:[%s458_s1 + $0x170] sm:$0xff]  ;;  %v73_v39 = vld [vmem:[%s458_s1 + $0x158] sm:$0xff]  ;;  %v74_v41 = vld [vmem:[%s458_s1 + $0x160] sm:$0xff] }
   0xf   :  { %169 = vmatpush.msra.mxu3 %v81_v23  ;;  %123 = vmatpush.msra.mxu1 %v80_v29  ;;  %v39_v42 = vld [vmem:[%s458_s1 + $0x48] sm:$0xff]  ;;  %v40_v44 = vld [vmem:[%s458_s1 + $0x50] sm:$0xff]  ;;  %v37_v46 = vld [vmem:[%s458_s1 + $0x38] sm:$0xff] }
  0x10   :  { %147 = vmatpush.msra.mxu2 %v47_v26  ;;  %101 = vmatpush.msra.mxu0 %v46_v32  ;;  %v71_v43 = vld [vmem:[%s458_s1 + $0x148] sm:$0xff]  ;;  %v72_v45 = vld [vmem:[%s458_s1 + $0x150] sm:$0xff]  ;;  %v69_v47 = vld [vmem:[%s458_s1 + $0x138] sm:$0xff] }
  0x11   :  { %170 = vmatpush.msra.mxu3 %v79_v27  ;;  %124 = vmatpush.msra.mxu1 %v78_v33  ;;  %v38_v48 = vld [vmem:[%s458_s1 + $0x40] sm:$0xff]  ;;  %v35_v50 = vld [vmem:[%s458_s1 + $0x28] sm:$0xff]  ;;  %v36_v52 = vld [vmem:[%s458_s1 + $0x30] sm:$0xff] }
  0x12   :  { %148 = vmatpush.msra.mxu2 %v45_v30  ;;  %102 = vmatpush.msra.mxu0 %v44_v36  ;;  %v70_v49 = vld [vmem:[%s458_s1 + $0x140] sm:$0xff]  ;;  %v67_v51 = vld [vmem:[%s458_s1 + $0x128] sm:$0xff]  ;;  %v68_v53 = vld [vmem:[%s458_s1 + $0x130] sm:$0xff] }
  0x13   :  { %171 = vmatpush.msra.mxu3 %v77_v31  ;;  %125 = vmatpush.msra.mxu1 %v76_v37  ;;  %v33_v54 = vld [vmem:[%s458_s1 + $0x18] sm:$0xff]  ;;  %v34_v56 = vld [vmem:[%s458_s1 + $0x20] sm:$0xff]  ;;  %v31_v58 = vld [vmem:[%s458_s1 + $0x8] sm:$0xff] }
  0x14   :  { %149 = vmatpush.msra.mxu2 %v43_v34  ;;  %103 = vmatpush.msra.mxu0 %v42_v40  ;;  %v65_v55 = vld [vmem:[%s458_s1 + $0x118] sm:$0xff]  ;;  %v66_v57 = vld [vmem:[%s458_s1 + $0x120] sm:$0xff]  ;;  %v63_v59 = vld [vmem:[%s458_s1 + $0x108] sm:$0xff] }
  0x15   :  { %172 = vmatpush.msra.mxu3 %v75_v35  ;;  %126 = vmatpush.msra.mxu1 %v74_v41  ;;  %v26_v60 = vld [vmem:[%s459_s0] sm:$0xff]  ;;  %v27_v61 = vld [vmem:[%s459_s0 + $0x8] sm:$0xff]  ;;  %v32_v62 = vld [vmem:[%s458_s1 + $0x10] sm:$0xff] }
  0x16   :  { %150 = vmatpush.msra.mxu2 %v41_v38  ;;  %104 = vmatpush.msra.mxu0 %v40_v44  ;;  %v64_v63 = vld [vmem:[%s458_s1 + $0x110] sm:$0xff]  ;;  %v30_v0 = vld [vmem:[%s458_s1] sm:$0xff]  ;;  %v29_v3 = vld [vmem:[%s459_s0 + $0x18] sm:$0xff] }
  0x17   :  { %173 = vmatpush.msra.mxu3 %v73_v39  ;;  %127 = vmatpush.msra.mxu1 %v72_v45  ;;  %v62_v1 = vld [vmem:[%s458_s1 + $0x100] sm:$0xff]  ;;  %v28_v2 = vld [vmem:[%s459_s0 + $0x10] sm:$0xff] }
  0x18   :  { %151 = vmatpush.msra.mxu2 %v39_v42  ;;  %105 = vmatpush.msra.mxu0 %v38_v48  ;;  %v201_v4 = vld [vmem:[%s460_s2] sm:$0x3] }
  0x19   :  { %174 = vmatpush.msra.mxu3 %v71_v43  ;;  %128 = vmatpush.msra.mxu1 %v70_v49  ;;  %v203_v5 = vperm.slane %v201_v4, 0  ;;  %v204_v9 = vperm.slane %v201_v4, 1 }
  0x1a   :  { %152 = vmatpush.msra.mxu2 %v37_v46  ;;  %106 = vmatpush.msra.mxu0 %v36_v52 }
  0x1b   :  { %175 = vmatpush.msra.mxu3 %v69_v47  ;;  %129 = vmatpush.msra.mxu1 %v68_v53 }
  0x1c   :  { %153 = vmatpush.msra.mxu2 %v35_v50  ;;  %107 = vmatpush.msra.mxu0 %v34_v56 }
  0x1d   :  { %176 = vmatpush.msra.mxu3 %v67_v51  ;;  %130 = vmatpush.msra.mxu1 %v66_v57 }
  0x1e   :  { %154 = vmatpush.msra.mxu2 %v33_v54  ;;  %108 = vmatpush.msra.mxu0 %v32_v62 }
  0x1f   :  { %177 = vmatpush.msra.mxu3 %v65_v55  ;;  %131 = vmatpush.msra.mxu1 %v64_v63 }
  0x20   :  { %155 = vmatpush.msra.mxu2 %v31_v58  ;;  %109 = vmatpush.msra.mxu0 %v30_v0 }
  0x21   :  { %178 = vmatpush.msra.mxu3 %v63_v59  ;;  %156 = vmatmul.f32.vlgmr.msra.gmra.mxu2 %v26_v60 }
  0x22   :  { %179 = vmatmul.f32.vlgmr.msra.gmra.mxu3 %v27_v61  ;;  %132 = vmatpush.msra.mxu1 %v62_v1 }
  0x23   :  { %110 = vmatmul.f32.vlgmr.msra.gmra.mxu0 %v26_v60  ;;  %133 = vmatmul.f32.vlgmr.msra.gmra.mxu1 %v27_v61 }
  0x29   :  { %159 = vmatmul.f32.gmra.mxu2 %v28_v2 }
  0x2a   :  { %182 = vmatmul.f32.gmra.mxu3 %v29_v3 }
  0x2b   :  { %113 = vmatmul.f32.gmra.mxu0 %v28_v2  ;;  %136 = vmatmul.f32.gmra.mxu1 %v29_v3 }
  0xa0   :  { %v111_v6 = vpop.f32.mrf.mxu0  ;;  %v134_v7 = vpop.f32.mrf.mxu1 }
  0xa1   :  { %v135_v8 = vadd.f32 %v134_v7, %v111_v6 }
  0xa3   :  { %v207_v12 = vadd.f32 %v203_v5, %v135_v8 }
  0xa4   :  { %v157_v10 = vpop.f32.mrf.mxu2 }
  0xa5   :  { %v180_v11 = vpop.f32.mrf.mxu3  ;;  %211 = vst [vmem:[%s461_s3] sm:$0xff] %v207_v12 }
  0xa6   :  { %v181_v13 = vadd.f32 %v180_v11, %v157_v10 }
  0xa8   :  { %v208_v14 = vadd.f32 %v204_v9, %v181_v13  ;;  %v114_v15 = vpop.f32.mrf.mxu0  ;;  %v137_v16 = vpop.f32.mrf.mxu1 }
  0xa9   :  { %v138_v17 = vadd.f32 %v137_v16, %v114_v15 }
  0xaa   :  { %212 = vst [vmem:[%s461_s3 + $0x8] sm:$0xff] %v208_v14 }
  0xab   :  { %v209_v20 = vadd.f32 %v203_v5, %v138_v17 }
  0xac   :  { %v160_v18 = vpop.f32.mrf.mxu2 }
  0xad   :  { %v183_v19 = vpop.f32.mrf.mxu3  ;;  %213 = vst [vmem:[%s461_s3 + $0x10] sm:$0xff] %v209_v20 }
  0xae   :  { %v184_v21 = vadd.f32 %v183_v19, %v160_v18 }
  0xb0   :  { %v210_v22 = vadd.f32 %v204_v9, %v184_v21 }
  0xb2   :  { %214 = vst [vmem:[%s461_s3 + $0x18] sm:$0xff] %v210_v22 }

// kernel: attention_st_encoder_forward.10
= control target key start
LH: loop header
LB: loop body
LE: loop exit
PB: predicated region body
PF: predicated region fallthrough
CT: control target
= control target key end

     0   :  { %s1333_s18 = smov 0   ;;  %s2210_s0 = inlined_call_operand.vmem [shape: f32[2,8,256], index: 0, kind: input, shape index: {}]   ;;  %s2211_s1 = inlined_call_operand.vmem [shape: f32[256,768], index: 1, kind: input, shape index: {}]   ;;  %s2212_s2 = inlined_call_operand.vmem [shape: f32[1,768], index: 2, kind: input, shape index: {}]   ;;  %s2213_s3 = inlined_call_operand.vmem [shape: f32[256,256], index: 3, kind: input, shape index: {}]   ;;  %s2214_s4 = inlined_call_operand.vmem [shape: f32[1,256], index: 4, kind: input, shape index: {}]   ;;  %s2215_s5 = inlined_call_operand.vmem [shape: f32[2,8,256], index: 5, kind: output, shape index: {}]  }
   0x1 LB: > { %s1236_s19 = sadd.s32 4294967295, %s1300_s18   ;;  %p1240_p0 = scmp.ge.s32.totalorder %s1300_s18, 1  ;;  %s1300_s18 = sphi %s1333_s18, %s15_s18  }
   0x2   : > { %p187_p1 = scmp.lt.s32.totalorder %s1300_s18, 3 }
   0x4   : > { %p188_p2 = pnand %p1240_p0, %p187_p1 }
   0x5   : > { %p215_p3 = scmp.lt.s32.totalorder (!%p188_p2), %s1236_s19, 1  ;;  %s1302_s15 = smov (!%p188_p2), 64  }
   0x6   : > { %191 = sbr.rel (%p188_p2) target bundleno = 1489 (0x5d1), region = 40 }
   0xb   : > { %v317_v0 = vld [vmem:[%s2211_s1 + $0x2d0] sm:$0xff]  ;;  %v311_v1 = vld [vmem:[%s2211_s1 + $0x2a0] sm:$0xff]  ;;  %s2217_s19 = smov (!%p215_p3, %s1236_s19), 1  ;;  %v318_v38 = vld [vmem:[%s2211_s1 + $0x2d8] sm:$0xff]  ;;  %vm744_vm0 = vcmask 523264   ;;  %vm771_vm1 = vcmask 64512  }
   0xc   : > { %v413_v2 = vld [vmem:[%s2211_s1 + $0x5d0] sm:$0xff]  ;;  %433 = vmatpush.msra.mxu0 %v317_v0  ;;  %v407_v3 = vld [vmem:[%s2211_s1 + $0x5a0] sm:$0xff]  ;;  %s1267_s30 = sshll.u32 %s2217_s19, 4  ;;  %v312_v41 = vld [vmem:[%s2211_s1 + $0x2a8] sm:$0xff]  ;;  %473 = vmatpush.msra.mxu2 %v318_v38 }
   0xd   : > { %453 = vmatpush.msra.mxu1 %v413_v2  ;;  %v305_v4 = vld [vmem:[%s2211_s1 + $0x270] sm:$0xff]  ;;  %v299_v6 = vld [vmem:[%s2211_s1 + $0x240] sm:$0xff]  ;;  %s219_s12 = scalar_lea.vmem %s2210_s0, %s1267_s30  ;;  %v306_v44 = vld [vmem:[%s2211_s1 + $0x278] sm:$0xff]  ;;  %s224_s21 = scalar_lea.vmem %s2215_s5, %s1267_s30 }
   0xe   : > { %v401_v5 = vld [vmem:[%s2211_s1 + $0x570] sm:$0xff]  ;;  %434 = vmatpush.msra.mxu0 %v311_v1  ;;  %v395_v7 = vld [vmem:[%s2211_s1 + $0x540] sm:$0xff]  ;;  %v1457_v35 = vld [vmem:[%s219_s12 + $0x8] sm:$0xff]  ;;  %474 = vmatpush.msra.mxu2 %v312_v41 }
   0xf   : > { %454 = vmatpush.msra.mxu1 %v407_v3  ;;  %v293_v8 = vld [vmem:[%s2211_s1 + $0x210] sm:$0xff]  ;;  %v287_v10 = vld [vmem:[%s2211_s1 + $0x1e0] sm:$0xff]  ;;  %v300_v47 = vld [vmem:[%s2211_s1 + $0x248] sm:$0xff] }
  0x10   : > { %435 = vmatpush.msra.mxu0 %v305_v4  ;;  %v389_v9 = vld [vmem:[%s2211_s1 + $0x510] sm:$0xff]  ;;  %v383_v11 = vld [vmem:[%s2211_s1 + $0x4e0] sm:$0xff]  ;;  %475 = vmatpush.msra.mxu2 %v306_v44  ;;  %v294_v50 = vld [vmem:[%s2211_s1 + $0x218] sm:$0xff] }
  0x11   : > { %455 = vmatpush.msra.mxu1 %v401_v5  ;;  %v281_v12 = vld [vmem:[%s2211_s1 + $0x1b0] sm:$0xff]  ;;  %v275_v14 = vld [vmem:[%s2211_s1 + $0x180] sm:$0xff]  ;;  %v288_v53 = vld [vmem:[%s2211_s1 + $0x1e8] sm:$0xff] }
  0x12   : > { %436 = vmatpush.msra.mxu0 %v299_v6  ;;  %v377_v13 = vld [vmem:[%s2211_s1 + $0x4b0] sm:$0xff]  ;;  %v371_v15 = vld [vmem:[%s2211_s1 + $0x480] sm:$0xff]  ;;  %476 = vmatpush.msra.mxu2 %v300_v47  ;;  %v282_v56 = vld [vmem:[%s2211_s1 + $0x1b8] sm:$0xff] }
  0x13   : > { %456 = vmatpush.msra.mxu1 %v395_v7  ;;  %v269_v16 = vld [vmem:[%s2211_s1 + $0x150] sm:$0xff]  ;;  %v263_v18 = vld [vmem:[%s2211_s1 + $0x120] sm:$0xff]  ;;  %v276_v59 = vld [vmem:[%s2211_s1 + $0x188] sm:$0xff] }
  0x14   : > { %437 = vmatpush.msra.mxu0 %v293_v8  ;;  %v365_v17 = vld [vmem:[%s2211_s1 + $0x450] sm:$0xff]  ;;  %v359_v19 = vld [vmem:[%s2211_s1 + $0x420] sm:$0xff]  ;;  %477 = vmatpush.msra.mxu2 %v294_v50  ;;  %v270_v62 = vld [vmem:[%s2211_s1 + $0x158] sm:$0xff] }
  0x15   : > { %457 = vmatpush.msra.mxu1 %v389_v9  ;;  %v257_v20 = vld [vmem:[%s2211_s1 + $0xf0] sm:$0xff]  ;;  %v251_v22 = vld [vmem:[%s2211_s1 + $0xc0] sm:$0xff]  ;;  %v264_v1 = vld [vmem:[%s2211_s1 + $0x128] sm:$0xff] }
  0x16   : > { %438 = vmatpush.msra.mxu0 %v287_v10  ;;  %v353_v21 = vld [vmem:[%s2211_s1 + $0x3f0] sm:$0xff]  ;;  %v347_v23 = vld [vmem:[%s2211_s1 + $0x3c0] sm:$0xff]  ;;  %478 = vmatpush.msra.mxu2 %v288_v53  ;;  %v258_v4 = vld [vmem:[%s2211_s1 + $0xf8] sm:$0xff] }
  0x17   : > { %458 = vmatpush.msra.mxu1 %v383_v11  ;;  %v245_v24 = vld [vmem:[%s2211_s1 + $0x90] sm:$0xff]  ;;  %v239_v26 = vld [vmem:[%s2211_s1 + $0x60] sm:$0xff]  ;;  %v252_v7 = vld [vmem:[%s2211_s1 + $0xc8] sm:$0xff] }
  0x18   : > { %439 = vmatpush.msra.mxu0 %v281_v12  ;;  %v341_v25 = vld [vmem:[%s2211_s1 + $0x390] sm:$0xff]  ;;  %v335_v27 = vld [vmem:[%s2211_s1 + $0x360] sm:$0xff]  ;;  %479 = vmatpush.msra.mxu2 %v282_v56  ;;  %v246_v10 = vld [vmem:[%s2211_s1 + $0x98] sm:$0xff] }
  0x19   : > { %459 = vmatpush.msra.mxu1 %v377_v13  ;;  %v233_v28 = vld [vmem:[%s2211_s1 + $0x30] sm:$0xff]  ;;  %v227_v30 = vld [vmem:[%s2211_s1] sm:$0xff]  ;;  %v240_v13 = vld [vmem:[%s2211_s1 + $0x68] sm:$0xff] }
  0x1a   : > { %440 = vmatpush.msra.mxu0 %v275_v14  ;;  %v329_v29 = vld [vmem:[%s2211_s1 + $0x330] sm:$0xff]  ;;  %v323_v31 = vld [vmem:[%s2211_s1 + $0x300] sm:$0xff]  ;;  %480 = vmatpush.msra.mxu2 %v276_v59  ;;  %v310_v38 = vld [vmem:[%s2211_s1 + $0x298] sm:$0xff] }
  0x1b   : > { %460 = vmatpush.msra.mxu1 %v371_v15  ;;  %v319_v32 = vld [vmem:[%s2211_s1 + $0x2e0] sm:$0xff]  ;;  %v313_v36 = vld [vmem:[%s2211_s1 + $0x2b0] sm:$0xff]  ;;  %v292_v41 = vld [vmem:[%s2211_s1 + $0x208] sm:$0xff] }
  0x1c   : > { %441 = vmatpush.msra.mxu0 %v269_v16  ;;  %v415_v33 = vld [vmem:[%s2211_s1 + $0x5e0] sm:$0xff]  ;;  %v409_v37 = vld [vmem:[%s2211_s1 + $0x5b0] sm:$0xff]  ;;  %481 = vmatpush.msra.mxu2 %v270_v62  ;;  %v234_v16 = vld [vmem:[%s2211_s1 + $0x38] sm:$0xff] }
  0x1d   : > { %461 = vmatpush.msra.mxu1 %v365_v17  ;;  %v1455_v34 = vld [vmem:[%s219_s12] sm:$0xff]  ;;  %v301_v42 = vld [vmem:[%s2211_s1 + $0x250] sm:$0xff]  ;;  %v228_v17 = vld [vmem:[%s2211_s1 + $0x8] sm:$0xff] }
  0x1e   : > { %442 = vmatpush.msra.mxu0 %v263_v18  ;;  %v307_v39 = vld [vmem:[%s2211_s1 + $0x280] sm:$0xff]  ;;  %v397_v43 = vld [vmem:[%s2211_s1 + $0x550] sm:$0xff]  ;;  %482 = vmatpush.msra.mxu2 %v264_v1  ;;  %v320_v18 = vld [vmem:[%s2211_s1 + $0x2e8] sm:$0xff] }
  0x1f   : > { %462 = vmatpush.msra.mxu1 %v359_v19  ;;  %v403_v40 = vld [vmem:[%s2211_s1 + $0x580] sm:$0xff]  ;;  %v289_v48 = vld [vmem:[%s2211_s1 + $0x1f0] sm:$0xff]  ;;  %v314_v19 = vld [vmem:[%s2211_s1 + $0x2b8] sm:$0xff] }
  0x20   : > { %443 = vmatpush.msra.mxu0 %v257_v20  ;;  %v295_v45 = vld [vmem:[%s2211_s1 + $0x220] sm:$0xff]  ;;  %v385_v49 = vld [vmem:[%s2211_s1 + $0x4f0] sm:$0xff]  ;;  %483 = vmatpush.msra.mxu2 %v258_v4  ;;  %v308_v20 = vld [vmem:[%s2211_s1 + $0x288] sm:$0xff] }
  0x21   : > { %463 = vmatpush.msra.mxu1 %v353_v21  ;;  %v391_v46 = vld [vmem:[%s2211_s1 + $0x520] sm:$0xff]  ;;  %v277_v54 = vld [vmem:[%s2211_s1 + $0x190] sm:$0xff]  ;;  %v302_v21 = vld [vmem:[%s2211_s1 + $0x258] sm:$0xff] }
  0x22   : > { %444 = vmatpush.msra.mxu0 %v251_v22  ;;  %v283_v51 = vld [vmem:[%s2211_s1 + $0x1c0] sm:$0xff]  ;;  %v373_v55 = vld [vmem:[%s2211_s1 + $0x490] sm:$0xff]  ;;  %484 = vmatpush.msra.mxu2 %v252_v7  ;;  %v296_v22 = vld [vmem:[%s2211_s1 + $0x228] sm:$0xff] }
  0x23   : > { %464 = vmatpush.msra.mxu1 %v347_v23  ;;  %v379_v52 = vld [vmem:[%s2211_s1 + $0x4c0] sm:$0xff]  ;;  %v265_v60 = vld [vmem:[%s2211_s1 + $0x130] sm:$0xff]  ;;  %v290_v23 = vld [vmem:[%s2211_s1 + $0x1f8] sm:$0xff] }
  0x24   : > { %445 = vmatpush.msra.mxu0 %v245_v24  ;;  %v271_v57 = vld [vmem:[%s2211_s1 + $0x160] sm:$0xff]  ;;  %v361_v61 = vld [vmem:[%s2211_s1 + $0x430] sm:$0xff]  ;;  %485 = vmatpush.msra.mxu2 %v246_v10  ;;  %v284_v24 = vld [vmem:[%s2211_s1 + $0x1c8] sm:$0xff] }
  0x25   : > { %465 = vmatpush.msra.mxu1 %v341_v25  ;;  %v367_v58 = vld [vmem:[%s2211_s1 + $0x460] sm:$0xff]  ;;  %v253_v2 = vld [vmem:[%s2211_s1 + $0xd0] sm:$0xff]  ;;  %v278_v25 = vld [vmem:[%s2211_s1 + $0x198] sm:$0xff] }
  0x26   : > { %446 = vmatpush.msra.mxu0 %v239_v26  ;;  %v259_v63 = vld [vmem:[%s2211_s1 + $0x100] sm:$0xff]  ;;  %v349_v3 = vld [vmem:[%s2211_s1 + $0x3d0] sm:$0xff]  ;;  %486 = vmatpush.msra.mxu2 %v240_v13  ;;  %v272_v26 = vld [vmem:[%s2211_s1 + $0x168] sm:$0xff] }
  0x27   : > { %466 = vmatpush.msra.mxu1 %v335_v27  ;;  %v355_v0 = vld [vmem:[%s2211_s1 + $0x400] sm:$0xff]  ;;  %v241_v8 = vld [vmem:[%s2211_s1 + $0x70] sm:$0xff]  ;;  %v266_v27 = vld [vmem:[%s2211_s1 + $0x138] sm:$0xff] }
  0x28   : > { %447 = vmatpush.msra.mxu0 %v233_v28  ;;  %v247_v5 = vld [vmem:[%s2211_s1 + $0xa0] sm:$0xff]  ;;  %v337_v9 = vld [vmem:[%s2211_s1 + $0x370] sm:$0xff]  ;;  %487 = vmatpush.msra.mxu2 %v234_v16  ;;  %v260_v28 = vld [vmem:[%s2211_s1 + $0x108] sm:$0xff] }
  0x29   : > { %467 = vmatpush.msra.mxu1 %v329_v29  ;;  %v343_v6 = vld [vmem:[%s2211_s1 + $0x3a0] sm:$0xff]  ;;  %v229_v14 = vld [vmem:[%s2211_s1 + $0x10] sm:$0xff]  ;;  %v254_v29 = vld [vmem:[%s2211_s1 + $0xd8] sm:$0xff] }
  0x2a   : > { %448 = vmatpush.msra.mxu0 %v227_v30  ;;  %v235_v11 = vld [vmem:[%s2211_s1 + $0x40] sm:$0xff]  ;;  %v325_v15 = vld [vmem:[%s2211_s1 + $0x310] sm:$0xff]  ;;  %488 = vmatpush.msra.mxu2 %v228_v17  ;;  %v248_v30 = vld [vmem:[%s2211_s1 + $0xa8] sm:$0xff] }
  0x2b   : > { %468 = vmatpush.msra.mxu1 %v323_v31  ;;  %449 = vmatmul.f32.vlgmr.msra.gmra.mxu0 %v1455_v34  ;;  %v331_v12 = vld [vmem:[%s2211_s1 + $0x340] sm:$0xff]  ;;  %v242_v31 = vld [vmem:[%s2211_s1 + $0x78] sm:$0xff]  ;;  %v256_v47 = vld [vmem:[%s2211_s1 + $0xe8] sm:$0xff] }
  0x2c   : > { %513 = vmatpush.msrb.mxu0 %v319_v32  ;;  %469 = vmatmul.f32.vlgmr.msra.gmra.mxu1 %v1457_v35  ;;  %v236_v32 = vld [vmem:[%s2211_s1 + $0x48] sm:$0xff]  ;;  %v274_v44 = vld [vmem:[%s2211_s1 + $0x178] sm:$0xff] }
  0x2d   : > { %533 = vmatpush.msrb.mxu1 %v415_v33  ;;  %553 = vmatpush.msrb.mxu2 %v320_v18  ;;  %v230_v33 = vld [vmem:[%s2211_s1 + $0x18] sm:$0xff]  ;;  %v408_v53 = vld [vmem:[%s2211_s1 + $0x5a8] sm:$0xff] }
  0x2e   : > { %514 = vmatpush.msrb.mxu0 %v313_v36  ;;  %489 = vmatmul.f32.vlgmr.msra.gmra.mxu2 %v1455_v34  ;;  %v322_v36 = vld [vmem:[%s2211_s1 + $0x2f8] sm:$0xff]  ;;  %v372_v59 = vld [vmem:[%s2211_s1 + $0x488] sm:$0xff] }
  0x2f   : > { %534 = vmatpush.msrb.mxu1 %v409_v37  ;;  %554 = vmatpush.msrb.mxu2 %v314_v19  ;;  %v316_v37 = vld [vmem:[%s2211_s1 + $0x2c8] sm:$0xff]  ;;  %v238_v50 = vld [vmem:[%s2211_s1 + $0x58] sm:$0xff] }
  0x30   : > { %515 = vmatpush.msrb.mxu0 %v307_v39  ;;  %v304_v39 = vld [vmem:[%s2211_s1 + $0x268] sm:$0xff]  ;;  %v390_v56 = vld [vmem:[%s2211_s1 + $0x518] sm:$0xff] }
  0x31   : > { %535 = vmatpush.msrb.mxu1 %v403_v40  ;;  %555 = vmatpush.msrb.mxu2 %v308_v20  ;;  %v298_v40 = vld [vmem:[%s2211_s1 + $0x238] sm:$0xff]  ;;  %v336_v7 = vld [vmem:[%s2211_s1 + $0x368] sm:$0xff] }
  0x32   : > { %516 = vmatpush.msrb.mxu0 %v301_v42  ;;  %v286_v42 = vld [vmem:[%s2211_s1 + $0x1d8] sm:$0xff]  ;;  %v404_v18 = vld [vmem:[%s2211_s1 + $0x588] sm:$0xff] }
  0x33   : > { %536 = vmatpush.msrb.mxu1 %v397_v43  ;;  %556 = vmatpush.msrb.mxu2 %v302_v21  ;;  %v280_v43 = vld [vmem:[%s2211_s1 + $0x1a8] sm:$0xff]  ;;  %v354_v1 = vld [vmem:[%s2211_s1 + $0x3f8] sm:$0xff] }
  0x34   : > { %517 = vmatpush.msrb.mxu0 %v295_v45  ;;  %v268_v45 = vld [vmem:[%s2211_s1 + $0x148] sm:$0xff]  ;;  %v410_v17 = vld [vmem:[%s2211_s1 + $0x5b8] sm:$0xff] }
  0x35   : > { %537 = vmatpush.msrb.mxu1 %v391_v46  ;;  %557 = vmatpush.msrb.mxu2 %v296_v22  ;;  %v262_v46 = vld [vmem:[%s2211_s1 + $0x118] sm:$0xff]  ;;  %v392_v20 = vld [vmem:[%s2211_s1 + $0x528] sm:$0xff] }
  0x36   : > { %518 = vmatpush.msrb.mxu0 %v289_v48  ;;  %v250_v48 = vld [vmem:[%s2211_s1 + $0xb8] sm:$0xff]  ;;  %v380_v22 = vld [vmem:[%s2211_s1 + $0x4c8] sm:$0xff] }
  0x37   : > { %538 = vmatpush.msrb.mxu1 %v385_v49  ;;  %558 = vmatpush.msrb.mxu2 %v290_v23  ;;  %v244_v49 = vld [vmem:[%s2211_s1 + $0x88] sm:$0xff]  ;;  %v398_v19 = vld [vmem:[%s2211_s1 + $0x558] sm:$0xff]  ;;  %v321_v23 = vld [vmem:[%s2211_s1 + $0x2f0] sm:$0xff] }
  0x38   : > { %519 = vmatpush.msrb.mxu0 %v283_v51  ;;  %v232_v51 = vld [vmem:[%s2211_s1 + $0x28] sm:$0xff]  ;;  %v386_v21 = vld [vmem:[%s2211_s1 + $0x4f8] sm:$0xff] }
  0x39   : > { %539 = vmatpush.msrb.mxu1 %v379_v52  ;;  %559 = vmatpush.msrb.mxu2 %v284_v24  ;;  %v414_v52 = vld [vmem:[%s2211_s1 + $0x5d8] sm:$0xff] }
  0x3a   : > { %520 = vmatpush.msrb.mxu0 %v277_v54  ;;  %493 = vmatpush.msra.mxu3 %v414_v52  ;;  %v402_v54 = vld [vmem:[%s2211_s1 + $0x578] sm:$0xff]  ;;  %v369_v52 = vld [vmem:[%s2211_s1 + $0x470] sm:$0xff] }
  0x3b   : > { %540 = vmatpush.msrb.mxu1 %v373_v55  ;;  %560 = vmatpush.msrb.mxu2 %v278_v25  ;;  %v396_v55 = vld [vmem:[%s2211_s1 + $0x548] sm:$0xff]  ;;  %v374_v24 = vld [vmem:[%s2211_s1 + $0x498] sm:$0xff]  ;;  %v315_v25 = vld [vmem:[%s2211_s1 + $0x2c0] sm:$0xff] }
  0x3c   : > { %521 = vmatpush.msrb.mxu0 %v271_v57  ;;  %494 = vmatpush.msra.mxu3 %v408_v53  ;;  %v384_v57 = vld [vmem:[%s2211_s1 + $0x4e8] sm:$0xff]  ;;  %v418_v53 = vld [vmem:[%s2211_s1 + $0x5f8] sm:$0xff] }
  0x3d   : > { %541 = vmatpush.msrb.mxu1 %v367_v58  ;;  %561 = vmatpush.msrb.mxu2 %v272_v26  ;;  %v378_v58 = vld [vmem:[%s2211_s1 + $0x4b8] sm:$0xff]  ;;  %v417_v26 = vld [vmem:[%s2211_s1 + $0x5f0] sm:$0xff] }
  0x3e   : > { %522 = vmatpush.msrb.mxu0 %v265_v60  ;;  %495 = vmatpush.msra.mxu3 %v402_v54  ;;  %v366_v60 = vld [vmem:[%s2211_s1 + $0x458] sm:$0xff]  ;;  %v412_v54 = vld [vmem:[%s2211_s1 + $0x5c8] sm:$0xff] }
  0x3f   : > { %542 = vmatpush.msrb.mxu1 %v361_v61  ;;  %562 = vmatpush.msrb.mxu2 %v266_v27  ;;  %v368_v27 = vld [vmem:[%s2211_s1 + $0x468] sm:$0xff] }
  0x40   : > { %523 = vmatpush.msrb.mxu0 %v259_v63  ;;  %496 = vmatpush.msra.mxu3 %v396_v55  ;;  %v1730_v63 = vld [vmem:[%s2212_s2] sm:$0x3f]  ;;  %v261_v55 = vld [vmem:[%s2211_s1 + $0x110] sm:$0xff] }
  0x41   : > { %543 = vmatpush.msrb.mxu1 %v355_v0  ;;  %563 = vmatpush.msrb.mxu2 %v260_v28  ;;  %v360_v0 = vld [vmem:[%s2211_s1 + $0x428] sm:$0xff]  ;;  %v423_v4 = vperm.slane %v1730_v63, 2  ;;  %v309_v28 = vld [vmem:[%s2211_s1 + $0x290] sm:$0xff] }
  0x42   : > { %524 = vmatpush.msrb.mxu0 %v253_v2  ;;  %497 = vmatpush.msra.mxu3 %v390_v56  ;;  %v421_v2 = vperm.slane %v1730_v63, 0  ;;  %v363_v56 = vld [vmem:[%s2211_s1 + $0x440] sm:$0xff] }
  0x43   : > { %544 = vmatpush.msrb.mxu1 %v349_v3  ;;  %564 = vmatpush.msrb.mxu2 %v254_v29  ;;  %v348_v3 = vld [vmem:[%s2211_s1 + $0x3c8] sm:$0xff]  ;;  %v411_v29 = vld [vmem:[%s2211_s1 + $0x5c0] sm:$0xff] }
  0x44   : > { %525 = vmatpush.msrb.mxu0 %v247_v5  ;;  %498 = vmatpush.msra.mxu3 %v384_v57  ;;  %v342_v5 = vld [vmem:[%s2211_s1 + $0x398] sm:$0xff]  ;;  %v255_v57 = vld [vmem:[%s2211_s1 + $0xe0] sm:$0xff] }
  0x45   : > { %545 = vmatpush.msrb.mxu1 %v343_v6  ;;  %565 = vmatpush.msrb.mxu2 %v248_v30  ;;  %v362_v30 = vld [vmem:[%s2211_s1 + $0x438] sm:$0xff] }
  0x46   : > { %526 = vmatpush.msrb.mxu0 %v241_v8  ;;  %499 = vmatpush.msra.mxu3 %v378_v58  ;;  %v357_v58 = vld [vmem:[%s2211_s1 + $0x410] sm:$0xff] }
  0x47   : > { %546 = vmatpush.msrb.mxu1 %v337_v9  ;;  %566 = vmatpush.msrb.mxu2 %v242_v31  ;;  %v303_v31 = vld [vmem:[%s2211_s1 + $0x260] sm:$0xff] }
  0x48   : > { %527 = vmatpush.msrb.mxu0 %v235_v11  ;;  %500 = vmatpush.msra.mxu3 %v372_v59  ;;  %v330_v11 = vld [vmem:[%s2211_s1 + $0x338] sm:$0xff] }
  0x49   : > { %547 = vmatpush.msrb.mxu1 %v331_v12  ;;  %567 = vmatpush.msrb.mxu2 %v236_v32  ;;  %v405_v32 = vld [vmem:[%s2211_s1 + $0x590] sm:$0xff]  ;;  %v406_v59 = vld [vmem:[%s2211_s1 + $0x598] sm:$0xff] }
  0x4a   : > { %528 = vmatpush.msrb.mxu0 %v229_v14  ;;  %501 = vmatpush.msra.mxu3 %v366_v60  ;;  %v324_v14 = vld [vmem:[%s2211_s1 + $0x308] sm:$0xff]  ;;  %v249_v60 = vld [vmem:[%s2211_s1 + $0xb0] sm:$0xff] }
  0x4b   : > { %548 = vmatpush.msrb.mxu1 %v325_v15  ;;  %529 = vmatmul.f32.vlgmr.msrb.gmra.mxu0 %v1455_v34  ;;  %v416_v15 = vld [vmem:[%s2211_s1 + $0x5e8] sm:$0xff] }
  0x4c   : > { %549 = vmatmul.f32.vlgmr.msrb.gmra.mxu1 %v1457_v35  ;;  %568 = vmatpush.msrb.mxu2 %v230_v33  ;;  %v356_v33 = vld [vmem:[%s2211_s1 + $0x408] sm:$0xff] }
  0x4d   : > { %569 = vmatmul.f32.vlgmr.msrb.gmra.mxu2 %v1455_v34  ;;  %502 = vmatpush.msra.mxu3 %v360_v0  ;;  %v243_v0 = vld [vmem:[%s2211_s1 + $0x80] sm:$0xff] }
  0x4e   : > { %633 = vmatpush.msra.mxu2 %v322_v36  ;;  %593 = vmatpush.msra.mxu0 %v321_v23  ;;  %v297_v36 = vld [vmem:[%s2211_s1 + $0x230] sm:$0xff]  ;;  %v677_v23 = vld [vmem:[%s2213_s3 + $0x20] sm:$0xff] }
  0x4f   : > { %503 = vmatpush.msra.mxu3 %v354_v1  ;;  %613 = vmatpush.msra.mxu1 %v417_v26  ;;  %v345_v1 = vld [vmem:[%s2211_s1 + $0x3b0] sm:$0xff] }
  0x50   : > { %634 = vmatpush.msra.mxu2 %v316_v37  ;;  %594 = vmatpush.msra.mxu0 %v315_v25  ;;  %v399_v37 = vld [vmem:[%s2211_s1 + $0x560] sm:$0xff] }
  0x51   : > { %504 = vmatpush.msra.mxu3 %v348_v3  ;;  %614 = vmatpush.msra.mxu1 %v411_v29  ;;  %v237_v3 = vld [vmem:[%s2211_s1 + $0x50] sm:$0xff] }
  0x52   : > { %635 = vmatpush.msra.mxu2 %v310_v38  ;;  %595 = vmatpush.msra.mxu0 %v309_v28  ;;  %v350_v38 = vld [vmem:[%s2211_s1 + $0x3d8] sm:$0xff]  ;;  %v422_v28 = vperm.slane %v1730_v63, 1 }
  0x53   : > { %505 = vmatpush.msra.mxu3 %v342_v5  ;;  %615 = vmatpush.msra.mxu1 %v405_v32  ;;  %v388_v5 = vld [vmem:[%s2211_s1 + $0x508] sm:$0xff]  ;;  %v675_v32 = vld [vmem:[%s2213_s3 + $0x10] sm:$0xff] }
  0x54   : > { %636 = vmatpush.msra.mxu2 %v304_v39  ;;  %596 = vmatpush.msra.mxu0 %v303_v31  ;;  %v291_v39 = vld [vmem:[%s2211_s1 + $0x200] sm:$0xff] }
  0x55   : > { %506 = vmatpush.msra.mxu3 %v336_v7  ;;  %616 = vmatpush.msra.mxu1 %v399_v37  ;;  %v333_v7 = vld [vmem:[%s2211_s1 + $0x350] sm:$0xff] }
  0x56   : > { %637 = vmatpush.msra.mxu2 %v298_v40  ;;  %597 = vmatpush.msra.mxu0 %v297_v36  ;;  %v393_v40 = vld [vmem:[%s2211_s1 + $0x530] sm:$0xff] }
  0x57   : > { %507 = vmatpush.msra.mxu3 %v330_v11  ;;  %617 = vmatpush.msra.mxu1 %v393_v40  ;;  %v364_v11 = vld [vmem:[%s2211_s1 + $0x448] sm:$0xff] }
  0x58   : > { %638 = vmatpush.msra.mxu2 %v292_v41  ;;  %598 = vmatpush.msra.mxu0 %v291_v39  ;;  %v344_v41 = vld [vmem:[%s2211_s1 + $0x3a8] sm:$0xff] }
  0x59   : > { %508 = vmatpush.msra.mxu3 %v324_v14  ;;  %v340_v14 = vld [vmem:[%s2211_s1 + $0x388] sm:$0xff] }
  0x5a   : > { %639 = vmatpush.msra.mxu2 %v286_v42  ;;  %509 = vmatmul.f32.vlgmr.msra.gmra.mxu3 %v1457_v35  ;;  %v285_v42 = vld [vmem:[%s2211_s1 + $0x1d0] sm:$0xff] }
  0x5b   : > { %573 = vmatpush.msrb.mxu3 %v416_v15  ;;  %599 = vmatpush.msra.mxu0 %v285_v42  ;;  %v334_v15 = vld [vmem:[%s2211_s1 + $0x358] sm:$0xff]  ;;  %v425_v42 = vperm.slane %v1730_v63, 4 }
  0x5c   : > { %640 = vmatpush.msra.mxu2 %v280_v43  ;;  %v387_v43 = vld [vmem:[%s2211_s1 + $0x500] sm:$0xff] }
  0x5d   : > { %574 = vmatpush.msrb.mxu3 %v410_v17  ;;  %618 = vmatpush.msra.mxu1 %v387_v43  ;;  %v327_v17 = vld [vmem:[%s2211_s1 + $0x320] sm:$0xff] }
  0x5e   : > { %641 = vmatpush.msra.mxu2 %v274_v44  ;;  %v338_v44 = vld [vmem:[%s2211_s1 + $0x378] sm:$0xff] }
  0x5f   : > { %575 = vmatpush.msrb.mxu3 %v404_v18 }
  0x60   : > { %642 = vmatpush.msra.mxu2 %v268_v45  ;;  %v279_v45 = vld [vmem:[%s2211_s1 + $0x1a0] sm:$0xff] }
  0x61   : > { %576 = vmatpush.msrb.mxu3 %v398_v19  ;;  %600 = vmatpush.msra.mxu0 %v279_v45  ;;  %v687_v19 = vld [vmem:[%s2213_s3 + $0x70] sm:$0xff] }
  0x62   : > { %643 = vmatpush.msra.mxu2 %v262_v46  ;;  %v381_v46 = vld [vmem:[%s2211_s1 + $0x4d0] sm:$0xff] }
  0x63   : > { %577 = vmatpush.msrb.mxu3 %v392_v20  ;;  %619 = vmatpush.msra.mxu1 %v381_v46  ;;  %v685_v20 = vld [vmem:[%s2213_s3 + $0x60] sm:$0xff] }
  0x64   : > { %644 = vmatpush.msra.mxu2 %v256_v47  ;;  %v332_v47 = vld [vmem:[%s2211_s1 + $0x348] sm:$0xff] }
  0x65   : > { %578 = vmatpush.msrb.mxu3 %v386_v21  ;;  %v683_v21 = vld [vmem:[%s2213_s3 + $0x50] sm:$0xff] }
  0x66   : > { %645 = vmatpush.msra.mxu2 %v250_v48  ;;  %v273_v48 = vld [vmem:[%s2211_s1 + $0x170] sm:$0xff] }
  0x67   : > { %579 = vmatpush.msrb.mxu3 %v380_v22  ;;  %601 = vmatpush.msra.mxu0 %v273_v48  ;;  %v681_v22 = vld [vmem:[%s2213_s3 + $0x40] sm:$0xff] }
  0x68   : > { %646 = vmatpush.msra.mxu2 %v244_v49  ;;  %v375_v49 = vld [vmem:[%s2211_s1 + $0x4a0] sm:$0xff] }
  0x69   : > { %580 = vmatpush.msrb.mxu3 %v374_v24  ;;  %620 = vmatpush.msra.mxu1 %v375_v49 }
  0x6a   : > { %647 = vmatpush.msra.mxu2 %v238_v50  ;;  %v326_v50 = vld [vmem:[%s2211_s1 + $0x318] sm:$0xff] }
  0x6b   : > { %581 = vmatpush.msrb.mxu3 %v368_v27  ;;  %621 = vmatpush.msra.mxu1 %v369_v52 }
  0x6c   : > { %648 = vmatpush.msra.mxu2 %v232_v51  ;;  %v267_v51 = vld [vmem:[%s2211_s1 + $0x140] sm:$0xff] }
  0x6d   : > { %649 = vmatmul.f32.vlgmr.msra.gmra.mxu2 %v1455_v34  ;;  %582 = vmatpush.msrb.mxu3 %v362_v30 }
  0x6e   : > { %602 = vmatpush.msra.mxu0 %v267_v51  ;;  %622 = vmatpush.msra.mxu1 %v363_v56  ;;  %v703_v56 = vld [vmem:[%s2213_s3 + $0xf0] sm:$0xff] }
  0x6f   : > { %583 = vmatpush.msrb.mxu3 %v356_v33  ;;  %v673_v33 = vld [vmem:[%s2213_s3] sm:$0xff] }
  0x70   : > { %603 = vmatpush.msra.mxu0 %v261_v55  ;;  %623 = vmatpush.msra.mxu1 %v357_v58  ;;  %v688_v55 = vld [vmem:[%s2213_s3 + $0x78] sm:$0xff]  ;;  %v701_v58 = vld [vmem:[%s2213_s3 + $0xe0] sm:$0xff] }
  0x71   : > { %584 = vmatpush.msrb.mxu3 %v350_v38  ;;  %v424_v38 = vperm.slane %v1730_v63, 3 }
  0x72   : > { %604 = vmatpush.msra.mxu0 %v255_v57  ;;  %v686_v57 = vld [vmem:[%s2213_s3 + $0x68] sm:$0xff] }
  0x73   : > { %585 = vmatpush.msrb.mxu3 %v344_v41 }
  0x74   : > { %605 = vmatpush.msra.mxu0 %v249_v60  ;;  %v699_v60 = vld [vmem:[%s2213_s3 + $0xd0] sm:$0xff] }
  0x75   : > { %586 = vmatpush.msrb.mxu3 %v338_v44 }
  0x76   : > { %606 = vmatpush.msra.mxu0 %v243_v0  ;;  %v680_v0 = vld [vmem:[%s2213_s3 + $0x38] sm:$0xff] }
  0x77   : > { %587 = vmatpush.msrb.mxu3 %v332_v47 }
  0x78   : > { %607 = vmatpush.msra.mxu0 %v237_v3  ;;  %v693_v3 = vld [vmem:[%s2213_s3 + $0xa0] sm:$0xff] }
  0x79   : > { %588 = vmatpush.msrb.mxu3 %v326_v50 }
  0x7a   : > { %589 = vmatmul.f32.vlgmr.msrb.gmra.mxu3 %v1457_v35 }
  0x7b   : > { %653 = vmatpush.msra.mxu3 %v418_v53 }
  0x7d   : > { %654 = vmatpush.msra.mxu3 %v412_v54 }
  0x7f   : > { %655 = vmatpush.msra.mxu3 %v406_v59  ;;  %v684_v59 = vld [vmem:[%s2213_s3 + $0x58] sm:$0xff] }
  0xa8   : > { %v450_v61 = vpop.f32.mrf.mxu0 }
  0xa9   : > { %v470_v62 = vpop.f32.mrf.mxu1  ;;  %v451_v6 = vadd.f32 %v450_v61, %v421_v2  ;;  %v351_v61 = vld [vmem:[%s2211_s1 + $0x3e0] sm:$0xff]  ;;  %v394_v2 = vld [vmem:[%s2211_s1 + $0x538] sm:$0xff] }
  0xaa   : > { %624 = vmatpush.msra.mxu1 %v351_v61  ;;  %v682_v61 = vld [vmem:[%s2213_s3 + $0x48] sm:$0xff] }
  0xab   : > { %v471_v12 = vadd.f32 %v470_v62, %v451_v6  ;;  %v400_v62 = vld [vmem:[%s2211_s1 + $0x568] sm:$0xff]  ;;  %v231_v6 = vld [vmem:[%s2211_s1 + $0x20] sm:$0xff] }
  0xac   : > { %656 = vmatpush.msra.mxu3 %v400_v62  ;;  %625 = vmatpush.msra.mxu1 %v345_v1  ;;  %v697_v62 = vld [vmem:[%s2213_s3 + $0xc0] sm:$0xff]  ;;  %v695_v1 = vld [vmem:[%s2213_s3 + $0xb0] sm:$0xff] }
  0xad   : > { %v743_v16 = vmul.f32 0.125, %v471_v12  ;;  %608 = vmatpush.msra.mxu0 %v231_v6  ;;  %v358_v12 = vld [vmem:[%s2211_s1 + $0x418] sm:$0xff]  ;;  %v674_v6 = vld [vmem:[%s2213_s3 + $0x8] sm:$0xff] }
  0xae   : > { %657 = vmatpush.msra.mxu3 %v394_v2  ;;  %609 = vmatmul.f32.vlgmr.msra.gmra.mxu0 %v1455_v34  ;;  %v352_v34 = vld [vmem:[%s2211_s1 + $0x3e8] sm:$0xff] }
  0xaf   : > { %v678_v2 = vld [vmem:[%s2213_s3 + $0x28] sm:$0xff] }
  0xb0   : > { %658 = vmatpush.msra.mxu3 %v388_v5  ;;  %v691_v5 = vld [vmem:[%s2213_s3 + $0x90] sm:$0xff] }
  0xb1   : > { %v490_v18 = vpop.f32.mrf.mxu2 }
  0xb2   : > { %v491_v29 = vadd.f32 %v490_v18, %v422_v28  ;;  %v692_v28 = vld [vmem:[%s2213_s3 + $0x98] sm:$0xff] }
  0xc8   : > { %v530_v8 = vpop.f32.mrf.mxu0 }
  0xc9   : > { %v550_v9 = vpop.f32.mrf.mxu1  ;;  %v531_v10 = vadd.f32 %v530_v8, %v423_v4  ;;  %v339_v4 = vld [vmem:[%s2211_s1 + $0x380] sm:$0xff]  ;;  %v382_v8 = vld [vmem:[%s2211_s1 + $0x4d8] sm:$0xff] }
  0xca   : > { %626 = vmatpush.msra.mxu1 %v339_v4  ;;  %659 = vmatpush.msra.mxu3 %v382_v8  ;;  %v676_v4 = vld [vmem:[%s2213_s3 + $0x18] sm:$0xff] }
  0xcb   : > { %v551_v13 = vadd.f32 %v550_v9, %v531_v10  ;;  %v376_v9 = vld [vmem:[%s2211_s1 + $0x4a8] sm:$0xff]  ;;  %v370_v10 = vld [vmem:[%s2211_s1 + $0x478] sm:$0xff] }
  0xcc   : > { %627 = vmatpush.msra.mxu1 %v333_v7  ;;  %660 = vmatpush.msra.mxu3 %v376_v9  ;;  %v689_v7 = vld [vmem:[%s2213_s3 + $0x80] sm:$0xff] }
  0xcd   : > { %853 = vrot.lane.b32.xlu0 %v551_v13, %s1302_s15  ;;  %1245 = vmatpush.xpose.msk.msrb.mxu2 %vm744_vm0, %v551_v13  ;;  %v346_v13 = vld [vmem:[%s2211_s1 + $0x3b8] sm:$0xff] }
  0xce   : > { %661 = vmatpush.msra.mxu3 %v370_v10  ;;  %628 = vmatpush.msra.mxu1 %v327_v17 }
  0xcf   : > { %629 = vmatmul.f32.vlgmr.msra.gmra.mxu1 %v1457_v35 }
  0xd0   : > { %1246 = vmatmul.msk.f32.vlgmr.msrb.gmra.mxu2 %vm744_vm0, %v743_v16  ;;  %662 = vmatpush.msra.mxu3 %v364_v11  ;;  %v570_v25 = vpop.f32.mrf.mxu2 }
  0xd1   : > { %817 = vmatpush.msra.mxu2 %v687_v19  ;;  %v571_v39 = vadd.f32 %v570_v25, %v424_v38  ;;  %v698_v25 = vld [vmem:[%s2213_s3 + $0xc8] sm:$0xff]  ;;  %v2088_v38 = vld [vmem:[%s2214_s4] sm:$0x3] }
  0xd2   : > { %663 = vmatpush.msra.mxu3 %v358_v12 }
  0xd3   : > { %818 = vmatpush.msra.mxu2 %v685_v20 }
  0xd4   : > { %664 = vmatpush.msra.mxu3 %v352_v34 }
  0xd5   : > { %851 = vrot.lane.b32.xlu0 %v743_v16, %s1302_s15  ;;  %v328_v16 = vld [vmem:[%s2211_s1 + $0x328] sm:$0xff]  ;;  %819 = vmatpush.msra.mxu2 %v683_v21  ;;  %v704_v21 = vld [vmem:[%s2213_s3 + $0xf8] sm:$0xff] }
  0xd6   : > { %665 = vmatpush.msra.mxu3 %v346_v13  ;;  %v426_v13 = vperm.slane %v1730_v63, 5 }
  0xd7   : > { %820 = vmatpush.msra.mxu2 %v681_v22  ;;  %v702_v22 = vld [vmem:[%s2213_s3 + $0xe8] sm:$0xff] }
  0xd8   : > { %666 = vmatpush.msra.mxu3 %v340_v14 }
  0xda   : > { %667 = vmatpush.msra.mxu3 %v334_v15 }
  0xdc   : > { %668 = vmatpush.msra.mxu3 %v328_v16 }
  0xdd   : > { %669 = vmatmul.f32.vlgmr.msra.gmra.mxu3 %v1457_v35  ;;  %v679_v35 = vld [vmem:[%s2213_s3 + $0x30] sm:$0xff]  ;;  %v510_v31 = vpop.f32.mrf.mxu3 }
  0xde   : > { %821 = vmatpush.msra.mxu2 %v679_v35  ;;  %v1986_v37 = vadd.f32 %v510_v31, %v491_v29  ;;  %v700_v35 = vld [vmem:[%s2213_s3 + $0xd8] sm:$0xff] }
  0xe0   : > { %822 = vmatpush.msra.mxu2 %v677_v23  ;;  %v962_v20 = vmul.f32 0.125, %v1986_v37 }
  0xe2   : > { %823 = vmatpush.msra.mxu2 %v675_v32 }
  0xe4   : > { %824 = vmatpush.msra.mxu2 %v673_v33 }
  0xf0   : > { %v1976_v27 = vpop.f32.mrf.mxu2 }
  0xf1   : > { %v651_v14 = vadd.f32 %v1976_v27, %v426_v13  ;;  %v694_v27 = vld [vmem:[%s2213_s3 + $0xa8] sm:$0xff]  ;;  %v731_v13 = vld [vmem:[%s2213_s3 + $0x1d0] sm:$0xff] }
  0xfd   : > { %v590_v40 = vpop.f32.mrf.mxu3 }
  0xfe   : > { %v591_v41 = vadd.f32 %v590_v40, %v571_v39  ;;  %v739_v39 = vperm.slane %v2088_v38, 0 }
 0x100   : > { %1255 = vmatpush.xpose.msk.msrb.mxu2 %vm744_vm0, %v591_v41 }
 0x12b   : > { %v610_v43 = vpop.f32.mrf.mxu0 }
 0x12c   : > { %v611_v44 = vadd.f32 %v610_v43, %v425_v42 }
 0x13f   : > { %v854_v24 = vpop.permute.xlu0 %853 }
 0x140   : > { %1250 = vmatpush.xpose.msk.msrb.mxu0 %vm744_vm0, %v854_v24 }
 0x144   : > { %928 = vmatpush.msra.mxu0 %v703_v56 }
 0x146   : > { %929 = vmatpush.msra.mxu0 %v701_v58  ;;  %v719_v58 = vld [vmem:[%s2213_s3 + $0x170] sm:$0xff] }
 0x147   : > { %v852_v26 = vpop.permute.xlu0 %851 }
 0x148   : > { %1251 = vmatmul.msk.f32.vlgmr.msrb.gmra.mxu0 %vm744_vm0, %v852_v26  ;;  %v696_v26 = vld [vmem:[%s2213_s3 + $0xb8] sm:$0xff] }
 0x149   : > { %930 = vmatpush.msra.mxu0 %v699_v60  ;;  %v717_v60 = vld [vmem:[%s2213_s3 + $0x160] sm:$0xff] }
 0x14b   : > { %931 = vmatpush.msra.mxu0 %v697_v62  ;;  %v715_v62 = vld [vmem:[%s2213_s3 + $0x150] sm:$0xff] }
 0x14c   : > { %v630_v45 = vpop.f32.mrf.mxu1 }
 0x14d   : > { %v631_v46 = vadd.f32 %v630_v45, %v611_v44  ;;  %932 = vmatpush.msra.mxu0 %v695_v1  ;;  %v713_v1 = vld [vmem:[%s2213_s3 + $0x140] sm:$0xff] }
 0x14f   : > { %801 = vmatpush.msrb.mxu3 %v631_v46  ;;  %891 = vrot.lane.b32.xlu0 %v631_v46, %s1302_s15 }
 0x150   : > { %933 = vmatpush.msra.mxu0 %v693_v3  ;;  %v711_v3 = vld [vmem:[%s2213_s3 + $0x130] sm:$0xff] }
 0x151   : > { %837 = vmatpush.msra.mxu3 %v688_v55 }
 0x152   : > { %934 = vmatpush.msra.mxu0 %v691_v5  ;;  %v709_v5 = vld [vmem:[%s2213_s3 + $0x120] sm:$0xff] }
 0x153   : > { %v768_v30 = vpop.f32.mrf.mxu2  ;;  %838 = vmatpush.msra.mxu3 %v686_v57 }
 0x154   : > { %v772_v36 = vsel %vm771_vm1, %v768_v30, -inf  ;;  %935 = vmatpush.msra.mxu0 %v689_v7  ;;  %v707_v7 = vld [vmem:[%s2213_s3 + $0x110] sm:$0xff] }
 0x155   : > { %773 = vmax.xlane.f32.xlu1 %v772_v36  ;;  %839 = vmatpush.msra.mxu3 %v684_v59  ;;  %v720_v59 = vld [vmem:[%s2213_s3 + $0x178] sm:$0xff] }
 0x157   : > { %840 = vmatpush.msra.mxu3 %v682_v61  ;;  %v718_v61 = vld [vmem:[%s2213_s3 + $0x168] sm:$0xff] }
 0x159   : > { %841 = vmatpush.msra.mxu3 %v680_v0  ;;  %v716_v0 = vld [vmem:[%s2213_s3 + $0x158] sm:$0xff] }
 0x15b   : > { %842 = vmatpush.msra.mxu3 %v678_v2  ;;  %v714_v2 = vld [vmem:[%s2213_s3 + $0x148] sm:$0xff] }
 0x15d   : > { %843 = vmatpush.msra.mxu3 %v676_v4  ;;  %v712_v4 = vld [vmem:[%s2213_s3 + $0x138] sm:$0xff] }
 0x15f   : > { %844 = vmatpush.msra.mxu3 %v674_v6  ;;  %v710_v6 = vld [vmem:[%s2213_s3 + $0x128] sm:$0xff] }
 0x160   : > { %v670_v15 = vpop.f32.mrf.mxu3 }
 0x161   : > { %v2046_v18 = vadd.f32 %v670_v15, %v651_v14  ;;  %v729_v14 = vld [vmem:[%s2213_s3 + $0x1c0] sm:$0xff]  ;;  %v727_v15 = vld [vmem:[%s2213_s3 + $0x1b0] sm:$0xff] }
 0x1c1   : > { %v892_v54 = vpop.permute.xlu0 %891 }
 0x1c2   : > { %912 = vmatpush.msrb.mxu1 %v892_v54 }
 0x1c4   : > { %948 = vmatpush.msra.mxu1 %v704_v21  ;;  %v734_v21 = vld [vmem:[%s2213_s3 + $0x1e8] sm:$0xff] }
 0x1c5   : > { %v876_v47 = vpop.f32.mrf.mxu0 }
 0x1c6   : > { %v879_v48 = vsel %vm771_vm1, %v876_v47, -inf  ;;  %949 = vmatpush.msra.mxu1 %v702_v22  ;;  %v732_v22 = vld [vmem:[%s2213_s3 + $0x1d8] sm:$0xff] }
 0x1c7   : > { %880 = vmax.xlane.f32.xlu1 %v879_v48 }
 0x1c8   : > { %v774_v49 = vpop.xlane.xlu1 %773  ;;  %950 = vmatpush.msra.mxu1 %v700_v35  ;;  %v730_v35 = vld [vmem:[%s2213_s3 + $0x1c8] sm:$0xff] }
 0x1c9   : > { %v775_v50 = vsub.f32 %v768_v30, %v774_v49  ;;  %v690_v30 = vld [vmem:[%s2213_s3 + $0x88] sm:$0xff] }
 0x1ca   : > { %951 = vmatpush.msra.mxu1 %v698_v25 }
 0x1cb   : > { %v776_v51 = vmul.f32 1.442695, %v775_v50 }
 0x1cc   : > { %952 = vmatpush.msra.mxu1 %v696_v26  ;;  %v724_v26 = vld [vmem:[%s2213_s3 + $0x198] sm:$0xff] }
 0x1cd   : > { %1278 = vpow2.f32 %v776_v51 }
 0x1ce   : > { %953 = vmatpush.msra.mxu1 %v694_v27 }
 0x1d0   : > { %954 = vmatpush.msra.mxu1 %v692_v28  ;;  %v721_v28 = vld [vmem:[%s2213_s3 + $0x180] sm:$0xff] }
 0x1d2   : > { %955 = vmatpush.msra.mxu1 %v690_v30 }
 0x1d3   : > { %v1279_v52 = vpop.eup %1278 }
 0x1d4   : > { %v778_v53 = vsel %vm771_vm1, %v1279_v52, 0.0 }
 0x1d5   : > { %779 = vadd.xlane.f32.xlu2 %v778_v53 }
 0x1e0   : > { %1070 = vrot.lane.b32.xlu1 %v591_v41, %s1302_s15 }
 0x23a   : > { %v881_v8 = vpop.xlane.xlu1 %880 }
 0x23b   : > { %v882_v9 = vsub.f32 %v876_v47, %v881_v8  ;;  %v708_v8 = vld [vmem:[%s2213_s3 + $0x118] sm:$0xff] }
 0x23d   : > { %v883_v10 = vmul.f32 1.442695, %v882_v9 }
 0x23f   : > { %1280 = vpow2.f32 %v883_v10  ;;  %v705_v10 = vld [vmem:[%s2213_s3 + $0x100] sm:$0xff] }
 0x245   : > { %v1281_v11 = vpop.eup %1280 }
 0x246   : > { %v885_v12 = vsel %vm771_vm1, %v1281_v11, 0.0 }
 0x247   : > { %886 = vadd.xlane.f32.xlu2 %v885_v12  ;;  %v735_v12 = vld [vmem:[%s2213_s3 + $0x1f0] sm:$0xff] }
 0x248   : > { %v780_v34 = vpop.xlane.xlu2 %779 }
 0x249   : > { %1282 = vrcp.f32 %v780_v34  ;;  %v733_v34 = vld [vmem:[%s2213_s3 + $0x1e0] sm:$0xff] }
 0x24f   : > { %v1283_v16 = vpop.eup %1282 }
 0x250   : > { %v782_v17 = vmul.f32 %v1283_v16, %v1279_v52 }
 0x252   : > { %1247 = vmatmul.msk.f32.vlgmr.msrb.gmra.mxu3 %vm771_vm1, %v782_v17  ;;  %v1071_v19 = vpop.permute.xlu1 %1070  ;;  %v725_v17 = vld [vmem:[%s2213_s3 + $0x1a0] sm:$0xff] }
 0x253   : > { %1018 = vmatpush.msrb.mxu3 %v2046_v18  ;;  %1260 = vmatpush.xpose.msk.msrb.mxu0 %vm744_vm0, %v1071_v19 }
 0x25f   : > { %1068 = vrot.lane.b32.xlu2 %v962_v20, %s1302_s15 }
 0x2ba   : > { %v887_v63 = vpop.xlane.xlu2 %886 }
 0x2bb   : > { %1284 = vrcp.f32 %v887_v63  ;;  %v736_v63 = vld [vmem:[%s2213_s3 + $0x1f8] sm:$0xff] }
 0x2c1   : > { %v1285_v23 = vpop.eup %1284 }
 0x2c2   : > { %v889_v24 = vmul.f32 %v1285_v23, %v1281_v11  ;;  %v1069_v32 = vpop.permute.xlu2 %1068  ;;  %v706_v11 = vld [vmem:[%s2213_s3 + $0x108] sm:$0xff]  ;;  %v728_v23 = vld [vmem:[%s2213_s3 + $0x1b8] sm:$0xff] }
 0x2c4   : > { %1252 = vmatmul.msk.f32.vlgmr.msrb.gmra.mxu1 %vm771_vm1, %v889_v24  ;;  %v726_v24 = vld [vmem:[%s2213_s3 + $0x1a8] sm:$0xff] }
 0x2d5   : > { %v803_v29 = vpop.f32.mrf.mxu3 }
 0x2d6   : > { %1248 = vmatmul.msk.f32.vlgmr.msra.gmra.mxu2 %vm744_vm0, %v803_v29  ;;  %1249 = vmatmul.msk.f32.vlgmr.msra.gmra.mxu3 %vm744_vm0, %v803_v29  ;;  %v722_v29 = vld [vmem:[%s2213_s3 + $0x188] sm:$0xff] }
 0x2d7   : > { %1034 = vmatpush.msra.mxu2 %v719_v58  ;;  %1054 = vmatpush.msra.mxu3 %v720_v59 }
 0x2d9   : > { %1035 = vmatpush.msra.mxu2 %v717_v60  ;;  %1055 = vmatpush.msra.mxu3 %v718_v61 }
 0x2db   : > { %1036 = vmatpush.msra.mxu2 %v715_v62  ;;  %1056 = vmatpush.msra.mxu3 %v716_v0 }
 0x2dd   : > { %1037 = vmatpush.msra.mxu2 %v713_v1  ;;  %1057 = vmatpush.msra.mxu3 %v714_v2 }
 0x2de   : > { %1256 = vmatmul.msk.f32.vlgmr.msrb.gmra.mxu2 %vm744_vm0, %v962_v20 }
 0x2df   : > { %1038 = vmatpush.msra.mxu2 %v711_v3  ;;  %1058 = vmatpush.msra.mxu3 %v712_v4 }
 0x2e1   : > { %1039 = vmatpush.msra.mxu2 %v709_v5  ;;  %1059 = vmatpush.msra.mxu3 %v710_v6 }
 0x2e3   : > { %1040 = vmatpush.msra.mxu2 %v707_v7  ;;  %1060 = vmatpush.msra.mxu3 %v708_v8 }
 0x2e5   : > { %1041 = vmatpush.msra.mxu2 %v705_v10  ;;  %1061 = vmatpush.msra.mxu3 %v706_v11 }
 0x341   : > { %v914_v31 = vpop.f32.mrf.mxu1 }
 0x342   : > { %1253 = vmatmul.msk.f32.vlgmr.msra.gmra.mxu0 %vm744_vm0, %v914_v31  ;;  %1254 = vmatmul.msk.f32.vlgmr.msra.gmra.mxu1 %vm744_vm0, %v914_v31 }
 0x343   : > { %1145 = vmatpush.msra.mxu0 %v735_v12 }
 0x345   : > { %1146 = vmatpush.msra.mxu0 %v733_v34 }
 0x347   : > { %1147 = vmatpush.msra.mxu0 %v731_v13 }
 0x349   : > { %1148 = vmatpush.msra.mxu0 %v729_v14 }
 0x34a   : > { %1261 = vmatmul.msk.f32.vlgmr.msrb.gmra.mxu0 %vm744_vm0, %v1069_v32  ;;  %v740_v32 = vperm.slane %v2088_v38, 1 }
 0x34b   : > { %1149 = vmatpush.msra.mxu0 %v727_v15 }
 0x34d   : > { %1150 = vmatpush.msra.mxu0 %v725_v17 }
 0x359   : > { %v826_v33 = vpop.f32.mrf.mxu2  ;;  %v846_v25 = vpop.f32.mrf.mxu3 }
 0x35a   : > { %v849_v40 = vadd.f32 %v826_v33, %v739_v39  ;;  %v850_v33 = vadd.f32 %v846_v25, %v740_v32 }
 0x361   : > { %v986_v36 = vpop.f32.mrf.mxu2 }
 0x362   : > { %v989_v37 = vsel %vm771_vm1, %v986_v36, -inf }
 0x363   : > { %990 = vmax.xlane.f32.xlu0 %v989_v37 }
 0x3bf   : > { %v937_v41 = vpop.f32.mrf.mxu0  ;;  %v957_v30 = vpop.f32.mrf.mxu1 }
 0x3c0   : > { %v2091_v42 = vadd.f32 %v937_v41, %v849_v40  ;;  %v961_v39 = vadd.f32 %v957_v30, %v850_v33 }
 0x3c7   : > { %v1093_v43 = vpop.f32.mrf.mxu0 }
 0x3c8   : > { %v1096_v44 = vsel %vm771_vm1, %v1093_v43, -inf }
 0x3c9   : > { %1097 = vmax.xlane.f32.xlu2 %v1096_v44 }
 0x3d6   : > { %v991_v45 = vpop.xlane.xlu0 %990 }
 0x3d7   : > { %v992_v46 = vsub.f32 %v986_v36, %v991_v45 }
 0x3d9   : > { %v993_v47 = vmul.f32 1.442695, %v992_v46 }
 0x3db   : > { %1286 = vpow2.f32 %v993_v47 }
 0x3e1   : > { %v1287_v48 = vpop.eup %1286 }
 0x3e2   : > { %v995_v49 = vsel %vm771_vm1, %v1287_v48, 0.0 }
 0x3e3   : > { %996 = vadd.xlane.f32.xlu1 %v995_v49 }
 0x43c   : > { %v1098_v50 = vpop.xlane.xlu2 %1097 }
 0x43d   : > { %v1099_v51 = vsub.f32 %v1093_v43, %v1098_v50 }
 0x43f   : > { %v1100_v52 = vmul.f32 1.442695, %v1099_v51 }
 0x441   : > { %1288 = vpow2.f32 %v1100_v52 }
 0x447   : > { %v1289_v53 = vpop.eup %1288 }
 0x448   : > { %v1102_v54 = vsel %vm771_vm1, %v1289_v53, 0.0 }
 0x449   : > { %1103 = vadd.xlane.f32.xlu0 %v1102_v54 }
 0x456   : > { %v997_v55 = vpop.xlane.xlu1 %996 }
 0x457   : > { %1290 = vrcp.f32 %v997_v55 }
 0x45d   : > { %v1291_v56 = vpop.eup %1290  ;;  %1108 = vrot.lane.b32.xlu0 %v2046_v18, %s1302_s15  ;;  %v723_v18 = vld [vmem:[%s2213_s3 + $0x190] sm:$0xff] }
 0x45e   : > { %v999_v57 = vmul.f32 %v1291_v56, %v1287_v48  ;;  %1151 = vmatpush.msra.mxu0 %v723_v18 }
 0x460   : > { %1257 = vmatmul.msk.f32.vlgmr.msrb.gmra.mxu3 %vm771_vm1, %v999_v57  ;;  %1152 = vmatpush.msra.mxu0 %v721_v28 }
 0x4bc   : > { %v1104_v9 = vpop.xlane.xlu0 %1103 }
 0x4bd   : > { %1292 = vrcp.f32 %v1104_v9 }
 0x4c3   : > { %v1293_v16 = vpop.eup %1292 }
 0x4c4   : > { %v1106_v19 = vmul.f32 %v1293_v16, %v1289_v53 }
 0x4cf   : > { %v1109_v20 = vpop.permute.xlu0 %1108 }
 0x4d0   : > { %1129 = vmatpush.msrb.mxu1 %v1109_v20 }
 0x4d1   : > { %1262 = vmatmul.msk.f32.vlgmr.msrb.gmra.mxu1 %vm771_vm1, %v1106_v19 }
 0x4d2   : > { %1165 = vmatpush.msra.mxu1 %v736_v63 }
 0x4d4   : > { %1166 = vmatpush.msra.mxu1 %v734_v21 }
 0x4d6   : > { %1167 = vmatpush.msra.mxu1 %v732_v22 }
 0x4d8   : > { %1168 = vmatpush.msra.mxu1 %v730_v35 }
 0x4da   : > { %1169 = vmatpush.msra.mxu1 %v728_v23 }
 0x4dc   : > { %1170 = vmatpush.msra.mxu1 %v726_v24 }
 0x4de   : > { %1171 = vmatpush.msra.mxu1 %v724_v26 }
 0x4e0   : > { %1172 = vmatpush.msra.mxu1 %v722_v29 }
 0x4e3   : > { %v1020_v27 = vpop.f32.mrf.mxu3 }
 0x4e4   : > { %1258 = vmatmul.msk.f32.vlgmr.msra.gmra.mxu2 %vm744_vm0, %v1020_v27  ;;  %1259 = vmatmul.msk.f32.vlgmr.msra.gmra.mxu3 %vm744_vm0, %v1020_v27 }
 0x54e   : > { %v1131_v31 = vpop.f32.mrf.mxu1 }
 0x54f   : > { %1263 = vmatmul.msk.f32.vlgmr.msra.gmra.mxu0 %vm744_vm0, %v1131_v31  ;;  %1264 = vmatmul.msk.f32.vlgmr.msra.gmra.mxu1 %vm744_vm0, %v1131_v31 }
 0x567   : > { %v1043_v36 = vpop.f32.mrf.mxu2  ;;  %v1063_v37 = vpop.f32.mrf.mxu3 }
 0x568   : > { %v1066_v40 = vadd.f32 %v1043_v36, %v2091_v42  ;;  %v1067_v41 = vadd.f32 %v1063_v37, %v961_v39 }
 0x5cc   : > { %v1154_v43 = vpop.f32.mrf.mxu0  ;;  %v1174_v44 = vpop.f32.mrf.mxu1 }
 0x5cd   : > { %v1177_v45 = vadd.f32 %v1154_v43, %v1066_v40  ;;  %v1178_v46 = vadd.f32 %v1174_v44, %v1067_v41 }
 0x5cf   : > { %1179 = vst [vmem:[%s224_s21] sm:$0xff] %v1177_v45 }
 0x5d0   : > { %1180 = vst [vmem:[%s224_s21 + $0x8] sm:$0xff] %v1178_v46 }
 0x5d1 PF: > { %s15_s18 = sadd.s32 1, %s1300_s18  }
 0x5d2   : > { %p12_p4 = scmp.ge.s32.totalorder %s15_s18, 4  }
 0x5d4   :  { %14 = sbr.rel (!%p12_p4) target bundleno = 1 (0x1), region = 70 }

// kernel: attention_st_encoder_forward.15
= control target key start
LH: loop header
LB: loop body
LE: loop exit
PB: predicated region body
PF: predicated region fallthrough
CT: control target
= control target key end

     0   :  { %vm18_vm0 = vcmask 523264   ;;  %s463_s1 = inlined_call_operand.vmem [shape: f32[512,64], index: 1, kind: input, shape index: {}]   ;;  %s464_s0 = inlined_call_operand.vmem [shape: f32[16,512], index: 0, kind: input, shape index: {}]   ;;  %s465_s2 = inlined_call_operand.vmem [shape: f32[1,64], index: 2, kind: input, shape index: {}]   ;;  %s466_s3 = inlined_call_operand.vmem [shape: f32[16,64], index: 3, kind: output, shape index: {}]  }
   0x1   :  { %v78_v0 = vld [vmem:[%s463_s1 + $0x178] sm:$0xff]  ;;  %v77_v1 = vld [vmem:[%s463_s1 + $0x170] sm:$0xff]  ;;  %v76_v5 = vld [vmem:[%s463_s1 + $0x168] sm:$0xff] }
   0x2   :  { %v94_v2 = vld [vmem:[%s463_s1 + $0x1f8] sm:$0xff]  ;;  %141 = vmatpush.msra.mxu2 %v78_v0  ;;  %v93_v6 = vld [vmem:[%s463_s1 + $0x1f0] sm:$0xff]  ;;  %v92_v9 = vld [vmem:[%s463_s1 + $0x1e8] sm:$0xff] }
   0x3   :  { %164 = vmatpush.msra.mxu3 %v94_v2  ;;  %v46_v3 = vld [vmem:[%s463_s1 + $0x78] sm:$0xff]  ;;  %v45_v7 = vld [vmem:[%s463_s1 + $0x70] sm:$0xff]  ;;  %v44_v10 = vld [vmem:[%s463_s1 + $0x68] sm:$0xff] }
   0x4   :  { %v62_v4 = vld [vmem:[%s463_s1 + $0xf8] sm:$0xff]  ;;  %95 = vmatpush.msra.mxu0 %v46_v3  ;;  %v61_v8 = vld [vmem:[%s463_s1 + $0xf0] sm:$0xff]  ;;  %142 = vmatpush.msra.mxu2 %v77_v1  ;;  %v75_v11 = vld [vmem:[%s463_s1 + $0x160] sm:$0xff] }
   0x5   :  { %118 = vmatpush.msra.mxu1 %v62_v4  ;;  %165 = vmatpush.msra.mxu3 %v93_v6  ;;  %v60_v12 = vld [vmem:[%s463_s1 + $0xe8] sm:$0xff]  ;;  %v91_v13 = vld [vmem:[%s463_s1 + $0x1e0] sm:$0xff]  ;;  %v74_v16 = vld [vmem:[%s463_s1 + $0x158] sm:$0xff] }
   0x6   :  { %96 = vmatpush.msra.mxu0 %v45_v7  ;;  %143 = vmatpush.msra.mxu2 %v76_v5  ;;  %v43_v14 = vld [vmem:[%s463_s1 + $0x60] sm:$0xff]  ;;  %v90_v17 = vld [vmem:[%s463_s1 + $0x1d8] sm:$0xff]  ;;  %v73_v20 = vld [vmem:[%s463_s1 + $0x150] sm:$0xff] }
   0x7   :  { %119 = vmatpush.msra.mxu1 %v61_v8  ;;  %166 = vmatpush.msra.mxu3 %v92_v9  ;;  %v59_v15 = vld [vmem:[%s463_s1 + $0xe0] sm:$0xff]  ;;  %v42_v18 = vld [vmem:[%s463_s1 + $0x58] sm:$0xff]  ;;  %v89_v21 = vld [vmem:[%s463_s1 + $0x1d0] sm:$0xff]  ;;  %v211_v8 = vmov 0.0  }
   0x8   :  { %97 = vmatpush.msra.mxu0 %v44_v10  ;;  %144 = vmatpush.msra.mxu2 %v75_v11  ;;  %v58_v19 = vld [vmem:[%s463_s1 + $0xd8] sm:$0xff]  ;;  %v41_v22 = vld [vmem:[%s463_s1 + $0x50] sm:$0xff]  ;;  %v72_v24 = vld [vmem:[%s463_s1 + $0x148] sm:$0xff]  ;;  %19 = vst.msk [vmem:[#allocation2] sm:$0xff] %vm18_vm0, %v211_v8 }
   0x9   :  { %120 = vmatpush.msra.mxu1 %v60_v12  ;;  %167 = vmatpush.msra.mxu3 %v91_v13  ;;  %v57_v23 = vld [vmem:[%s463_s1 + $0xd0] sm:$0xff]  ;;  %v88_v25 = vld [vmem:[%s463_s1 + $0x1c8] sm:$0xff]  ;;  %v71_v28 = vld [vmem:[%s463_s1 + $0x140] sm:$0xff]  ;;  %20 = vst.msk [vmem:[#allocation2 + $0x8] sm:$0xff] %vm18_vm0, %v211_v8 }
   0xa   :  { %98 = vmatpush.msra.mxu0 %v43_v14  ;;  %145 = vmatpush.msra.mxu2 %v74_v16  ;;  %v40_v26 = vld [vmem:[%s463_s1 + $0x48] sm:$0xff]  ;;  %v87_v29 = vld [vmem:[%s463_s1 + $0x1c0] sm:$0xff]  ;;  %v70_v32 = vld [vmem:[%s463_s1 + $0x138] sm:$0xff] }
   0xb   :  { %121 = vmatpush.msra.mxu1 %v59_v15  ;;  %168 = vmatpush.msra.mxu3 %v90_v17  ;;  %v56_v27 = vld [vmem:[%s463_s1 + $0xc8] sm:$0xff]  ;;  %v39_v30 = vld [vmem:[%s463_s1 + $0x40] sm:$0xff]  ;;  %v86_v33 = vld [vmem:[%s463_s1 + $0x1b8] sm:$0xff] }
   0xc   :  { %99 = vmatpush.msra.mxu0 %v42_v18  ;;  %146 = vmatpush.msra.mxu2 %v73_v20  ;;  %v55_v31 = vld [vmem:[%s463_s1 + $0xc0] sm:$0xff]  ;;  %v38_v34 = vld [vmem:[%s463_s1 + $0x38] sm:$0xff]  ;;  %v69_v36 = vld [vmem:[%s463_s1 + $0x130] sm:$0xff] }
   0xd   :  { %122 = vmatpush.msra.mxu1 %v58_v19  ;;  %169 = vmatpush.msra.mxu3 %v89_v21  ;;  %v54_v35 = vld [vmem:[%s463_s1 + $0xb8] sm:$0xff]  ;;  %v85_v37 = vld [vmem:[%s463_s1 + $0x1b0] sm:$0xff]  ;;  %v68_v40 = vld [vmem:[%s463_s1 + $0x128] sm:$0xff] }
   0xe   :  { %100 = vmatpush.msra.mxu0 %v41_v22  ;;  %147 = vmatpush.msra.mxu2 %v72_v24  ;;  %v37_v38 = vld [vmem:[%s463_s1 + $0x30] sm:$0xff]  ;;  %v84_v41 = vld [vmem:[%s463_s1 + $0x1a8] sm:$0xff]  ;;  %v67_v44 = vld [vmem:[%s463_s1 + $0x120] sm:$0xff] }
   0xf   :  { %123 = vmatpush.msra.mxu1 %v57_v23  ;;  %170 = vmatpush.msra.mxu3 %v88_v25  ;;  %v53_v39 = vld [vmem:[%s463_s1 + $0xb0] sm:$0xff]  ;;  %v36_v42 = vld [vmem:[%s463_s1 + $0x28] sm:$0xff]  ;;  %v83_v45 = vld [vmem:[%s463_s1 + $0x1a0] sm:$0xff] }
  0x10   :  { %101 = vmatpush.msra.mxu0 %v40_v26  ;;  %148 = vmatpush.msra.mxu2 %v71_v28  ;;  %v52_v43 = vld [vmem:[%s463_s1 + $0xa8] sm:$0xff]  ;;  %v35_v46 = vld [vmem:[%s463_s1 + $0x20] sm:$0xff]  ;;  %v66_v48 = vld [vmem:[%s463_s1 + $0x118] sm:$0xff] }
  0x11   :  { %124 = vmatpush.msra.mxu1 %v56_v27  ;;  %171 = vmatpush.msra.mxu3 %v87_v29  ;;  %v51_v47 = vld [vmem:[%s463_s1 + $0xa0] sm:$0xff]  ;;  %v82_v49 = vld [vmem:[%s463_s1 + $0x198] sm:$0xff]  ;;  %v65_v52 = vld [vmem:[%s463_s1 + $0x110] sm:$0xff] }
  0x12   :  { %102 = vmatpush.msra.mxu0 %v39_v30  ;;  %149 = vmatpush.msra.mxu2 %v70_v32  ;;  %v34_v50 = vld [vmem:[%s463_s1 + $0x18] sm:$0xff]  ;;  %v81_v53 = vld [vmem:[%s463_s1 + $0x190] sm:$0xff]  ;;  %v64_v56 = vld [vmem:[%s463_s1 + $0x108] sm:$0xff] }
  0x13   :  { %125 = vmatpush.msra.mxu1 %v55_v31  ;;  %172 = vmatpush.msra.mxu3 %v86_v33  ;;  %v50_v51 = vld [vmem:[%s463_s1 + $0x98] sm:$0xff]  ;;  %v33_v54 = vld [vmem:[%s463_s1 + $0x10] sm:$0xff]  ;;  %v80_v57 = vld [vmem:[%s463_s1 + $0x188] sm:$0xff] }
  0x14   :  { %103 = vmatpush.msra.mxu0 %v38_v34  ;;  %150 = vmatpush.msra.mxu2 %v69_v36  ;;  %v49_v55 = vld [vmem:[%s463_s1 + $0x90] sm:$0xff]  ;;  %v32_v58 = vld [vmem:[%s463_s1 + $0x8] sm:$0xff]  ;;  %v63_v60 = vld [vmem:[%s463_s1 + $0x100] sm:$0xff] }
  0x15   :  { %126 = vmatpush.msra.mxu1 %v54_v35  ;;  %173 = vmatpush.msra.mxu3 %v85_v37  ;;  %v48_v59 = vld [vmem:[%s463_s1 + $0x88] sm:$0xff]  ;;  %v79_v61 = vld [vmem:[%s463_s1 + $0x180] sm:$0xff]  ;;  %v25_v62 = vld [vmem:[%s464_s0 + $0x10] sm:$0xff] }
  0x16   :  { %104 = vmatpush.msra.mxu0 %v37_v38  ;;  %151 = vmatpush.msra.mxu2 %v68_v40  ;;  %v26_v63 = vld [vmem:[%s464_s0 + $0x18] sm:$0xff]  ;;  %v31_v0 = vld [vmem:[%s463_s1] sm:$0xff]  ;;  %v24_v3 = vld [vmem:[%s464_s0 + $0x8] sm:$0xff] }
  0x17   :  { %127 = vmatpush.msra.mxu1 %v53_v39  ;;  %174 = vmatpush.msra.mxu3 %v84_v41  ;;  %v47_v1 = vld [vmem:[%s463_s1 + $0x80] sm:$0xff]  ;;  %v29_v4 = vld [vmem:[%s464_s0 + $0x30] sm:$0xff]  ;;  %v30_v5 = vld [vmem:[%s464_s0 + $0x38] sm:$0xff] }
  0x18   :  { %105 = vmatpush.msra.mxu0 %v36_v42  ;;  %152 = vmatpush.msra.mxu2 %v67_v44  ;;  %v23_v2 = vld [vmem:[%s464_s0] sm:$0xff]  ;;  %v28_v7 = vld [vmem:[%s464_s0 + $0x28] sm:$0xff] }
  0x19   :  { %128 = vmatpush.msra.mxu1 %v52_v43  ;;  %175 = vmatpush.msra.mxu3 %v83_v45  ;;  %v27_v6 = vld [vmem:[%s464_s0 + $0x20] sm:$0xff]  ;;  %v22_v24 = vld [vmem:[#allocation2 + $0x8] sm:$0xff] }
  0x1a   :  { %106 = vmatpush.msra.mxu0 %v35_v46  ;;  %153 = vmatpush.msra.mxu2 %v66_v48  ;;  %v21_v15 = vld [vmem:[#allocation2] sm:$0xff] }
  0x1b   :  { %129 = vmatpush.msra.mxu1 %v51_v47  ;;  %176 = vmatpush.msra.mxu3 %v82_v49  ;;  %v210_v25 = vld [vmem:[%s465_s2] ss:$0 sm:$0xff] }
  0x1c   :  { %107 = vmatpush.msra.mxu0 %v34_v50  ;;  %154 = vmatpush.msra.mxu2 %v65_v52 }
  0x1d   :  { %130 = vmatpush.msra.mxu1 %v50_v51  ;;  %177 = vmatpush.msra.mxu3 %v81_v53 }
  0x1e   :  { %108 = vmatpush.msra.mxu0 %v33_v54  ;;  %155 = vmatpush.msra.mxu2 %v64_v56 }
  0x1f   :  { %131 = vmatpush.msra.mxu1 %v49_v55  ;;  %178 = vmatpush.msra.mxu3 %v80_v57 }
  0x20   :  { %109 = vmatpush.msra.mxu0 %v32_v58  ;;  %156 = vmatpush.msra.mxu2 %v63_v60 }
  0x21   :  { %132 = vmatpush.msra.mxu1 %v48_v59  ;;  %179 = vmatpush.msra.mxu3 %v79_v61 }
  0x22   :  { %157 = vmatmul.f32.vlgmr.msra.gmra.mxu2 %v25_v62  ;;  %180 = vmatmul.f32.vlgmr.msra.gmra.mxu3 %v26_v63 }
  0x23   :  { %110 = vmatpush.msra.mxu0 %v31_v0  ;;  %133 = vmatpush.msra.mxu1 %v47_v1 }
  0x24   :  { %111 = vmatmul.f32.vlgmr.msra.gmra.mxu0 %v23_v2  ;;  %134 = vmatmul.f32.vlgmr.msra.gmra.mxu1 %v24_v3 }
  0x2a   :  { %160 = vmatmul.f32.gmra.mxu2 %v29_v4  ;;  %183 = vmatmul.f32.gmra.mxu3 %v30_v5 }
  0x2c   :  { %114 = vmatmul.f32.gmra.mxu0 %v27_v6  ;;  %137 = vmatmul.f32.gmra.mxu1 %v28_v7 }
  0xa1   :  { %v112_v9 = vpop.f32.mrf.mxu0  ;;  %v135_v10 = vpop.f32.mrf.mxu1 }
  0xa2   :  { %v136_v11 = vadd.f32 %v135_v10, %v112_v9 }
  0xa5   :  { %v158_v12 = vpop.f32.mrf.mxu2  ;;  %v181_v13 = vpop.f32.mrf.mxu3 }
  0xa6   :  { %v159_v14 = vadd.f32 %v158_v12, %v136_v11 }
  0xa8   :  { %v182_v16 = vadd.f32 %v181_v13, %v159_v14 }
  0xa9   :  { %v115_v17 = vpop.f32.mrf.mxu0  ;;  %v138_v18 = vpop.f32.mrf.mxu1 }
  0xaa   :  { %v187_v19 = vadd.f32 %v182_v16, %v21_v15  ;;  %v139_v20 = vadd.f32 %v138_v18, %v115_v17 }
  0xac   :  { %190 = vst.msk [vmem:[#allocation2] sm:$0xff] %vm18_vm0, %v187_v19 }
  0xad   :  { %v161_v21 = vpop.f32.mrf.mxu2  ;;  %v184_v22 = vpop.f32.mrf.mxu3 }
  0xae   :  { %v162_v23 = vadd.f32 %v161_v21, %v139_v20 }
  0xb0   :  { %v185_v26 = vadd.f32 %v184_v22, %v162_v23 }
  0xb2   :  { %v188_v27 = vadd.f32 %v185_v26, %v22_v24 }
  0xb3   :  { %v195_v28 = vld [vmem:[#allocation2] sm:$0xff] }
  0xb4   :  { %v201_v29 = vadd.f32 %v210_v25, %v195_v28  ;;  %191 = vst.msk [vmem:[#allocation2 + $0x8] sm:$0xff] %vm18_vm0, %v188_v27 }
  0xb6   :  { %203 = vst.msk [vmem:[%s466_s3] sm:$0xff] %vm18_vm0, %v201_v29 }
  0xbb   :  { %v196_v30 = vld [vmem:[#allocation2 + $0x8] sm:$0xff] }
  0xbc   :  { %v202_v31 = vadd.f32 %v210_v25, %v196_v30 }
  0xbe   :  { %204 = vst.msk [vmem:[%s466_s3 + $0x8] sm:$0xff] %vm18_vm0, %v202_v31 }

</bundles_post_ra>
